<compile_context>
chip_gen: v7x
topology: tpu7x:2x2x1
jax: 0.10.0
libtpu: 0.0.40
codegen_flags: <defaults>
</compile_context>

<pallas_src>
import functools

import jax
import jax.numpy as jnp
import numpy as np
from jax.experimental import pallas as pl
from jax.experimental.pallas import tpu as pltpu


# --------------------------------------------------------------------------- #
# Pallas kernel: one block of `windows_per_block` windows per grid step.
# --------------------------------------------------------------------------- #
def window_attention_kernel(
    x_ref,       # (Wb, N, C)        input tokens of this window block
    wqkv_ref,    # (C, 3C)           fused qkv weight (q columns pre-scaled), mxu dtype
    bqkv_ref,    # (1, 3C)           fused qkv bias   (q part pre-scaled), f32
    wproj_ref,   # (C, C)            output projection weight, mxu dtype
    bproj_ref,   # (1, C)            output projection bias, f32
    bias_ref,    # (H, nWm, N, N)    rel-pos bias (+ fused 0/-inf window mask), f32
    o_ref,       # (Wb, N, C)        output block
    *,
    num_heads: int,
    head_dim: int,
    tokens: int,
    windows_per_block: int,
    mask_windows: int,
    mxu_dtype,
):
    H, hd, N = num_heads, head_dim, tokens
    Wb, nWm = windows_per_block, mask_windows
    C = H * hd
    T = Wb * N
    g = Wb // nWm                      # window groups sharing one mask slice
    f32 = jnp.float32

    # ---- fused QKV projection: one lane/contraction-dense (T, C) @ (C, 3C) dot.
    x = x_ref[...].reshape(T, C).astype(mxu_dtype)
    qkv = jnp.dot(x, wqkv_ref[...], preferred_element_type=f32) + bqkv_ref[...]   # (T, 3C) f32
    qkv = qkv.reshape(Wb, N, 3 * C).astype(mxu_dtype)

    # ---- per-head attention (static hd-wide lane slices). The Python loop also
    # bounds live ranges: only one head's (Wb, N, N) f32 scores exist at a time.
    head_out = []
    for h in range(H):
        lo = h * hd
        qh = qkv[:, :, lo:lo + hd]                       # (Wb, N, hd)
        kh = qkv[:, :, C + lo:C + lo + hd]               # (Wb, N, hd)
        vh = qkv[:, :, 2 * C + lo:2 * C + lo + hd]       # (Wb, N, hd)

        s = jnp.einsum("wnd,wmd->wnm", qh, kh, preferred_element_type=f32)  # (Wb, N, N)
        # rel-pos bias (+ window mask): bias_ref[h] is (nWm, N, N); broadcast over groups.
        s = s.reshape(g, nWm, N, N) + bias_ref[h]

        # Softmax in f32; the divide goes to the EUP as an approximate reciprocal.
        s = s - jnp.max(s, axis=-1, keepdims=True)
        p = jnp.exp(s)
        p = p * pl.reciprocal(jnp.sum(p, axis=-1, keepdims=True), approx=True)
        p = p.reshape(Wb, N, N).astype(mxu_dtype)

        head_out.append(jnp.einsum("wnm,wmd->wnd", p, vh,
                                   preferred_element_type=f32))              # (Wb, N, hd) f32

    # ---- merge heads on the lane axis, then a single (T, C) @ (C, C) proj dot.
    pv = jnp.concatenate(head_out, axis=-1).reshape(T, C).astype(mxu_dtype)   # (T, C)
    out = jnp.dot(pv, wproj_ref[...], preferred_element_type=f32) + bproj_ref[...]

    o_ref[...] = out.reshape(Wb, N, C).astype(o_ref.dtype)


# --------------------------------------------------------------------------- #
# Sizing helpers
# --------------------------------------------------------------------------- #
def _vmem_capacity_bytes():
    try:
        info = pltpu.get_tpu_info()
        cap = getattr(info, "vmem_capacity_bytes", None)
        if cap:
            return int(cap)
    except Exception:
        pass
    return 0  # unknown


def _block_vmem_bytes(wb, N, C, H, nWm, x_isize, m_isize):
    """Rough per-grid-step VMEM footprint estimate (bytes)."""
    T = wb * N
    io = 2 * (T * C * x_isize) * 2           # double-buffered x block + out block
    qkv = T * 3 * C * (4 + m_isize)          # f32 qkv accumulator + mxu-dtype copy
    scores = 4 * wb * N * N * 4              # a few live (Wb, N, N) f32 temporaries
    pv = T * C * (4 + m_isize)               # merged heads + cast
    consts = (3 * C * C + C * C) * m_isize + 4 * C * 4 + H * nWm * N * N * 4
    return io + qkv + scores + pv + consts


def _choose_windows_per_block(B_, base, bytes_for, budget):
    cands = [w for w in range(base, B_ + 1, base) if B_ % w == 0] or [B_]
    fitting = [w for w in cands if bytes_for(w) <= budget] or [cands[0]]
    # Prefer >= 4 grid steps (>= 2 per TensorCore on v7x megacore), then >= 2,
    # with an even step count when possible; take the largest block that fits.
    for min_blocks in (4, 2, 1):
        ok = [w for w in fitting if B_ // w >= min_blocks]
        if ok:
            even = [w for w in ok if (B_ // w) % 2 == 0]
            return max(even or ok)
    return base


def _const_index_map(ndim):
    zeros = (0,) * ndim

    def index_map(i):
        return zeros

    return index_map


# --------------------------------------------------------------------------- #
# Init-time parameter preprocessing (hoisted out of the per-call forward path)
# --------------------------------------------------------------------------- #
def prepare_window_attention(wqkv, bqkv, wproj, bproj, rel_bias, mask, *,
                             num_heads, scale, mxu_dtype=jnp.bfloat16):
    """wqkv: (C, 3C); bqkv: (3C,); wproj: (C, C); bproj: (C,);
    rel_bias: (H, N, N); mask: (nW, N, N) or None."""
    C = wqkv.shape[0]
    H = num_heads
    N = rel_bias.shape[-1]
    f32 = jnp.float32

    # Fold the qk scale into the query columns of the fused qkv weight / bias.
    wqkv_s = jnp.concatenate([wqkv[:, :C] * scale, wqkv[:, C:]], axis=1).astype(mxu_dtype)
    bqkv_s = jnp.concatenate([bqkv[:C] * scale, bqkv[C:]]).reshape(1, 3 * C).astype(f32)
    wproj_m = wproj.astype(mxu_dtype)
    bproj_r = bproj.reshape(1, C).astype(f32)

    # Fuse the relative-position bias with the (0/-inf) window mask once, but do
    # NOT tile it per block: (H, nW, N, N) is broadcast in-kernel over groups.
    if mask is None:
        bias_fused = rel_bias.reshape(H, 1, N, N).astype(f32)
    else:
        bias_fused = rel_bias[:, None].astype(f32) + mask[None].astype(f32)   # (H, nW, N, N)

    return (wqkv_s, bqkv_s, wproj_m, bproj_r, bias_fused)


# --------------------------------------------------------------------------- #
# Forward wrapper
# --------------------------------------------------------------------------- #
def window_attention_forward(x, params, *, num_heads, windows_per_block=None):
    wqkv_s, bqkv_s, wproj_m, bproj_r, bias_fused = params
    B_, N, C = x.shape
    H = num_heads
    hd = C // H
    nWm = bias_fused.shape[1]
    mxu_dtype = wqkv_s.dtype

    x_isize = jnp.dtype(x.dtype).itemsize
    m_isize = jnp.dtype(mxu_dtype).itemsize

    # Per-generation VMEM budget (v5e/v6e: 128 MiB, v7x: 64 MiB per TensorCore).
    cap = _vmem_capacity_bytes()
    if cap:
        budget = (2 * cap) // 5
        vmem_limit = min((3 * cap) // 4, 96 * 1024 * 1024)
    else:
        budget = 48 * 1024 * 1024
        vmem_limit = 64 * 1024 * 1024

    if windows_per_block is None:
        wb = _choose_windows_per_block(
            B_, nWm,
            lambda w: _block_vmem_bytes(w, N, C, H, nWm, x_isize, m_isize),
            budget)
    else:
        wb = windows_per_block
    assert B_ % wb == 0 and wb % nWm == 0
    num_blocks = B_ // wb

    # Advisory cost estimate for the XLA scheduler around the custom call.
    flops = 2 * B_ * N * C * 3 * C + 4 * B_ * N * N * C + 2 * B_ * N * C * C
    trans = B_ * H * N * N
    bytes_acc = (2 * B_ * N * C * x_isize
                 + (3 * C * C + C * C) * m_isize + 4 * C * 4
                 + H * nWm * N * N * 4)
    cost = pl.CostEstimate(flops=int(flops), transcendentals=int(trans),
                           bytes_accessed=int(bytes_acc))

    kernel = functools.partial(
        window_attention_kernel,
        num_heads=H, head_dim=hd, tokens=N, windows_per_block=wb,
        mask_windows=nWm, mxu_dtype=mxu_dtype)

    def build(single_buffer_consts):
        const_kwargs = ({"pipeline_mode": pl.Buffered(1)}
                        if single_buffer_consts else {})

        def const_spec(shape):
            return pl.BlockSpec(shape, _const_index_map(len(shape)), **const_kwargs)

        return pl.pallas_call(
            kernel,
            out_shape=jax.ShapeDtypeStruct((B_, N, C), x.dtype),
            grid=(num_blocks,),
            in_specs=[
                pl.BlockSpec((wb, N, C), lambda i: (i, 0, 0)),   # x (window block)
                const_spec((C, 3 * C)),                           # fused qkv weight
                const_spec((1, 3 * C)),                           # fused qkv bias
                const_spec((C, C)),                               # proj weight
                const_spec((1, C)),                               # proj bias
                const_spec((H, nWm, N, N)),                       # rel-pos bias (+mask)
            ],
            out_specs=pl.BlockSpec((wb, N, C), lambda i: (i, 0, 0)),
            compiler_params=pltpu.CompilerParams(
                dimension_semantics=("parallel",),
                vmem_limit_bytes=vmem_limit),
            cost_estimate=cost,
        )

    args = (x, wqkv_s, bqkv_s, wproj_m, bproj_r, bias_fused)
    try:
        return build(True)(*args)
    except Exception:
        # TODO(synk): drop this fallback once pipeline_mode=pl.Buffered(1) single
        # buffering of constant operands is guaranteed on the deployed jax.
        return build(False)(*args)


def window_attention(x, wqkv, bqkv, wproj, bproj, rel_bias, mask, *,
                     num_heads, scale, windows_per_block=None,
                     mxu_dtype=jnp.bfloat16):
    """Convenience: prepare (init-time) + forward in one call."""
    params = prepare_window_attention(wqkv, bqkv, wproj, bproj, rel_bias, mask,
                                      num_heads=num_heads, scale=scale,
                                      mxu_dtype=mxu_dtype)
    return window_attention_forward(x, params, num_heads=num_heads,
                                    windows_per_block=windows_per_block)


# --------------------------------------------------------------------------- #
# Parameter / buffer construction and pure-JAX reference
# --------------------------------------------------------------------------- #
def make_relative_position_index(window_size):
    Wh, Ww = window_size
    coords = np.stack(np.meshgrid(np.arange(Wh), np.arange(Ww), indexing="ij"))   # (2, Wh, Ww)
    coords_flatten = coords.reshape(2, -1)                                        # (2, N)
    rel = coords_flatten[:, :, None] - coords_flatten[:, None, :]                 # (2, N, N)
    rel = rel.transpose(1, 2, 0)                                                  # (N, N, 2)
    rel[:, :, 0] += Wh - 1
    rel[:, :, 1] += Ww - 1
    rel[:, :, 0] *= 2 * Ww - 1
    return rel.sum(-1)                                                            # (N, N)


def reference_forward(x, wqkv, bqkv, wproj, bproj, rel_bias, mask, num_heads, scale):
    """Pure-JAX replica of the PyTorch forward (for verification)."""
    B_, N, C = x.shape
    hd = C // num_heads
    qkv = x @ wqkv + bqkv                                            # (B_, N, 3C)
    qkv = qkv.reshape(B_, N, 3, num_heads, hd).transpose(2, 0, 3, 1, 4)
    q, k, v = qkv[0] * scale, qkv[1], qkv[2]                         # (B_, H, N, hd)
    attn = jnp.einsum("bhnd,bhmd->bhnm", q, k) + rel_bias[None]      # (B_, H, N, N)
    if mask is not None:
        nW = mask.shape[0]
        attn = attn.reshape(B_ // nW, nW, num_heads, N, N) + mask[None, :, None]
        attn = attn.reshape(B_, num_heads, N, N)
    attn = jax.nn.softmax(attn, axis=-1)
    out = jnp.einsum("bhnm,bhmd->bhnd", attn, v).transpose(0, 2, 1, 3).reshape(B_, N, C)
    return out @ wproj + bproj


if __name__ == "__main__":
    # Module config: dim=32, window 4x4, 4 heads.
    dim = 32
    window_size = (4, 4)
    num_heads = 4
    head_dim = dim // num_heads
    scale = head_dim ** (-0.5)
    N = window_size[0] * window_size[1]      # 16 tokens per window
    B = 2
    nW = 4
    B_ = B * nW                               # 8 windows total

    key = jax.random.PRNGKey(0)
    keys = jax.random.split(key, 8)

    table_size = (2 * window_size[0] - 1) * (2 * window_size[1] - 1)
    rel_bias_table = jnp.clip(
        0.02 * jax.random.normal(keys[0], (table_size, num_heads), jnp.float32), -0.04, 0.04
    )
    wqkv = 0.05 * jax.random.normal(keys[1], (dim, 3 * dim), jnp.float32)
    bqkv = 0.05 * jax.random.normal(keys[2], (3 * dim,), jnp.float32)
    wproj = 0.05 * jax.random.normal(keys[3], (dim, dim), jnp.float32)
    bproj = 0.05 * jax.random.normal(keys[4], (dim,), jnp.float32)

    # Relative position bias: gather table -> (N, N, H) -> (H, N, N)
    rel_idx = jnp.asarray(make_relative_position_index(window_size))           # (N, N)
    rel_bias = rel_bias_table[rel_idx.reshape(-1)].reshape(N, N, num_heads)
    rel_bias = jnp.transpose(rel_bias, (2, 0, 1))                              # (H, N, N)

    # Inputs
    x = jax.random.normal(keys[5], (B_, N, dim), jnp.float32)
    mask_bits = jax.random.bernoulli(keys[6], 0.25, (nW, N, N))
    mask = jnp.where(mask_bits, -1e9, 0.0).astype(jnp.float32)

    # References
    ref = jax.block_until_ready(
        reference_forward(x, wqkv, bqkv, wproj, bproj, rel_bias, mask, num_heads, scale))
    ref_nm = jax.block_until_ready(
        reference_forward(x, wqkv, bqkv, wproj, bproj, rel_bias, None, num_heads, scale))

    # Default path: bf16 MXU operands (all generations), f32 softmax/accumulation,
    # with init-time (hoisted) parameter preprocessing and the 0/-inf window mask.
    params = prepare_window_attention(wqkv, bqkv, wproj, bproj, rel_bias, mask,
                                      num_heads=num_heads, scale=scale)
    out = jax.block_until_ready(window_attention_forward(x, params, num_heads=num_heads))
    assert out.shape == (B_, N, dim)
    np.testing.assert_allclose(np.asarray(out), np.asarray(ref), rtol=3e-2, atol=3e-2)

    # f32 MXU operands (tighter tolerance), via the one-shot convenience wrapper.
    out_f32 = window_attention(x, wqkv, bqkv, wproj, bproj, rel_bias, mask,
                               num_heads=num_heads, scale=scale,
                               mxu_dtype=jnp.float32)
    out_f32 = jax.block_until_ready(out_f32)
    np.testing.assert_allclose(np.asarray(out_f32), np.asarray(ref), rtol=5e-3, atol=1e-3)

    # mask=None specialization (bias stays at (H, 1, N, N), broadcast in-kernel).
    params_nm = prepare_window_attention(wqkv, bqkv, wproj, bproj, rel_bias, None,
                                         num_heads=num_heads, scale=scale)
    out_nm = jax.block_until_ready(
        window_attention_forward(x, params_nm, num_heads=num_heads))
    np.testing.assert_allclose(np.asarray(out_nm), np.asarray(ref_nm), rtol=3e-2, atol=3e-2)

    print("KERNEL_OK")
</pallas_src>

<mosaic_0001>
module attributes {stable_mosaic.version = 11 : i64} {
  func.func @window_attention_kernel(%arg0: i32, %arg1: memref<4x16x32xf32, #tpu.memory_space<vmem>>, %arg2: memref<32x96xbf16, #tpu.memory_space<vmem>>, %arg3: memref<1x96xf32, #tpu.memory_space<vmem>>, %arg4: memref<32x32xbf16, #tpu.memory_space<vmem>>, %arg5: memref<1x32xf32, #tpu.memory_space<vmem>>, %arg6: memref<4x4x16x16xf32, #tpu.memory_space<vmem>>, %arg7: memref<4x16x32xf32, #tpu.memory_space<vmem>>) attributes {dimension_semantics = [#tpu.dimension_semantics<parallel>], iteration_bounds = array<i64: 2>, scalar_prefetch = 0 : i64, scratch_operands = 0 : i64, tpu.core_type = #tpu.core_type<tc>, window_params = [{transform_indices = @transform_0, window_bounds = array<i64: 4, 16, 32>}, {pipeline_mode = #tpu.pipeline_mode<synchronous>, transform_indices = @transform_1, window_bounds = array<i64: 32, 96>}, {pipeline_mode = #tpu.pipeline_mode<synchronous>, transform_indices = @transform_2, window_bounds = array<i64: 1, 96>}, {pipeline_mode = #tpu.pipeline_mode<synchronous>, transform_indices = @transform_3, window_bounds = array<i64: 32, 32>}, {pipeline_mode = #tpu.pipeline_mode<synchronous>, transform_indices = @transform_4, window_bounds = array<i64: 1, 32>}, {pipeline_mode = #tpu.pipeline_mode<synchronous>, transform_indices = @transform_5, window_bounds = array<i64: 4, 4, 16, 16>}, {transform_indices = @transform_6, window_bounds = array<i64: 4, 16, 32>}]} {
    %c0 = arith.constant 0 : index
    %c0_0 = arith.constant 0 : index
    %c0_1 = arith.constant 0 : index
    %0 = vector.load %arg1[%c0, %c0_0, %c0_1] : memref<4x16x32xf32, #tpu.memory_space<vmem>>, vector<4x16x32xf32>
    %1 = vector.shape_cast %0 : vector<4x16x32xf32> to vector<64x32xf32>
    %2 = arith.truncf %1 : vector<64x32xf32> to vector<64x32xbf16>
    %c0_2 = arith.constant 0 : index
    %c0_3 = arith.constant 0 : index
    %3 = vector.load %arg2[%c0_2, %c0_3] : memref<32x96xbf16, #tpu.memory_space<vmem>>, vector<32x96xbf16>
    %cst = arith.constant dense<0.000000e+00> : vector<64x96xf32>
    %4 = tpu.matmul %2, %3, %cst {dimension_numbers = #tpu.dot_dimension_numbers<[1], [0], [0], [1], [0, 0, 1, 1], [], []>} : vector<64x32xbf16>, vector<32x96xbf16>, vector<64x96xf32> -> vector<64x96xf32>
    %c0_4 = arith.constant 0 : index
    %c0_5 = arith.constant 0 : index
    %5 = vector.load %arg3[%c0_4, %c0_5] : memref<1x96xf32, #tpu.memory_space<vmem>>, vector<1x96xf32>
    %6 = vector.broadcast %5 : vector<1x96xf32> to vector<64x96xf32>
    %7 = arith.addf %4, %6 : vector<64x96xf32>
    %8 = vector.shape_cast %7 : vector<64x96xf32> to vector<4x16x96xf32>
    %9 = arith.truncf %8 : vector<4x16x96xf32> to vector<4x16x96xbf16>
    %10 = vector.extract_strided_slice %9 {offsets = [0, 0, 0], sizes = [4, 16, 8], strides = [1, 1, 1]} : vector<4x16x96xbf16> to vector<4x16x8xbf16>
    %11 = vector.extract_strided_slice %9 {offsets = [0, 0, 32], sizes = [4, 16, 8], strides = [1, 1, 1]} : vector<4x16x96xbf16> to vector<4x16x8xbf16>
    %12 = vector.extract_strided_slice %9 {offsets = [0, 0, 64], sizes = [4, 16, 8], strides = [1, 1, 1]} : vector<4x16x96xbf16> to vector<4x16x8xbf16>
    "tpu.trace_start"() <{level = 10 : i32, message = "wnd,wmd->wnm"}> : () -> ()
    %cst_6 = arith.constant dense<0.000000e+00> : vector<4x16x16xf32>
    %13 = tpu.matmul %10, %11, %cst_6 {dimension_numbers = #tpu.dot_dimension_numbers<[2], [2], [1], [1], [0, 0, 0, 1, 1, 1], [0], [0]>} : vector<4x16x8xbf16>, vector<4x16x8xbf16>, vector<4x16x16xf32> -> vector<4x16x16xf32>
    "tpu.trace_stop"() : () -> ()
    %14 = vector.shape_cast %13 : vector<4x16x16xf32> to vector<1x4x16x16xf32>
    %c0_7 = arith.constant 0 : index
    %c0_8 = arith.constant 0 : index
    %c0_9 = arith.constant 0 : index
    %c0_10 = arith.constant 0 : index
    %15 = vector.load %arg6[%c0_7, %c0_8, %c0_9, %c0_10] : memref<4x4x16x16xf32, #tpu.memory_space<vmem>>, vector<1x4x16x16xf32>
    %16 = vector.shape_cast %15 : vector<1x4x16x16xf32> to vector<4x16x16xf32>
    %17 = vector.shape_cast %16 : vector<4x16x16xf32> to vector<1x4x16x16xf32>
    %18 = arith.addf %14, %17 : vector<1x4x16x16xf32>
    %cst_11 = arith.constant dense<0xFF800000> : vector<1x4x16xf32>
    %19 = vector.multi_reduction <maximumf>, %18, %cst_11 [3] : vector<1x4x16x16xf32> to vector<1x4x16xf32>
    %20 = vector.shape_cast %19 : vector<1x4x16xf32> to vector<1x4x16x1xf32>
    %21 = vector.broadcast %20 : vector<1x4x16x1xf32> to vector<1x4x16x16xf32>
    %22 = arith.subf %18, %21 : vector<1x4x16x16xf32>
    %23 = math.exp %22 : vector<1x4x16x16xf32>
    %cst_12 = arith.constant dense<0.000000e+00> : vector<1x4x16xf32>
    %24 = vector.multi_reduction <add>, %23, %cst_12 [3] : vector<1x4x16x16xf32> to vector<1x4x16xf32>
    %25 = vector.shape_cast %24 : vector<1x4x16xf32> to vector<1x4x16x1xf32>
    %26 = tpu.reciprocal %25 {approx = true} : vector<1x4x16x1xf32> -> vector<1x4x16x1xf32>
    %27 = vector.broadcast %26 : vector<1x4x16x1xf32> to vector<1x4x16x16xf32>
    %28 = arith.mulf %23, %27 : vector<1x4x16x16xf32>
    %29 = vector.shape_cast %28 : vector<1x4x16x16xf32> to vector<4x16x16xf32>
    %30 = arith.truncf %29 : vector<4x16x16xf32> to vector<4x16x16xbf16>
    "tpu.trace_start"() <{level = 10 : i32, message = "wnm,wmd->wnd"}> : () -> ()
    %cst_13 = arith.constant dense<0.000000e+00> : vector<4x16x8xf32>
    %31 = tpu.matmul %30, %12, %cst_13 {dimension_numbers = #tpu.dot_dimension_numbers<[2], [1], [1], [2], [0, 0, 0, 1, 1, 2], [0], [0]>} : vector<4x16x16xbf16>, vector<4x16x8xbf16>, vector<4x16x8xf32> -> vector<4x16x8xf32>
    "tpu.trace_stop"() : () -> ()
    %32 = vector.extract_strided_slice %9 {offsets = [0, 0, 8], sizes = [4, 16, 8], strides = [1, 1, 1]} : vector<4x16x96xbf16> to vector<4x16x8xbf16>
    %33 = vector.extract_strided_slice %9 {offsets = [0, 0, 40], sizes = [4, 16, 8], strides = [1, 1, 1]} : vector<4x16x96xbf16> to vector<4x16x8xbf16>
    %34 = vector.extract_strided_slice %9 {offsets = [0, 0, 72], sizes = [4, 16, 8], strides = [1, 1, 1]} : vector<4x16x96xbf16> to vector<4x16x8xbf16>
    "tpu.trace_start"() <{level = 10 : i32, message = "wnd,wmd->wnm"}> : () -> ()
    %cst_14 = arith.constant dense<0.000000e+00> : vector<4x16x16xf32>
    %35 = tpu.matmul %32, %33, %cst_14 {dimension_numbers = #tpu.dot_dimension_numbers<[2], [2], [1], [1], [0, 0, 0, 1, 1, 1], [0], [0]>} : vector<4x16x8xbf16>, vector<4x16x8xbf16>, vector<4x16x16xf32> -> vector<4x16x16xf32>
    "tpu.trace_stop"() : () -> ()
    %36 = vector.shape_cast %35 : vector<4x16x16xf32> to vector<1x4x16x16xf32>
    %c1 = arith.constant 1 : index
    %c0_15 = arith.constant 0 : index
    %c0_16 = arith.constant 0 : index
    %c0_17 = arith.constant 0 : index
    %37 = vector.load %arg6[%c1, %c0_15, %c0_16, %c0_17] : memref<4x4x16x16xf32, #tpu.memory_space<vmem>>, vector<1x4x16x16xf32>
    %38 = vector.shape_cast %37 : vector<1x4x16x16xf32> to vector<4x16x16xf32>
    %39 = vector.shape_cast %38 : vector<4x16x16xf32> to vector<1x4x16x16xf32>
    %40 = arith.addf %36, %39 : vector<1x4x16x16xf32>
    %cst_18 = arith.constant dense<0xFF800000> : vector<1x4x16xf32>
    %41 = vector.multi_reduction <maximumf>, %40, %cst_18 [3] : vector<1x4x16x16xf32> to vector<1x4x16xf32>
    %42 = vector.shape_cast %41 : vector<1x4x16xf32> to vector<1x4x16x1xf32>
    %43 = vector.broadcast %42 : vector<1x4x16x1xf32> to vector<1x4x16x16xf32>
    %44 = arith.subf %40, %43 : vector<1x4x16x16xf32>
    %45 = math.exp %44 : vector<1x4x16x16xf32>
    %cst_19 = arith.constant dense<0.000000e+00> : vector<1x4x16xf32>
    %46 = vector.multi_reduction <add>, %45, %cst_19 [3] : vector<1x4x16x16xf32> to vector<1x4x16xf32>
    %47 = vector.shape_cast %46 : vector<1x4x16xf32> to vector<1x4x16x1xf32>
    %48 = tpu.reciprocal %47 {approx = true} : vector<1x4x16x1xf32> -> vector<1x4x16x1xf32>
    %49 = vector.broadcast %48 : vector<1x4x16x1xf32> to vector<1x4x16x16xf32>
    %50 = arith.mulf %45, %49 : vector<1x4x16x16xf32>
    %51 = vector.shape_cast %50 : vector<1x4x16x16xf32> to vector<4x16x16xf32>
    %52 = arith.truncf %51 : vector<4x16x16xf32> to vector<4x16x16xbf16>
    "tpu.trace_start"() <{level = 10 : i32, message = "wnm,wmd->wnd"}> : () -> ()
    %cst_20 = arith.constant dense<0.000000e+00> : vector<4x16x8xf32>
    %53 = tpu.matmul %52, %34, %cst_20 {dimension_numbers = #tpu.dot_dimension_numbers<[2], [1], [1], [2], [0, 0, 0, 1, 1, 2], [0], [0]>} : vector<4x16x16xbf16>, vector<4x16x8xbf16>, vector<4x16x8xf32> -> vector<4x16x8xf32>
    "tpu.trace_stop"() : () -> ()
    %54 = vector.extract_strided_slice %9 {offsets = [0, 0, 16], sizes = [4, 16, 8], strides = [1, 1, 1]} : vector<4x16x96xbf16> to vector<4x16x8xbf16>
    %55 = vector.extract_strided_slice %9 {offsets = [0, 0, 48], sizes = [4, 16, 8], strides = [1, 1, 1]} : vector<4x16x96xbf16> to vector<4x16x8xbf16>
    %56 = vector.extract_strided_slice %9 {offsets = [0, 0, 80], sizes = [4, 16, 8], strides = [1, 1, 1]} : vector<4x16x96xbf16> to vector<4x16x8xbf16>
    "tpu.trace_start"() <{level = 10 : i32, message = "wnd,wmd->wnm"}> : () -> ()
    %cst_21 = arith.constant dense<0.000000e+00> : vector<4x16x16xf32>
    %57 = tpu.matmul %54, %55, %cst_21 {dimension_numbers = #tpu.dot_dimension_numbers<[2], [2], [1], [1], [0, 0, 0, 1, 1, 1], [0], [0]>} : vector<4x16x8xbf16>, vector<4x16x8xbf16>, vector<4x16x16xf32> -> vector<4x16x16xf32>
    "tpu.trace_stop"() : () -> ()
    %58 = vector.shape_cast %57 : vector<4x16x16xf32> to vector<1x4x16x16xf32>
    %c2 = arith.constant 2 : index
    %c0_22 = arith.constant 0 : index
    %c0_23 = arith.constant 0 : index
    %c0_24 = arith.constant 0 : index
    %59 = vector.load %arg6[%c2, %c0_22, %c0_23, %c0_24] : memref<4x4x16x16xf32, #tpu.memory_space<vmem>>, vector<1x4x16x16xf32>
    %60 = vector.shape_cast %59 : vector<1x4x16x16xf32> to vector<4x16x16xf32>
    %61 = vector.shape_cast %60 : vector<4x16x16xf32> to vector<1x4x16x16xf32>
    %62 = arith.addf %58, %61 : vector<1x4x16x16xf32>
    %cst_25 = arith.constant dense<0xFF800000> : vector<1x4x16xf32>
    %63 = vector.multi_reduction <maximumf>, %62, %cst_25 [3] : vector<1x4x16x16xf32> to vector<1x4x16xf32>
    %64 = vector.shape_cast %63 : vector<1x4x16xf32> to vector<1x4x16x1xf32>
    %65 = vector.broadcast %64 : vector<1x4x16x1xf32> to vector<1x4x16x16xf32>
    %66 = arith.subf %62, %65 : vector<1x4x16x16xf32>
    %67 = math.exp %66 : vector<1x4x16x16xf32>
    %cst_26 = arith.constant dense<0.000000e+00> : vector<1x4x16xf32>
    %68 = vector.multi_reduction <add>, %67, %cst_26 [3] : vector<1x4x16x16xf32> to vector<1x4x16xf32>
    %69 = vector.shape_cast %68 : vector<1x4x16xf32> to vector<1x4x16x1xf32>
    %70 = tpu.reciprocal %69 {approx = true} : vector<1x4x16x1xf32> -> vector<1x4x16x1xf32>
    %71 = vector.broadcast %70 : vector<1x4x16x1xf32> to vector<1x4x16x16xf32>
    %72 = arith.mulf %67, %71 : vector<1x4x16x16xf32>
    %73 = vector.shape_cast %72 : vector<1x4x16x16xf32> to vector<4x16x16xf32>
    %74 = arith.truncf %73 : vector<4x16x16xf32> to vector<4x16x16xbf16>
    "tpu.trace_start"() <{level = 10 : i32, message = "wnm,wmd->wnd"}> : () -> ()
    %cst_27 = arith.constant dense<0.000000e+00> : vector<4x16x8xf32>
    %75 = tpu.matmul %74, %56, %cst_27 {dimension_numbers = #tpu.dot_dimension_numbers<[2], [1], [1], [2], [0, 0, 0, 1, 1, 2], [0], [0]>} : vector<4x16x16xbf16>, vector<4x16x8xbf16>, vector<4x16x8xf32> -> vector<4x16x8xf32>
    "tpu.trace_stop"() : () -> ()
    %76 = vector.extract_strided_slice %9 {offsets = [0, 0, 24], sizes = [4, 16, 8], strides = [1, 1, 1]} : vector<4x16x96xbf16> to vector<4x16x8xbf16>
    %77 = vector.extract_strided_slice %9 {offsets = [0, 0, 56], sizes = [4, 16, 8], strides = [1, 1, 1]} : vector<4x16x96xbf16> to vector<4x16x8xbf16>
    %78 = vector.extract_strided_slice %9 {offsets = [0, 0, 88], sizes = [4, 16, 8], strides = [1, 1, 1]} : vector<4x16x96xbf16> to vector<4x16x8xbf16>
    "tpu.trace_start"() <{level = 10 : i32, message = "wnd,wmd->wnm"}> : () -> ()
    %cst_28 = arith.constant dense<0.000000e+00> : vector<4x16x16xf32>
    %79 = tpu.matmul %76, %77, %cst_28 {dimension_numbers = #tpu.dot_dimension_numbers<[2], [2], [1], [1], [0, 0, 0, 1, 1, 1], [0], [0]>} : vector<4x16x8xbf16>, vector<4x16x8xbf16>, vector<4x16x16xf32> -> vector<4x16x16xf32>
    "tpu.trace_stop"() : () -> ()
    %80 = vector.shape_cast %79 : vector<4x16x16xf32> to vector<1x4x16x16xf32>
    %c3 = arith.constant 3 : index
    %c0_29 = arith.constant 0 : index
    %c0_30 = arith.constant 0 : index
    %c0_31 = arith.constant 0 : index
    %81 = vector.load %arg6[%c3, %c0_29, %c0_30, %c0_31] : memref<4x4x16x16xf32, #tpu.memory_space<vmem>>, vector<1x4x16x16xf32>
    %82 = vector.shape_cast %81 : vector<1x4x16x16xf32> to vector<4x16x16xf32>
    %83 = vector.shape_cast %82 : vector<4x16x16xf32> to vector<1x4x16x16xf32>
    %84 = arith.addf %80, %83 : vector<1x4x16x16xf32>
    %cst_32 = arith.constant dense<0xFF800000> : vector<1x4x16xf32>
    %85 = vector.multi_reduction <maximumf>, %84, %cst_32 [3] : vector<1x4x16x16xf32> to vector<1x4x16xf32>
    %86 = vector.shape_cast %85 : vector<1x4x16xf32> to vector<1x4x16x1xf32>
    %87 = vector.broadcast %86 : vector<1x4x16x1xf32> to vector<1x4x16x16xf32>
    %88 = arith.subf %84, %87 : vector<1x4x16x16xf32>
    %89 = math.exp %88 : vector<1x4x16x16xf32>
    %cst_33 = arith.constant dense<0.000000e+00> : vector<1x4x16xf32>
    %90 = vector.multi_reduction <add>, %89, %cst_33 [3] : vector<1x4x16x16xf32> to vector<1x4x16xf32>
    %91 = vector.shape_cast %90 : vector<1x4x16xf32> to vector<1x4x16x1xf32>
    %92 = tpu.reciprocal %91 {approx = true} : vector<1x4x16x1xf32> -> vector<1x4x16x1xf32>
    %93 = vector.broadcast %92 : vector<1x4x16x1xf32> to vector<1x4x16x16xf32>
    %94 = arith.mulf %89, %93 : vector<1x4x16x16xf32>
    %95 = vector.shape_cast %94 : vector<1x4x16x16xf32> to vector<4x16x16xf32>
    %96 = arith.truncf %95 : vector<4x16x16xf32> to vector<4x16x16xbf16>
    "tpu.trace_start"() <{level = 10 : i32, message = "wnm,wmd->wnd"}> : () -> ()
    %cst_34 = arith.constant dense<0.000000e+00> : vector<4x16x8xf32>
    %97 = tpu.matmul %96, %78, %cst_34 {dimension_numbers = #tpu.dot_dimension_numbers<[2], [1], [1], [2], [0, 0, 0, 1, 1, 2], [0], [0]>} : vector<4x16x16xbf16>, vector<4x16x8xbf16>, vector<4x16x8xf32> -> vector<4x16x8xf32>
    "tpu.trace_stop"() : () -> ()
    %98 = tpu.concatenate %31, %53, %75, %97 in 2 : vector<4x16x8xf32>, vector<4x16x8xf32>, vector<4x16x8xf32>, vector<4x16x8xf32> -> vector<4x16x32xf32>
    %99 = vector.shape_cast %98 : vector<4x16x32xf32> to vector<64x32xf32>
    %100 = arith.truncf %99 : vector<64x32xf32> to vector<64x32xbf16>
    %c0_35 = arith.constant 0 : index
    %c0_36 = arith.constant 0 : index
    %101 = vector.load %arg4[%c0_35, %c0_36] : memref<32x32xbf16, #tpu.memory_space<vmem>>, vector<32x32xbf16>
    %cst_37 = arith.constant dense<0.000000e+00> : vector<64x32xf32>
    %102 = tpu.matmul %100, %101, %cst_37 {dimension_numbers = #tpu.dot_dimension_numbers<[1], [0], [0], [1], [0, 0, 1, 1], [], []>} : vector<64x32xbf16>, vector<32x32xbf16>, vector<64x32xf32> -> vector<64x32xf32>
    %c0_38 = arith.constant 0 : index
    %c0_39 = arith.constant 0 : index
    %103 = vector.load %arg5[%c0_38, %c0_39] : memref<1x32xf32, #tpu.memory_space<vmem>>, vector<1x32xf32>
    %104 = vector.broadcast %103 : vector<1x32xf32> to vector<64x32xf32>
    %105 = arith.addf %102, %104 : vector<64x32xf32>
    %106 = vector.shape_cast %105 : vector<64x32xf32> to vector<4x16x32xf32>
    %c0_40 = arith.constant 0 : index
    %c0_41 = arith.constant 0 : index
    %c0_42 = arith.constant 0 : index
    %107 = vector.load %arg7[%c0_40, %c0_41, %c0_42] : memref<4x16x32xf32, #tpu.memory_space<vmem>>, vector<4x16x32xf32>
    tpu.vector_store %arg7[%c0_40, %c0_41, %c0_42], %106 {strides = array<i32>} : memref<4x16x32xf32, #tpu.memory_space<vmem>>, vector<4x16x32xf32>,
    return
  }
  func.func @transform_0(%arg0: i32) -> (i32, i32, i32) {
    %c0_i32 = arith.constant 0 : i32
    %c0_i32_0 = arith.constant 0 : i32
    %c0_i32_1 = arith.constant 0 : i32
    return %arg0, %c0_i32, %c0_i32_0 : i32, i32, i32
  }
  func.func @transform_1(%arg0: i32) -> (i32, i32) {
    %c0_i32 = arith.constant 0 : i32
    %c0_i32_0 = arith.constant 0 : i32
    %c0_i32_1 = arith.constant 0 : i32
    return %c0_i32, %c0_i32_0 : i32, i32
  }
  func.func @transform_2(%arg0: i32) -> (i32, i32) {
    %c0_i32 = arith.constant 0 : i32
    %c0_i32_0 = arith.constant 0 : i32
    %c0_i32_1 = arith.constant 0 : i32
    return %c0_i32, %c0_i32_0 : i32, i32
  }
  func.func @transform_3(%arg0: i32) -> (i32, i32) {
    %c0_i32 = arith.constant 0 : i32
    %c0_i32_0 = arith.constant 0 : i32
    %c0_i32_1 = arith.constant 0 : i32
    return %c0_i32, %c0_i32_0 : i32, i32
  }
  func.func @transform_4(%arg0: i32) -> (i32, i32) {
    %c0_i32 = arith.constant 0 : i32
    %c0_i32_0 = arith.constant 0 : i32
    %c0_i32_1 = arith.constant 0 : i32
    return %c0_i32, %c0_i32_0 : i32, i32
  }
  func.func @transform_5(%arg0: i32) -> (i32, i32, i32, i32) {
    %c0_i32 = arith.constant 0 : i32
    %c0_i32_0 = arith.constant 0 : i32
    %c0_i32_1 = arith.constant 0 : i32
    %c0_i32_2 = arith.constant 0 : i32
    %c0_i32_3 = arith.constant 0 : i32
    return %c0_i32, %c0_i32_0, %c0_i32_1, %c0_i32_2 : i32, i32, i32, i32
  }
  func.func @transform_6(%arg0: i32) -> (i32, i32, i32) {
    %c0_i32 = arith.constant 0 : i32
    %c0_i32_0 = arith.constant 0 : i32
    %c0_i32_1 = arith.constant 0 : i32
    return %arg0, %c0_i32, %c0_i32_0 : i32, i32, i32
  }
}

module attributes {stable_mosaic.version = 11 : i64} {
  func.func @window_attention_kernel(%arg0: i32, %arg1: memref<4x16x32xf32, #tpu.memory_space<vmem>>, %arg2: memref<32x96xbf16, #tpu.memory_space<vmem>>, %arg3: memref<1x96xf32, #tpu.memory_space<vmem>>, %arg4: memref<32x32xbf16, #tpu.memory_space<vmem>>, %arg5: memref<1x32xf32, #tpu.memory_space<vmem>>, %arg6: memref<4x4x16x16xf32, #tpu.memory_space<vmem>>, %arg7: memref<4x16x32xf32, #tpu.memory_space<vmem>>) attributes {dimension_semantics = [#tpu.dimension_semantics<parallel>], iteration_bounds = array<i64: 2>, scalar_prefetch = 0 : i64, scratch_operands = 0 : i64, tpu.core_type = #tpu.core_type<tc>, window_params = [{transform_indices = @transform_0, window_bounds = array<i64: 4, 16, 32>}, {pipeline_mode = #tpu.pipeline_mode<synchronous>, transform_indices = @transform_1, window_bounds = array<i64: 32, 96>}, {pipeline_mode = #tpu.pipeline_mode<synchronous>, transform_indices = @transform_2, window_bounds = array<i64: 1, 96>}, {pipeline_mode = #tpu.pipeline_mode<synchronous>, transform_indices = @transform_3, window_bounds = array<i64: 32, 32>}, {pipeline_mode = #tpu.pipeline_mode<synchronous>, transform_indices = @transform_4, window_bounds = array<i64: 1, 32>}, {pipeline_mode = #tpu.pipeline_mode<synchronous>, transform_indices = @transform_5, window_bounds = array<i64: 4, 4, 16, 16>}, {transform_indices = @transform_6, window_bounds = array<i64: 4, 16, 32>}]} {
    %c0 = arith.constant 0 : index
    %c0_0 = arith.constant 0 : index
    %c0_1 = arith.constant 0 : index
    %0 = vector.load %arg1[%c0, %c0_0, %c0_1] : memref<4x16x32xf32, #tpu.memory_space<vmem>>, vector<4x16x32xf32>
    %1 = vector.shape_cast %0 : vector<4x16x32xf32> to vector<64x32xf32>
    %2 = arith.truncf %1 : vector<64x32xf32> to vector<64x32xbf16>
    %c0_2 = arith.constant 0 : index
    %c0_3 = arith.constant 0 : index
    %3 = vector.load %arg2[%c0_2, %c0_3] : memref<32x96xbf16, #tpu.memory_space<vmem>>, vector<32x96xbf16>
    %cst = arith.constant dense<0.000000e+00> : vector<64x96xf32>
    %4 = tpu.matmul %2, %3, %cst {dimension_numbers = #tpu.dot_dimension_numbers<[1], [0], [0], [1], [0, 0, 1, 1], [], []>} : vector<64x32xbf16>, vector<32x96xbf16>, vector<64x96xf32> -> vector<64x96xf32>
    %c0_4 = arith.constant 0 : index
    %c0_5 = arith.constant 0 : index
    %5 = vector.load %arg3[%c0_4, %c0_5] : memref<1x96xf32, #tpu.memory_space<vmem>>, vector<1x96xf32>
    %6 = vector.broadcast %5 : vector<1x96xf32> to vector<64x96xf32>
    %7 = arith.addf %4, %6 : vector<64x96xf32>
    %8 = vector.shape_cast %7 : vector<64x96xf32> to vector<4x16x96xf32>
    %9 = arith.truncf %8 : vector<4x16x96xf32> to vector<4x16x96xbf16>
    %10 = vector.extract_strided_slice %9 {offsets = [0, 0, 0], sizes = [4, 16, 8], strides = [1, 1, 1]} : vector<4x16x96xbf16> to vector<4x16x8xbf16>
    %11 = vector.extract_strided_slice %9 {offsets = [0, 0, 32], sizes = [4, 16, 8], strides = [1, 1, 1]} : vector<4x16x96xbf16> to vector<4x16x8xbf16>
    %12 = vector.extract_strided_slice %9 {offsets = [0, 0, 64], sizes = [4, 16, 8], strides = [1, 1, 1]} : vector<4x16x96xbf16> to vector<4x16x8xbf16>
    "tpu.trace_start"() <{level = 10 : i32, message = "wnd,wmd->wnm"}> : () -> ()
    %cst_6 = arith.constant dense<0.000000e+00> : vector<4x16x16xf32>
    %13 = tpu.matmul %10, %11, %cst_6 {dimension_numbers = #tpu.dot_dimension_numbers<[2], [2], [1], [1], [0, 0, 0, 1, 1, 1], [0], [0]>} : vector<4x16x8xbf16>, vector<4x16x8xbf16>, vector<4x16x16xf32> -> vector<4x16x16xf32>
    "tpu.trace_stop"() : () -> ()
    %14 = vector.shape_cast %13 : vector<4x16x16xf32> to vector<1x4x16x16xf32>
    %c0_7 = arith.constant 0 : index
    %c0_8 = arith.constant 0 : index
    %c0_9 = arith.constant 0 : index
    %c0_10 = arith.constant 0 : index
    %15 = vector.load %arg6[%c0_7, %c0_8, %c0_9, %c0_10] : memref<4x4x16x16xf32, #tpu.memory_space<vmem>>, vector<1x4x16x16xf32>
    %16 = vector.shape_cast %15 : vector<1x4x16x16xf32> to vector<4x16x16xf32>
    %17 = vector.shape_cast %16 : vector<4x16x16xf32> to vector<1x4x16x16xf32>
    %18 = arith.addf %14, %17 : vector<1x4x16x16xf32>
    %cst_11 = arith.constant dense<0xFF800000> : vector<1x4x16xf32>
    %19 = vector.multi_reduction <maximumf>, %18, %cst_11 [3] : vector<1x4x16x16xf32> to vector<1x4x16xf32>
    %20 = vector.shape_cast %19 : vector<1x4x16xf32> to vector<1x4x16x1xf32>
    %21 = vector.broadcast %20 : vector<1x4x16x1xf32> to vector<1x4x16x16xf32>
    %22 = arith.subf %18, %21 : vector<1x4x16x16xf32>
    %23 = math.exp %22 : vector<1x4x16x16xf32>
    %cst_12 = arith.constant dense<0.000000e+00> : vector<1x4x16xf32>
    %24 = vector.multi_reduction <add>, %23, %cst_12 [3] : vector<1x4x16x16xf32> to vector<1x4x16xf32>
    %25 = vector.shape_cast %24 : vector<1x4x16xf32> to vector<1x4x16x1xf32>
    %26 = tpu.reciprocal %25 {approx = true} : vector<1x4x16x1xf32> -> vector<1x4x16x1xf32>
    %27 = vector.broadcast %26 : vector<1x4x16x1xf32> to vector<1x4x16x16xf32>
    %28 = arith.mulf %23, %27 : vector<1x4x16x16xf32>
    %29 = vector.shape_cast %28 : vector<1x4x16x16xf32> to vector<4x16x16xf32>
    %30 = arith.truncf %29 : vector<4x16x16xf32> to vector<4x16x16xbf16>
    "tpu.trace_start"() <{level = 10 : i32, message = "wnm,wmd->wnd"}> : () -> ()
    %cst_13 = arith.constant dense<0.000000e+00> : vector<4x16x8xf32>
    %31 = tpu.matmul %30, %12, %cst_13 {dimension_numbers = #tpu.dot_dimension_numbers<[2], [1], [1], [2], [0, 0, 0, 1, 1, 2], [0], [0]>} : vector<4x16x16xbf16>, vector<4x16x8xbf16>, vector<4x16x8xf32> -> vector<4x16x8xf32>
    "tpu.trace_stop"() : () -> ()
    %32 = vector.extract_strided_slice %9 {offsets = [0, 0, 8], sizes = [4, 16, 8], strides = [1, 1, 1]} : vector<4x16x96xbf16> to vector<4x16x8xbf16>
    %33 = vector.extract_strided_slice %9 {offsets = [0, 0, 40], sizes = [4, 16, 8], strides = [1, 1, 1]} : vector<4x16x96xbf16> to vector<4x16x8xbf16>
    %34 = vector.extract_strided_slice %9 {offsets = [0, 0, 72], sizes = [4, 16, 8], strides = [1, 1, 1]} : vector<4x16x96xbf16> to vector<4x16x8xbf16>
    "tpu.trace_start"() <{level = 10 : i32, message = "wnd,wmd->wnm"}> : () -> ()
    %cst_14 = arith.constant dense<0.000000e+00> : vector<4x16x16xf32>
    %35 = tpu.matmul %32, %33, %cst_14 {dimension_numbers = #tpu.dot_dimension_numbers<[2], [2], [1], [1], [0, 0, 0, 1, 1, 1], [0], [0]>} : vector<4x16x8xbf16>, vector<4x16x8xbf16>, vector<4x16x16xf32> -> vector<4x16x16xf32>
    "tpu.trace_stop"() : () -> ()
    %36 = vector.shape_cast %35 : vector<4x16x16xf32> to vector<1x4x16x16xf32>
    %c1 = arith.constant 1 : index
    %c0_15 = arith.constant 0 : index
    %c0_16 = arith.constant 0 : index
    %c0_17 = arith.constant 0 : index
    %37 = vector.load %arg6[%c1, %c0_15, %c0_16, %c0_17] : memref<4x4x16x16xf32, #tpu.memory_space<vmem>>, vector<1x4x16x16xf32>
    %38 = vector.shape_cast %37 : vector<1x4x16x16xf32> to vector<4x16x16xf32>
    %39 = vector.shape_cast %38 : vector<4x16x16xf32> to vector<1x4x16x16xf32>
    %40 = arith.addf %36, %39 : vector<1x4x16x16xf32>
    %cst_18 = arith.constant dense<0xFF800000> : vector<1x4x16xf32>
    %41 = vector.multi_reduction <maximumf>, %40, %cst_18 [3] : vector<1x4x16x16xf32> to vector<1x4x16xf32>
    %42 = vector.shape_cast %41 : vector<1x4x16xf32> to vector<1x4x16x1xf32>
    %43 = vector.broadcast %42 : vector<1x4x16x1xf32> to vector<1x4x16x16xf32>
    %44 = arith.subf %40, %43 : vector<1x4x16x16xf32>
    %45 = math.exp %44 : vector<1x4x16x16xf32>
    %cst_19 = arith.constant dense<0.000000e+00> : vector<1x4x16xf32>
    %46 = vector.multi_reduction <add>, %45, %cst_19 [3] : vector<1x4x16x16xf32> to vector<1x4x16xf32>
    %47 = vector.shape_cast %46 : vector<1x4x16xf32> to vector<1x4x16x1xf32>
    %48 = tpu.reciprocal %47 {approx = true} : vector<1x4x16x1xf32> -> vector<1x4x16x1xf32>
    %49 = vector.broadcast %48 : vector<1x4x16x1xf32> to vector<1x4x16x16xf32>
    %50 = arith.mulf %45, %49 : vector<1x4x16x16xf32>
    %51 = vector.shape_cast %50 : vector<1x4x16x16xf32> to vector<4x16x16xf32>
    %52 = arith.truncf %51 : vector<4x16x16xf32> to vector<4x16x16xbf16>
    "tpu.trace_start"() <{level = 10 : i32, message = "wnm,wmd->wnd"}> : () -> ()
    %cst_20 = arith.constant dense<0.000000e+00> : vector<4x16x8xf32>
    %53 = tpu.matmul %52, %34, %cst_20 {dimension_numbers = #tpu.dot_dimension_numbers<[2], [1], [1], [2], [0, 0, 0, 1, 1, 2], [0], [0]>} : vector<4x16x16xbf16>, vector<4x16x8xbf16>, vector<4x16x8xf32> -> vector<4x16x8xf32>
    "tpu.trace_stop"() : () -> ()
    %54 = vector.extract_strided_slice %9 {offsets = [0, 0, 16], sizes = [4, 16, 8], strides = [1, 1, 1]} : vector<4x16x96xbf16> to vector<4x16x8xbf16>
    %55 = vector.extract_strided_slice %9 {offsets = [0, 0, 48], sizes = [4, 16, 8], strides = [1, 1, 1]} : vector<4x16x96xbf16> to vector<4x16x8xbf16>
    %56 = vector.extract_strided_slice %9 {offsets = [0, 0, 80], sizes = [4, 16, 8], strides = [1, 1, 1]} : vector<4x16x96xbf16> to vector<4x16x8xbf16>
    "tpu.trace_start"() <{level = 10 : i32, message = "wnd,wmd->wnm"}> : () -> ()
    %cst_21 = arith.constant dense<0.000000e+00> : vector<4x16x16xf32>
    %57 = tpu.matmul %54, %55, %cst_21 {dimension_numbers = #tpu.dot_dimension_numbers<[2], [2], [1], [1], [0, 0, 0, 1, 1, 1], [0], [0]>} : vector<4x16x8xbf16>, vector<4x16x8xbf16>, vector<4x16x16xf32> -> vector<4x16x16xf32>
    "tpu.trace_stop"() : () -> ()
    %58 = vector.shape_cast %57 : vector<4x16x16xf32> to vector<1x4x16x16xf32>
    %c2 = arith.constant 2 : index
    %c0_22 = arith.constant 0 : index
    %c0_23 = arith.constant 0 : index
    %c0_24 = arith.constant 0 : index
    %59 = vector.load %arg6[%c2, %c0_22, %c0_23, %c0_24] : memref<4x4x16x16xf32, #tpu.memory_space<vmem>>, vector<1x4x16x16xf32>
    %60 = vector.shape_cast %59 : vector<1x4x16x16xf32> to vector<4x16x16xf32>
    %61 = vector.shape_cast %60 : vector<4x16x16xf32> to vector<1x4x16x16xf32>
    %62 = arith.addf %58, %61 : vector<1x4x16x16xf32>
    %cst_25 = arith.constant dense<0xFF800000> : vector<1x4x16xf32>
    %63 = vector.multi_reduction <maximumf>, %62, %cst_25 [3] : vector<1x4x16x16xf32> to vector<1x4x16xf32>
    %64 = vector.shape_cast %63 : vector<1x4x16xf32> to vector<1x4x16x1xf32>
    %65 = vector.broadcast %64 : vector<1x4x16x1xf32> to vector<1x4x16x16xf32>
    %66 = arith.subf %62, %65 : vector<1x4x16x16xf32>
    %67 = math.exp %66 : vector<1x4x16x16xf32>
    %cst_26 = arith.constant dense<0.000000e+00> : vector<1x4x16xf32>
    %68 = vector.multi_reduction <add>, %67, %cst_26 [3] : vector<1x4x16x16xf32> to vector<1x4x16xf32>
    %69 = vector.shape_cast %68 : vector<1x4x16xf32> to vector<1x4x16x1xf32>
    %70 = tpu.reciprocal %69 {approx = true} : vector<1x4x16x1xf32> -> vector<1x4x16x1xf32>
    %71 = vector.broadcast %70 : vector<1x4x16x1xf32> to vector<1x4x16x16xf32>
    %72 = arith.mulf %67, %71 : vector<1x4x16x16xf32>
    %73 = vector.shape_cast %72 : vector<1x4x16x16xf32> to vector<4x16x16xf32>
    %74 = arith.truncf %73 : vector<4x16x16xf32> to vector<4x16x16xbf16>
    "tpu.trace_start"() <{level = 10 : i32, message = "wnm,wmd->wnd"}> : () -> ()
    %cst_27 = arith.constant dense<0.000000e+00> : vector<4x16x8xf32>
    %75 = tpu.matmul %74, %56, %cst_27 {dimension_numbers = #tpu.dot_dimension_numbers<[2], [1], [1], [2], [0, 0, 0, 1, 1, 2], [0], [0]>} : vector<4x16x16xbf16>, vector<4x16x8xbf16>, vector<4x16x8xf32> -> vector<4x16x8xf32>
    "tpu.trace_stop"() : () -> ()
    %76 = vector.extract_strided_slice %9 {offsets = [0, 0, 24], sizes = [4, 16, 8], strides = [1, 1, 1]} : vector<4x16x96xbf16> to vector<4x16x8xbf16>
    %77 = vector.extract_strided_slice %9 {offsets = [0, 0, 56], sizes = [4, 16, 8], strides = [1, 1, 1]} : vector<4x16x96xbf16> to vector<4x16x8xbf16>
    %78 = vector.extract_strided_slice %9 {offsets = [0, 0, 88], sizes = [4, 16, 8], strides = [1, 1, 1]} : vector<4x16x96xbf16> to vector<4x16x8xbf16>
    "tpu.trace_start"() <{level = 10 : i32, message = "wnd,wmd->wnm"}> : () -> ()
    %cst_28 = arith.constant dense<0.000000e+00> : vector<4x16x16xf32>
    %79 = tpu.matmul %76, %77, %cst_28 {dimension_numbers = #tpu.dot_dimension_numbers<[2], [2], [1], [1], [0, 0, 0, 1, 1, 1], [0], [0]>} : vector<4x16x8xbf16>, vector<4x16x8xbf16>, vector<4x16x16xf32> -> vector<4x16x16xf32>
    "tpu.trace_stop"() : () -> ()
    %80 = vector.shape_cast %79 : vector<4x16x16xf32> to vector<1x4x16x16xf32>
    %c3 = arith.constant 3 : index
    %c0_29 = arith.constant 0 : index
    %c0_30 = arith.constant 0 : index
    %c0_31 = arith.constant 0 : index
    %81 = vector.load %arg6[%c3, %c0_29, %c0_30, %c0_31] : memref<4x4x16x16xf32, #tpu.memory_space<vmem>>, vector<1x4x16x16xf32>
    %82 = vector.shape_cast %81 : vector<1x4x16x16xf32> to vector<4x16x16xf32>
    %83 = vector.shape_cast %82 : vector<4x16x16xf32> to vector<1x4x16x16xf32>
    %84 = arith.addf %80, %83 : vector<1x4x16x16xf32>
    %cst_32 = arith.constant dense<0xFF800000> : vector<1x4x16xf32>
    %85 = vector.multi_reduction <maximumf>, %84, %cst_32 [3] : vector<1x4x16x16xf32> to vector<1x4x16xf32>
    %86 = vector.shape_cast %85 : vector<1x4x16xf32> to vector<1x4x16x1xf32>
    %87 = vector.broadcast %86 : vector<1x4x16x1xf32> to vector<1x4x16x16xf32>
    %88 = arith.subf %84, %87 : vector<1x4x16x16xf32>
    %89 = math.exp %88 : vector<1x4x16x16xf32>
    %cst_33 = arith.constant dense<0.000000e+00> : vector<1x4x16xf32>
    %90 = vector.multi_reduction <add>, %89, %cst_33 [3] : vector<1x4x16x16xf32> to vector<1x4x16xf32>
    %91 = vector.shape_cast %90 : vector<1x4x16xf32> to vector<1x4x16x1xf32>
    %92 = tpu.reciprocal %91 {approx = true} : vector<1x4x16x1xf32> -> vector<1x4x16x1xf32>
    %93 = vector.broadcast %92 : vector<1x4x16x1xf32> to vector<1x4x16x16xf32>
    %94 = arith.mulf %89, %93 : vector<1x4x16x16xf32>
    %95 = vector.shape_cast %94 : vector<1x4x16x16xf32> to vector<4x16x16xf32>
    %96 = arith.truncf %95 : vector<4x16x16xf32> to vector<4x16x16xbf16>
    "tpu.trace_start"() <{level = 10 : i32, message = "wnm,wmd->wnd"}> : () -> ()
    %cst_34 = arith.constant dense<0.000000e+00> : vector<4x16x8xf32>
    %97 = tpu.matmul %96, %78, %cst_34 {dimension_numbers = #tpu.dot_dimension_numbers<[2], [1], [1], [2], [0, 0, 0, 1, 1, 2], [0], [0]>} : vector<4x16x16xbf16>, vector<4x16x8xbf16>, vector<4x16x8xf32> -> vector<4x16x8xf32>
    "tpu.trace_stop"() : () -> ()
    %98 = tpu.concatenate %31, %53, %75, %97 in 2 : vector<4x16x8xf32>, vector<4x16x8xf32>, vector<4x16x8xf32>, vector<4x16x8xf32> -> vector<4x16x32xf32>
    %99 = vector.shape_cast %98 : vector<4x16x32xf32> to vector<64x32xf32>
    %100 = arith.truncf %99 : vector<64x32xf32> to vector<64x32xbf16>
    %c0_35 = arith.constant 0 : index
    %c0_36 = arith.constant 0 : index
    %101 = vector.load %arg4[%c0_35, %c0_36] : memref<32x32xbf16, #tpu.memory_space<vmem>>, vector<32x32xbf16>
    %cst_37 = arith.constant dense<0.000000e+00> : vector<64x32xf32>
    %102 = tpu.matmul %100, %101, %cst_37 {dimension_numbers = #tpu.dot_dimension_numbers<[1], [0], [0], [1], [0, 0, 1, 1], [], []>} : vector<64x32xbf16>, vector<32x32xbf16>, vector<64x32xf32> -> vector<64x32xf32>
    %c0_38 = arith.constant 0 : index
    %c0_39 = arith.constant 0 : index
    %103 = vector.load %arg5[%c0_38, %c0_39] : memref<1x32xf32, #tpu.memory_space<vmem>>, vector<1x32xf32>
    %104 = vector.broadcast %103 : vector<1x32xf32> to vector<64x32xf32>
    %105 = arith.addf %102, %104 : vector<64x32xf32>
    %106 = vector.shape_cast %105 : vector<64x32xf32> to vector<4x16x32xf32>
    %c0_40 = arith.constant 0 : index
    %c0_41 = arith.constant 0 : index
    %c0_42 = arith.constant 0 : index
    %107 = vector.load %arg7[%c0_40, %c0_41, %c0_42] : memref<4x16x32xf32, #tpu.memory_space<vmem>>, vector<4x16x32xf32>
    tpu.vector_store %arg7[%c0_40, %c0_41, %c0_42], %106 {strides = array<i32>} : memref<4x16x32xf32, #tpu.memory_space<vmem>>, vector<4x16x32xf32>,
    return
  }
  func.func @transform_0(%arg0: i32) -> (i32, i32, i32) {
    %c0_i32 = arith.constant 0 : i32
    %c0_i32_0 = arith.constant 0 : i32
    %c0_i32_1 = arith.constant 0 : i32
    return %arg0, %c0_i32, %c0_i32_0 : i32, i32, i32
  }
  func.func @transform_1(%arg0: i32) -> (i32, i32) {
    %c0_i32 = arith.constant 0 : i32
    %c0_i32_0 = arith.constant 0 : i32
    %c0_i32_1 = arith.constant 0 : i32
    return %c0_i32, %c0_i32_0 : i32, i32
  }
  func.func @transform_2(%arg0: i32) -> (i32, i32) {
    %c0_i32 = arith.constant 0 : i32
    %c0_i32_0 = arith.constant 0 : i32
    %c0_i32_1 = arith.constant 0 : i32
    return %c0_i32, %c0_i32_0 : i32, i32
  }
  func.func @transform_3(%arg0: i32) -> (i32, i32) {
    %c0_i32 = arith.constant 0 : i32
    %c0_i32_0 = arith.constant 0 : i32
    %c0_i32_1 = arith.constant 0 : i32
    return %c0_i32, %c0_i32_0 : i32, i32
  }
  func.func @transform_4(%arg0: i32) -> (i32, i32) {
    %c0_i32 = arith.constant 0 : i32
    %c0_i32_0 = arith.constant 0 : i32
    %c0_i32_1 = arith.constant 0 : i32
    return %c0_i32, %c0_i32_0 : i32, i32
  }
  func.func @transform_5(%arg0: i32) -> (i32, i32, i32, i32) {
    %c0_i32 = arith.constant 0 : i32
    %c0_i32_0 = arith.constant 0 : i32
    %c0_i32_1 = arith.constant 0 : i32
    %c0_i32_2 = arith.constant 0 : i32
    %c0_i32_3 = arith.constant 0 : i32
    return %c0_i32, %c0_i32_0, %c0_i32_1, %c0_i32_2 : i32, i32, i32, i32
  }
  func.func @transform_6(%arg0: i32) -> (i32, i32, i32) {
    %c0_i32 = arith.constant 0 : i32
    %c0_i32_0 = arith.constant 0 : i32
    %c0_i32_1 = arith.constant 0 : i32
    return %arg0, %c0_i32, %c0_i32_0 : i32, i32, i32
  }
}

</mosaic_0001>

<bundles_post_ra>
// kernel: tpu_custom_call.1
= control target key start
LH: loop header
LB: loop body
LE: loop exit
PB: predicated region body
PF: predicated region fallthrough
CT: control target
= control target key end

     0   :  { %11 = vsyncpa [#allocation3], 0  ;;  %s4610_s0 = inlined_call_operand.hbm [shape: f32[8,16,32], index: 0, kind: input, shape index: {}]   ;;  %s4611_s1 = inlined_call_operand.hbm [shape: bf16[32,96], index: 1, kind: input, shape index: {}]   ;;  %s4612_s2 = inlined_call_operand.hbm [shape: f32[1,96], index: 2, kind: input, shape index: {}]   ;;  %s4613_s3 = inlined_call_operand.hbm [shape: bf16[32,32], index: 3, kind: input, shape index: {}]   ;;  %s4614_s4 = inlined_call_operand.hbm [shape: f32[1,32], index: 4, kind: input, shape index: {}]   ;;  %s4615_s5 = inlined_call_operand.hbm [shape: f32[4,4,16,16], index: 5, kind: input, shape index: {}]   ;;  %s4616_s6 = inlined_call_operand.hbm [shape: f32[8,16,32], index: 6, kind: output, shape index: {}]  }
   0x1   :  { %13 = vsyncpa [#allocation3 + $0x1], 0 }
   0x2   :  { %14 = vsyncpa [#allocation6], 0 }
   0x3   :  { %15 = vsyncpa [#allocation9], 0 }
   0x4   :  { %16 = vsyncpa [#allocation12], 0 }
   0x5   :  { %17 = vsyncpa [#allocation4], 0 }
   0x6   :  { %19 = vsyncpa [#allocation4 + $0x1], 0  ;;  %s3825_s21 = smov 0   ;;  %s3827_s22 = smov 0  }
   0x7   :  { %s3829_s23 = smov 0   ;;  %s3831_s24 = smov 0  }
   0x8 LB: > { %s3762_s25 = smov [#allocation5]   ;;  %s3846_s27 = sadd.s32 4294967295, %s3760_s24   ;;  %s3760_s24 = sphi %s3831_s24, %s4641_s24   ;;  %s3756_s23 = sphi %s3829_s23, %s4640_s23   ;;  %s3752_s22 = sphi %s3827_s22, %s4639_s22   ;;  %s3748_s21 = sphi %s3825_s21, %s4638_s21  }
   0x9   : > { %s199_s26 = sshll.u32 %s3762_s25, 4  ;;  %p2831_p0 = scmp.ge.s32.totalorder %s3760_s24, 1  ;;  %s3851_s26 = int_to_ptr.vmem [resolvable:$true] %s199_s26 }
   0xa   : > { %p4617_p1 = scmp.eq.s32.totalorder %s3846_s27, 0  ;;  %p187_p2 = scmp.lt.s32.totalorder %s3760_s24, 3 }
   0xb   : > { %s3763_s29 = smov [#allocation8]   ;;  %s3764_s8 = smov [#allocation7]  }
   0xc   : > { %p3853_p3 = pnand %p2831_p0, %p187_p2  ;;  %s223_s30 = sshll.u32 %s3763_s29, 4  ;;  %s3866_s30 = int_to_ptr.vmem [resolvable:$true] %s223_s30 }
   0xd   : > { %s213_s9 = sshll.u32 %s3764_s8, 4  ;;  %s3512_s12 = scalar_lea.hbm %s4611_s1, 256  ;;  %s3868_s9 = int_to_ptr.vmem [resolvable:$true] %s213_s9 }
   0xe   : > { %s4620_s28 = scalar_select %p3853_p3, 1, 0 }
   0xf   : > { %p3226_p5 = pneg %p3853_p3  ;;  %p3513_p7 = scmp.ne.s32.totalorder %s4611_s1, %s3512_s12 }
  0x10   : > { %p3519_p11 = scmp.lt.u32.totalorder %s3512_s12, %s4611_s1 }
  0x11   : > { %p3862_p6 = pnand %p3226_p5, %p4617_p1 }
  0x13   : > { %p3878_p8 = pneg %p3862_p6 }
  0x15   : > { %p3515_p9 = pnand %p3878_p8, %p3513_p7 }
  0x17   : > { %p3516_p10 = pneg %p3515_p9 }
  0x19   : > { %p3521_p12 = pnand %p3519_p11, %p3516_p10 }
  0x1b   : > { %3524 = shalt.err (!%p3521_p12)
}
  0x1c   : > { %s3525_s18 = scalar_lea.vmem %s3851_s26, 256  ;;  %p3533_p5 = scmp.lt.s32.totalorder %s3851_s26, %s3851_s26 }
  0x1d   : > { %p3526_p13 = scmp.ne.s32.totalorder %s3851_s26, %s3525_s18  ;;  %p3534_p4 = scmp.lt.s32.totalorder %s3525_s18, %s3525_s18 }
  0x1f   : > { %p3528_p0 = pnand %p3526_p13, %p3878_p8  ;;  %p3535_p7 = por %p3534_p4, %p3533_p5 }
  0x21   : > { %p3529_p2 = pneg %p3528_p0 }
  0x23   : > { %p3536_p9 = pnand %p3535_p7, %p3529_p2 }
  0x25   : > { %3539 = shalt.err (!%p3536_p9)
}
  0x26   : > { %s3765_s19 = smov 64   ;;  %s3766_s20 = smov 4  }
  0x27   : > { %3229 = dma.hbm_to_vmem [thread:$0]  (!%p3862_p6), %s4611_s1, 256, %s3851_s26, [#allocation6], %s3765_s19, %s3765_s19, %s3766_s20  }
  0x28   : > { %s3540_s11 = scalar_lea.hbm %s4613_s3, 256 }
  0x29   : > { %p3541_p4 = scmp.ne.s32.totalorder %s4613_s3, %s3540_s11  ;;  %p3547_p12 = scmp.lt.u32.totalorder %s3540_s11, %s4613_s3 }
  0x2b   : > { %p3543_p10 = pnand %p3541_p4, %p3878_p8 }
  0x2d   : > { %p3544_p11 = pneg %p3543_p10 }
  0x2f   : > { %p3549_p13 = pnand %p3547_p12, %p3544_p11 }
  0x31   : > { %3552 = shalt.err (!%p3549_p13)
}
  0x32   : > { %s3553_s26 = scalar_lea.vmem %s3866_s30, 256  ;;  %p3561_p7 = scmp.lt.s32.totalorder %s3866_s30, %s3866_s30 }
  0x33   : > { %p3554_p0 = scmp.ne.s32.totalorder %s3866_s30, %s3553_s26  ;;  %p3562_p9 = scmp.lt.s32.totalorder %s3553_s26, %s3553_s26 }
  0x35   : > { %p3556_p2 = pnand %p3554_p0, %p3878_p8  ;;  %p3563_p4 = por %p3562_p9, %p3561_p7 }
  0x37   : > { %p3557_p5 = pneg %p3556_p2 }
  0x39   : > { %p3564_p10 = pnand %p3563_p4, %p3557_p5 }
  0x3b   : > { %3567 = shalt.err (!%p3564_p10)
}
  0x3c   : > { %3235 = dma.hbm_to_vmem [thread:$0]  (!%p3862_p6), %s4613_s3, 256, %s3866_s30, [#allocation9], %s3765_s19, %s3765_s19, %s3766_s20  }
  0x3d   : > { %s3568_s8 = scalar_lea.hbm %s4612_s2, 16 }
  0x3e   : > { %p3569_p11 = scmp.ne.s32.totalorder %s4612_s2, %s3568_s8  ;;  %p3575_p0 = scmp.lt.u32.totalorder %s3568_s8, %s4612_s2 }
  0x40   : > { %p3571_p12 = pnand %p3569_p11, %p3878_p8 }
  0x42   : > { %p3572_p13 = pneg %p3571_p12 }
  0x44   : > { %p3577_p2 = pnand %p3575_p0, %p3572_p13 }
  0x46   : > { %3580 = shalt.err (!%p3577_p2)
}
  0x47   : > { %s3581_s30 = scalar_lea.vmem %s3868_s9, 16  ;;  %s3588_s19 = scalar_lea.vmem %s3868_s9, 32 }
  0x48   : > { %p3582_p5 = scmp.ne.s32.totalorder %s3868_s9, %s3581_s30  ;;  %p3589_p4 = scmp.lt.s32.totalorder %s3868_s9, %s3868_s9 }
  0x49   : > { %p3590_p10 = scmp.lt.s32.totalorder %s3588_s19, %s3581_s30 }
  0x4a   : > { %p3584_p7 = pnand %p3582_p5, %p3878_p8 }
  0x4b   : > { %p3591_p11 = por %p3590_p10, %p3589_p4 }
  0x4c   : > { %p3585_p9 = pneg %p3584_p7 }
  0x4e   : > { %p3592_p12 = pnand %p3591_p11, %p3585_p9 }
  0x50   : > { %3595 = shalt.err (!%p3592_p12)
}
  0x51   : > { %3232 = dma.hbm_to_vmem [thread:$0]  (!%p3862_p6), %s4612_s2, 16, %s3868_s9, [#allocation6]  }
  0x52   : > { %s3767_s16 = smov [#allocation10]   ;;  %s3768_s17 = smov [#allocation11]  }
  0x53   : > { %s237_s26 = sshll.u32 %s3767_s16, 4  ;;  %s247_s18 = sshll.u32 %s3768_s17, 4  ;;  %s238_s26 = int_to_ptr.vmem [resolvable:$true] %s237_s26  ;;  %s248_s18 = int_to_ptr.vmem [resolvable:$true] %s247_s18 }
  0x54   : > { %s3596_s8 = scalar_lea.hbm %s4614_s4, 16 }
  0x55   : > { %p3597_p13 = scmp.ne.s32.totalorder %s4614_s4, %s3596_s8  ;;  %p3603_p5 = scmp.lt.u32.totalorder %s3596_s8, %s4614_s4 }
  0x57   : > { %p3599_p0 = pnand %p3597_p13, %p3878_p8 }
  0x59   : > { %p3600_p2 = pneg %p3599_p0 }
  0x5b   : > { %p3605_p7 = pnand %p3603_p5, %p3600_p2 }
  0x5d   : > { %3608 = shalt.err (!%p3605_p7)
}
  0x5e   : > { %s3609_s9 = scalar_lea.vmem %s238_s26, 16  ;;  %s3616_s30 = scalar_lea.vmem %s238_s26, 32 }
  0x5f   : > { %p3610_p9 = scmp.ne.s32.totalorder %s238_s26, %s3609_s9  ;;  %p3617_p11 = scmp.lt.s32.totalorder %s238_s26, %s238_s26 }
  0x60   : > { %p3618_p12 = scmp.lt.s32.totalorder %s3616_s30, %s3609_s9 }
  0x61   : > { %p3612_p4 = pnand %p3610_p9, %p3878_p8 }
  0x62   : > { %p3619_p1 = por %p3618_p12, %p3617_p11 }
  0x63   : > { %p3613_p10 = pneg %p3612_p4 }
  0x65   : > { %p3620_p3 = pnand %p3619_p1, %p3613_p10 }
  0x67   : > { %3623 = shalt.err (!%p3620_p3)
}
  0x68   : > { %3238 = dma.hbm_to_vmem [thread:$0]  (!%p3862_p6), %s4614_s4, 16, %s238_s26, [#allocation9]  }
  0x69   : > { %s3624_s17 = scalar_lea.hbm %s4615_s5, 4096 }
  0x6a   : > { %p3625_p13 = scmp.ne.s32.totalorder %s4615_s5, %s3624_s17  ;;  %p3631_p3 = scmp.lt.u32.totalorder %s3624_s17, %s4615_s5 }
  0x6c   : > { %p3627_p0 = pnand %p3625_p13, %p3878_p8 }
  0x6e   : > { %p3628_p1 = pneg %p3627_p0 }
  0x70   : > { %p3633_p2 = pnand %p3631_p3, %p3628_p1 }
  0x72   : > { %3636 = shalt.err (!%p3633_p2)
}
  0x73   : > { %s3637_s11 = scalar_lea.vmem %s248_s18, 4096  ;;  %p3645_p4 = scmp.lt.s32.totalorder %s248_s18, %s248_s18 }
  0x74   : > { %p3638_p5 = scmp.ne.s32.totalorder %s248_s18, %s3637_s11  ;;  %p3646_p10 = scmp.lt.s32.totalorder %s3637_s11, %s3637_s11 }
  0x76   : > { %p3640_p7 = pnand %p3638_p5, %p3878_p8  ;;  %p3647_p11 = por %p3646_p10, %p3645_p4 }
  0x78   : > { %p3641_p9 = pneg %p3640_p7 }
  0x7a   : > { %p3648_p12 = pnand %p3647_p11, %p3641_p9 }
  0x7c   : > { %3651 = shalt.err (!%p3648_p12)
}
  0x7d   : > { %s3769_s26 = smov 128   ;;  %s3770_s15 = smov 8  }
  0x7e   : > { %3241 = dma.hbm_to_vmem [thread:$0]  (!%p3862_p6), %s4615_s5, 4096, %s248_s18, [#allocation12], %s3769_s26, %s3769_s26, %s3770_s15  }
  0x7f   : > { %s2830_s9 = sadd.s32 4294967294, %s3760_s24   ;;  %s3987_s30 = sadd.s32 1, %s3760_s24  }
  0x80   : > { %s32_s19 = sadd.s32 1, %s3756_s23  ;;  %s29_s20 = ssub.s32 %s3760_s24, %s3987_s30 }
  0x81   : > { %p39_p8 = scmp.ne.s32.totalorder %s3756_s23, %s3752_s22  ;;  %p30_p13 = scmp.eq.s32.totalorder %s29_s20, 0 }
  0x82   : > { %p40_p0 = scmp.eq.s32.totalorder %s3760_s24, 0  ;;  %p45_p1 = scmp.ne.s32.totalorder %s3752_s22, %s3748_s21 }
  0x83   : > { %p174_p3 = scmp.eq.s32.totalorder %s3846_s27, 1  ;;  %p4623_p5 = scmp.eq.s32.totalorder %s3846_s27, 0 }
  0x84   : > { %s3999_s7 = scalar_select %p30_p13, %s3756_s23, %s32_s19  }
  0x85   : > { %p41_p2 = por %p40_p0, %p39_p8  ;;  %p4003_p7 = por %p4623_p5, %p45_p1 }
  0x86   : > { %p4007_p6 = por %p174_p3, %p39_p8  ;;  %p180_p9 = scmp.eq.s32.totalorder %s2830_s9, 1 }
  0x87   : > { %p3255_p4 = scmp.lt.s32.totalorder %s3760_s24, 2  ;;  %s261_s16 = sand.u32 1, %s3756_s23  }
  0x88   : > { %s4625_s18 = scalar_select %p4007_p6, 1, 0 }
  0x89   : > { %p4013_p10 = por %p180_p9, %p45_p1  ;;  %s2838_s25 = sshll.u32 %s261_s16, 6 }
  0x8a   : > { %s2903_s29 = sshll.u32 %s3760_s24, 10  ;;  %s265_s12 = scalar_lea.vmem [#allocation2], %s2838_s25 }
  0x8b   : > { %s4626_s17 = scalar_select %p4013_p10, 1, 0 }
  0x8c   : > { %s4021_s11 = scalar_lea.hbm %s4610_s0, %s2903_s29  ;;  %s273_s13 = sshll.u32 %s265_s12, 4  ;;  %s4027_s13 = int_to_ptr.vmem [resolvable:$true] %s273_s13 }
  0x8d   : > { %p4023_p11 = pnand %p3255_p4, %p41_p2  ;;  %s4029_s19 = scalar_lea.sflag [#allocation3], %s261_s16 }
  0x8e   : > { %s3652_s20 = scalar_lea.hbm %s4021_s11, 1024  ;;  %s3657_s8 = scalar_lea.hbm %s4610_s0, 2048 }
  0x8f   : > { %p3653_p12 = scmp.ne.s32.totalorder %s4021_s11, %s3652_s20  ;;  %p3654_p8 = pneg %p4023_p11 }
  0x90   : > { %p3658_p1 = scmp.lt.u32.totalorder %s4021_s11, %s4610_s0  ;;  %p3659_p3 = scmp.lt.u32.totalorder %s3657_s8, %s3652_s20 }
  0x91   : > { %p3655_p13 = pnand %p3654_p8, %p3653_p12  ;;  %p3661_p5 = scmp.lt.u32.totalorder %s3652_s20, %s4021_s11 }
  0x92   : > { %p3660_p2 = por %p3659_p3, %p3658_p1 }
  0x93   : > { %p3656_p0 = pneg %p3655_p13 }
  0x94   : > { %p3662_p9 = por %p3661_p5, %p3660_p2 }
  0x96   : > { %p3663_p4 = pnand %p3662_p9, %p3656_p0 }
  0x98   : > { %3666 = shalt.err (!%p3663_p4)
}
  0x99   : > { %s3667_s16 = scalar_lea.vmem %s4027_s13, 1024  ;;  %s3771_s25 = smov [#allocation2]  }
  0x9a   : > { %p3668_p12 = scmp.ne.s32.totalorder %s4027_s13, %s3667_s16  ;;  %s3672_s29 = sshll.u32 %s3771_s25, 4  ;;  %s3673_s29 = int_to_ptr.vmem [resolvable:$false] %s3672_s29 }
  0x9b   : > { %s3674_s10 = scalar_lea.vmem %s3673_s29, 2048  ;;  %p3675_p6 = scmp.lt.s32.totalorder %s4027_s13, %s3673_s29 }
  0x9c   : > { %p3670_p13 = pnand %p3668_p12, %p3654_p8  ;;  %p3676_p1 = scmp.lt.s32.totalorder %s3674_s10, %s3667_s16 }
  0x9e   : > { %p3671_p10 = pneg %p3670_p13  ;;  %p3677_p3 = por %p3676_p1, %p3675_p6 }
  0xa0   : > { %p3678_p2 = pnand %p3677_p3, %p3671_p10 }
  0xa2   : > { %3681 = shalt.err (!%p3678_p2)
}
  0xa3   : > { %3245 = dma.hbm_to_vmem [thread:$0]  (!%p4023_p11), %s4021_s11, 1024, %s4027_s13, %s4029_s19, %s3769_s26, %s3769_s26, %s3770_s15  }
  0xa4   : > { %p4628_p8 = scmp.ne.s32.totalorder %s4620_s28, 0 }
  0xa5   : > { %s4063_s20 = sand.u32 (!%p4628_p8), 1, %s3752_s22  }
  0xa6   : > { %285 = sbr.rel (%p4628_p8) target bundleno = 3360 (0xd20), region = 44  ;;  %s2843_s8 = sshll.u32 (!%p4628_p8), %s4063_s20, 6 }
  0xa7   : > { %s288_s12 = scalar_lea.sflag (!%p4628_p8), [#allocation3], %s4063_s20  ;;  %s291_s9 = scalar_lea.vmem (!%p4628_p8), [#allocation2], %s2843_s8 }
  0xad   : > { %3727 = dma.done.wait (%p4003_p7), %s288_s12, 1024  }
  0xae   : > { %3729 = vsyncadd (%p4003_p7), %s288_s12, 4294966272  ;;  %p4629_p6 = scmp.eq.s32.totalorder %s3846_s27, 0 }
  0xb0   : > { %3731 = dma.done.wait (%p4629_p6), [#allocation6], 272   ;;  %p4630_p10 = pmov %p4629_p6 }
  0xb1   : > { %p4631_p11 = pmov %p4629_p6 }
  0xb2   : > { %3733 = vsyncadd (%p4630_p10), [#allocation6], 4294967024 }
  0xb3   : > { %3735 = dma.done.wait (%p4631_p11), [#allocation9], 272   ;;  %p4632_p0 = pmov %p4629_p6 }
  0xb5   : > { %3737 = vsyncadd (%p4632_p0), [#allocation9], 4294967024  ;;  %p4633_p5 = pmov %p4632_p0 }
  0xb6   : > { %p4634_p9 = pmov %p4632_p0 }
  0xb7   : > { %3739 = dma.done.wait (%p4633_p5), [#allocation12], 4096  }
  0xb8   : > { %3741 = vsyncadd (%p4634_p9), [#allocation12], 4294963200  ;;  %v3380_v0 = vld [vmem:[#allocation5] sm:$0xff]   ;;  %v3381_v1 = vld [vmem:[#allocation5 + $0x8] sm:$0xff]   ;;  %vm378_vm0 = vcmask 261120   ;;  %v3772_v14 = vmov 0.0  }
  0xb9   : > { %2982 = vmatprep.subr.bf16.mxu0 %v3380_v0  ;;  %3198 = vmatprep.subr.bf16.mxu1 %v3380_v0  ;;  %v343_v2 = vld [vmem:[%s291_s9] sm:$0xff]  ;;  %v344_v3 = vld [vmem:[%s291_s9 + $0x8] sm:$0xff]  ;;  %v345_v7 = vld [vmem:[%s291_s9 + $0x10] sm:$0xff]  ;;  %vm3773_vm1 = vmmov 0   ;;  %s3774_s28 = smov 96   ;;  %vm463_vm2 = vcmask 64512  }
  0xba   : > { %v347_v4 = vld [vmem:[%s291_s9 + $0x20] sm:$0xff]  ;;  %2983 = vmatpush3.bf16.msra.mxu0 %v3380_v0  ;;  %3200 = vmatpush3.bf16.msra.mxu1 %v3380_v0  ;;  %v351_v5 = vpack.c.bf16 %v344_v3, %v343_v2  ;;  %v348_v6 = vld [vmem:[%s291_s9 + $0x28] sm:$0xff]  ;;  %v346_v8 = vld [vmem:[%s291_s9 + $0x18] sm:$0xff]  ;;  %vm677_vm3 = vcmask 130048   ;;  %s3775_s26 = smov 64   ;;  %s3776_s15 = smov 88  }
  0xbb   : > { %2984 = vmatprep.subr.bf16.mxu0 %v3381_v1  ;;  %3199 = vmatprep.subr.bf16.mxu1 %v3381_v1  ;;  %v353_v9 = vpack.c.bf16 %v348_v6, %v347_v4  ;;  %v349_v10 = vld [vmem:[%s291_s9 + $0x30] sm:$0xff]  ;;  %v350_v11 = vld [vmem:[%s291_s9 + $0x38] sm:$0xff]  ;;  %v352_v12 = vpack.c.bf16 %v346_v8, %v345_v7  ;;  %v661_v44 = vld [vmem:[#allocation11] sm:$0xff]  ;;  %s3777_s14 = smov 120   ;;  %s3778_s11 = smov 56   ;;  %vm2573_vm4 = vcmask 195584  }
  0xbc   : > { %2986 = vmatprep.mubr.msk.bf16.mxu0 %vm378_vm0, %v351_v5  ;;  %v354_v13 = vpack.c.bf16 %v350_v11, %v349_v10  ;;  %v2850_v16 = vld [vmem:[#allocation7] ss:$0 sm:$0xff]  ;;  %v665_v45 = vld [vmem:[#allocation11 + $0x20] sm:$0xff]  ;;  %v663_v60 = vld [vmem:[#allocation11 + $0x10] sm:$0xff]  ;;  %s3779_s13 = smov 80   ;;  %s3780_s19 = smov 112  }
  0xbd   : > { %2990 = vmatprep.mubr.msk.bf16.mxu1 %vm378_vm0, %v353_v9  ;;  %v662_v48 = vld [vmem:[#allocation11 + $0x8] sm:$0xff]  ;;  %v664_v63 = vld [vmem:[#allocation11 + $0x18] sm:$0xff]  ;;  %v667_v7 = vld [vmem:[#allocation11 + $0x30] sm:$0xff]  ;;  %s3781_s16 = smov 48   ;;  %s3782_s25 = smov 72  }
  0xbe   : > { %2985 = vmatpush3.bf16.msra.mxu0 %v3381_v1  ;;  %3201 = vmatpush3.bf16.msra.mxu1 %v3381_v1  ;;  %v666_v6 = vld [vmem:[#allocation11 + $0x28] sm:$0xff]  ;;  %v668_v11 = vld [vmem:[#allocation11 + $0x38] sm:$0xff]  ;;  %s3783_s29 = smov 104   ;;  %s3784_s10 = smov 40  }
  0xbf   : > { %2994 = vmatprep.subr.bf16.mxu1 %v3772_v14  ;;  %3006 = vmatprep.subr.bf16.mxu0 %v3772_v14  ;;  %s3785_s12 = smov 8   ;;  %s3786_s9 = smov 16  }
  0xc0   : > { %p4635_p4 = scmp.ne.s32.totalorder %s4625_s18, 0 }
  0xc1   : > { %2987 = vmatmul.mubr.msk.bf16.vlgmr.msra.gmra.mrb[0].mxu0 %vm378_vm0, %v352_v12  ;;  %2991 = vmatmul.mubr.msk.bf16.vlgmr.msra.gmra.mrb[0].mxu1 %vm378_vm0, %v354_v13 }
  0xc2   : > { %2996 = vmatprep.mubr.msk.bf16.mxu1 %vm3773_vm1, %v3772_v14  ;;  %3008 = vmatprep.mubr.msk.bf16.mxu0 %vm3773_vm1, %v3772_v14 }
 0x194   : > { %v2988_v15 = vpop.f32.mrb[0].mxu0  ;;  %v2992_v17 = vpop.f32.mrb[0].mxu1 }
 0x195   : > { %v450_v18 = vadd.f32 %v2992_v17, %v2850_v16  ;;  %v425_v19 = vpop.f32.mrb[1].mxu0  ;;  %v441_v20 = vpop.f32.mrb[1].mxu1  ;;  %v434_v24 = vadd.f32 %v2988_v15, %v2850_v16 }
 0x196   : > { %v442_v21 = vadd.f32 %v2850_v16, %v441_v20  ;;  %v2989_v22 = vpop.f32.mrb[2].mxu0  ;;  %v2993_v23 = vpop.f32.mrb[2].mxu1  ;;  %v426_v29 = vadd.f32 %v2850_v16, %v425_v19 }
 0x197   : > { %v437_v25 = vadd.f32 %v2989_v22, %v2850_v16  ;;  %v453_v26 = vadd.f32 %v2993_v23, %v2850_v16  ;;  %v428_v27 = vpop.f32.mrb[3].mxu0  ;;  %v444_v28 = vpop.f32.mrb[3].mxu1 }
 0x198   : > { %v429_v30 = vadd.f32 %v2850_v16, %v428_v27  ;;  %v445_v31 = vadd.f32 %v2850_v16, %v444_v28 }
 0x199   : > { %v4095_v32 = vpack.c.bf16 %v437_v25, %v434_v24  ;;  %v4097_v33 = vpack.c.bf16 %v453_v26, %v450_v18 }
 0x19a   : > { %v4099_v34 = vpack.c.bf16 %v429_v30, %v426_v29  ;;  %v4101_v35 = vpack.c.bf16 %v445_v31, %v442_v21 }
 0x19c   : > { %562 = vrot.lane.b32.xlu1 %v4101_v35, %s3774_s28  ;;  %461 = vrot.lane.b32.xlu0 %v4099_v34, %s3774_s28 }
 0x1a0   : > { %512 = vrot.lane.b32.xlu0 %v4095_v32, %s3774_s28  ;;  %612 = vrot.lane.b32.xlu1 %v4097_v33, %s3774_s28  ;;  %s3787_s28 = smov 24  }
 0x20e   : > { %v563_v36 = vpop.permute.xlu1 %562  ;;  %v462_v37 = vpop.permute.xlu0 %461 }
 0x20f   : > { %v568_v38 = vsel %vm463_vm2, %v563_v36, 0  ;;  %v468_v39 = vsel %vm463_vm2, %v462_v37, 0 }
 0x210   : > { %2995 = vmatpush3.bf16.xpose.msra.mxu1 %v468_v39  ;;  %3007 = vmatpush3.bf16.xpose.msra.mxu0 %v568_v38 }
 0x211   : > { %3000 = vmatprep.subr.bf16.mxu1 %v3772_v14  ;;  %3018 = vmatprep.subr.bf16.mxu0 %v3772_v14 }
 0x212   : > { %v513_v40 = vpop.permute.xlu0 %512  ;;  %v613_v42 = vpop.permute.xlu1 %612 }
 0x213   : > { %v518_v41 = vsel %vm463_vm2, %v513_v40, 0  ;;  %v618_v43 = vsel %vm463_vm2, %v613_v42, 0 }
 0x217   : > { %2997 = vmatmul.mubr.msk.bf16.vlgmr.msra.gmra.mrb[4].mxu1 %vm463_vm2, %v4099_v34  ;;  %3009 = vmatmul.mubr.msk.bf16.vlgmr.msra.gmra.mrb[4].mxu0 %vm463_vm2, %v4101_v35 }
 0x218   : > { %3001 = vmatpush3.bf16.xpose.msra.mxu1 %v518_v41  ;;  %3002 = vmatprep.mubr.msk.bf16.mxu1 %vm3773_vm1, %v3772_v14 }
 0x219   : > { %3012 = vmatprep.subr.bf16.mxu1 %v3772_v14  ;;  %3020 = vmatprep.mubr.msk.bf16.mxu0 %vm3773_vm1, %v3772_v14 }
 0x21f   : > { %3003 = vmatmul.mubr.msk.bf16.vlgmr.msra.gmra.mrb[8].mxu1 %vm463_vm2, %v4095_v32 }
 0x220   : > { %3013 = vmatpush3.bf16.xpose.msra.mxu1 %v618_v43  ;;  %3014 = vmatprep.mubr.msk.bf16.mxu1 %vm3773_vm1, %v3772_v14 }
 0x221   : > { %3024 = vmatprep.subr.bf16.mxu1 %v3772_v14 }
 0x227   : > { %3015 = vmatmul.mubr.msk.bf16.vlgmr.msra.gmra.mrb[12].mxu1 %vm463_vm2, %v4097_v33 }
 0x228   : > { %3026 = vmatprep.mubr.msk.bf16.mxu1 %vm3773_vm1, %v3772_v14 }
 0x2ea   : > { %v504_v46 = vpop.f32.mrb[4].mxu1  ;;  %v604_v47 = vpop.f32.mrb[4].mxu0 }
 0x2eb   : > { %v669_v49 = vadd.f32 %v661_v44, %v504_v46  ;;  %v673_v50 = vadd.f32 %v665_v45, %v604_v47  ;;  %v2998_v51 = vpop.f32.mrb[5].mxu1  ;;  %v3010_v52 = vpop.f32.mrb[5].mxu0 }
 0x2ec   : > { %v507_v53 = vpop.f32.mrb[6].mxu1  ;;  %v607_v54 = vpop.f32.mrb[6].mxu0 }
 0x2ed   : > { %v670_v55 = vadd.f32 %v662_v48, %v507_v53  ;;  %v2999_v56 = vpop.f32.mrb[7].mxu1  ;;  %v3011_v57 = vpop.f32.mrb[7].mxu0  ;;  %v690_v58 = vsel %vm677_vm3, %v673_v50, -inf  ;;  %v678_v59 = vsel %vm677_vm3, %v669_v49, -inf  ;;  %v674_v8 = vadd.f32 %v666_v6, %v607_v54 }
 0x2ee   : > { %691 = vmax.xlane.f32.xlu1 %v690_v58  ;;  %679 = vmax.xlane.f32.xlu0 %v678_v59 }
 0x2ef   : > { %v681_v61 = vsel %vm677_vm3, %v670_v55, -inf  ;;  %v693_v18 = vsel %vm677_vm3, %v674_v8, -inf }
 0x2f2   : > { %682 = vmax.xlane.f32.xlu1 %v681_v61  ;;  %v554_v62 = vpop.f32.mrb[8].mxu1 }
 0x2f3   : > { %v671_v0 = vadd.f32 %v663_v60, %v554_v62  ;;  %v3004_v1 = vpop.f32.mrb[9].mxu1 }
 0x2f4   : > { %v557_v2 = vpop.f32.mrb[10].mxu1 }
 0x2f5   : > { %v672_v3 = vadd.f32 %v664_v63, %v557_v2  ;;  %v3005_v4 = vpop.f32.mrb[11].mxu1  ;;  %v684_v5 = vsel %vm677_vm3, %v671_v0, -inf }
 0x2f6   : > { %685 = vmax.xlane.f32.xlu0 %v684_v5 }
 0x2f7   : > { %v687_v9 = vsel %vm677_vm3, %v672_v3, -inf }
 0x2fa   : > { %688 = vmax.xlane.f32.xlu0 %v687_v9  ;;  %v654_v10 = vpop.f32.mrb[12].mxu1 }
 0x2fb   : > { %v4136_v12 = vadd.f32 %v667_v7, %v654_v10  ;;  %v3016_v13 = vpop.f32.mrb[13].mxu1 }
 0x2fc   : > { %v657_v15 = vpop.f32.mrb[14].mxu1 }
 0x2fd   : > { %v4138_v16 = vadd.f32 %v668_v11, %v657_v15  ;;  %v3017_v17 = vpop.f32.mrb[15].mxu1  ;;  %v696_v19 = vsel %vm677_vm3, %v4136_v12, -inf }
 0x2fe   : > { %694 = vmax.xlane.f32.xlu0 %v693_v18  ;;  %697 = vmax.xlane.f32.xlu1 %v696_v19 }
 0x2ff   : > { %v699_v20 = vsel %vm677_vm3, %v4138_v16, -inf }
 0x302   : > { %700 = vmax.xlane.f32.xlu0 %v699_v20 }
 0x30f   : > { %770 = vrot.lane.b32.xlu1 %v4099_v34, %s3775_s26 }
 0x37b   : > { %v692_v21 = vpop.xlane.xlu1 %691  ;;  %v680_v22 = vpop.xlane.xlu0 %679 }
 0x37c   : > { %v706_v23 = vsub.f32 %v673_v50, %v692_v21  ;;  %v702_v24 = vsub.f32 %v669_v49, %v680_v22 }
 0x37e   : > { %v710_v25 = vmul.f32 1.442695, %v702_v24  ;;  %v718_v26 = vmul.f32 1.442695, %v706_v23 }
 0x37f   : > { %v683_v27 = vpop.xlane.xlu1 %682 }
 0x380   : > { %v703_v28 = vsub.f32 %v670_v55, %v683_v27  ;;  %3384 = vpow2.f32 %v710_v25 }
 0x381   : > { %3386 = vpow2.f32 %v718_v26 }
 0x382   : > { %v712_v29 = vmul.f32 1.442695, %v703_v28 }
 0x383   : > { %v686_v30 = vpop.xlane.xlu0 %685 }
 0x384   : > { %3388 = vpow2.f32 %v712_v29  ;;  %v704_v31 = vsub.f32 %v671_v0, %v686_v30 }
 0x386   : > { %v714_v36 = vmul.f32 1.442695, %v704_v31 }
 0x387   : > { %v689_v37 = vpop.xlane.xlu0 %688 }
 0x388   : > { %3390 = vpow2.f32 %v714_v36  ;;  %v705_v39 = vsub.f32 %v672_v3, %v689_v37 }
 0x38a   : > { %v4147_v38 = vpop.eup %3384  ;;  %v716_v47 = vmul.f32 1.442695, %v705_v39 }
 0x38b   : > { %v698_v40 = vpop.xlane.xlu1 %697  ;;  %v695_v41 = vpop.xlane.xlu0 %694  ;;  %v726_v43 = vsel %vm677_vm3, %v4147_v38, 0.0 }
 0x38c   : > { %v707_v42 = vsub.f32 %v674_v8, %v695_v41  ;;  %v4151_v44 = vpop.eup %3386  ;;  %727 = vadd.xlane.f32.xlu1 %v726_v43  ;;  %v708_v57 = vsub.f32 %v4136_v12, %v698_v40 }
 0x38d   : > { %v738_v50 = vsel %vm677_vm3, %v4151_v44, 0.0 }
 0x38e   : > { %v3389_v45 = vpop.eup %3388  ;;  %v720_v46 = vmul.f32 1.442695, %v707_v42  ;;  %v722_v58 = vmul.f32 1.442695, %v708_v57 }
 0x38f   : > { %v771_v48 = vpop.permute.xlu1 %770  ;;  %v729_v49 = vsel %vm677_vm3, %v3389_v45, 0.0  ;;  %v701_v59 = vpop.xlane.xlu0 %700 }
 0x390   : > { %3019 = vmatpush3.bf16.msra.mxu0 %v771_v48  ;;  %730 = vadd.xlane.f32.xlu0 %v729_v49  ;;  %3392 = vpow2.f32 %v720_v46  ;;  %v709_v60 = vsub.f32 %v4138_v16, %v701_v59 }
 0x391   : > { %739 = vadd.xlane.f32.xlu1 %v738_v50  ;;  %3030 = vmatprep.subr.bf16.mxu0 %v3772_v14  ;;  %3394 = vpow2.f32 %v716_v47 }
 0x392   : > { %v4157_v51 = vpop.eup %3390  ;;  %3396 = vpow2.f32 %v722_v58  ;;  %v724_v61 = vmul.f32 1.442695, %v709_v60 }
 0x393   : > { %v732_v52 = vsel %vm677_vm3, %v4157_v51, 0.0 }
 0x394   : > { %3398 = vpow2.f32 %v724_v61 }
 0x395   : > { %733 = vadd.xlane.f32.xlu1 %v732_v52 }
 0x39a   : > { %v3393_v53 = vpop.eup %3392 }
 0x39b   : > { %v741_v54 = vsel %vm677_vm3, %v3393_v53, 0.0  ;;  %v4162_v55 = vpop.eup %3394 }
 0x39c   : > { %742 = vadd.xlane.f32.xlu0 %v741_v54  ;;  %v735_v56 = vsel %vm677_vm3, %v4162_v55, 0.0  ;;  %v4174_v62 = vpop.eup %3396 }
 0x39d   : > { %v744_v63 = vsel %vm677_vm3, %v4174_v62, 0.0 }
 0x39e   : > { %v4178_v0 = vpop.eup %3398 }
 0x39f   : > { %v747_v1 = vsel %vm677_vm3, %v4178_v0, 0.0 }
 0x3a0   : > { %736 = vadd.xlane.f32.xlu0 %v735_v56 }
 0x3a6   : > { %864 = vrot.lane.b32.xlu1 %v4101_v35, %s3775_s26 }
 0x3aa   : > { %911 = vrot.lane.b32.xlu1 %v4097_v33, %s3775_s26 }
 0x3b6   : > { %817 = vrot.lane.b32.xlu0 %v4095_v32, %s3775_s26  ;;  %s339_s26 = scalar_lea.vmem [#allocation13], %s2843_s8 }
 0x3ce   : > { %745 = vadd.xlane.f32.xlu1 %v744_v63 }
 0x3d5   : > { %748 = vadd.xlane.f32.xlu0 %v747_v1 }
 0x3df   : > { %1011 = vrot.lane.b32.xlu1 %v4095_v32, %s3776_s15 }
 0x3e3   : > { %1062 = vrot.lane.b32.xlu1 %v4101_v35, %s3776_s15 }
 0x3e7   : > { %1113 = vrot.lane.b32.xlu1 %v4097_v33, %s3776_s15 }
 0x3eb   : > { %1111 = vrot.lane.b32.xlu1 %v4097_v33, %s3777_s14  ;;  %960 = vrot.lane.b32.xlu0 %v4099_v34, %s3776_s15  ;;  %s2905_s15 = sshll.u32 %s3846_s27, 10  ;;  %s2695_s27 = scalar_lea.sflag [#allocation4], %s4063_s20 }
 0x3ef   : > { %958 = vrot.lane.b32.xlu0 %v4099_v34, %s3777_s14 }
 0x3f3   : > { %1009 = vrot.lane.b32.xlu0 %v4095_v32, %s3777_s14 }
 0x3f7   : > { %1060 = vrot.lane.b32.xlu0 %v4101_v35, %s3777_s14  ;;  %s2709_s14 = sshll.u32 %s339_s26, 4  ;;  %s4563_s14 = int_to_ptr.vmem [resolvable:$true] %s2709_s14 }
 0x419   : > { %v728_v2 = vpop.xlane.xlu1 %727 }
 0x41a   : > { %3400 = vrcp.f32 %v728_v2 }
 0x41d   : > { %v731_v3 = vpop.xlane.xlu0 %730 }
 0x41e   : > { %3402 = vrcp.f32 %v731_v3  ;;  %v740_v4 = vpop.xlane.xlu1 %739 }
 0x41f   : > { %3404 = vrcp.f32 %v740_v4 }
 0x422   : > { %v734_v6 = vpop.xlane.xlu1 %733 }
 0x424   : > { %v3401_v5 = vpop.eup %3400 }
 0x425   : > { %v758_v8 = vmul.f32 %v3401_v5, %v4147_v38 }
 0x426   : > { %v865_v12 = vpop.permute.xlu1 %864 }
 0x428   : > { %v3403_v7 = vpop.eup %3402 }
 0x429   : > { %v759_v9 = vmul.f32 %v3403_v7, %v3389_v45  ;;  %v743_v10 = vpop.xlane.xlu0 %742  ;;  %v3405_v16 = vpop.eup %3404 }
 0x42a   : > { %3406 = vrcp.f32 %v743_v10  ;;  %v762_v18 = vmul.f32 %v3405_v16, %v4151_v44  ;;  %v912_v26 = vpop.permute.xlu1 %911 }
 0x42b   : > { %v766_v11 = vpack.c.bf16 %v759_v9, %v758_v8  ;;  %3408 = vrcp.f32 %v734_v6 }
 0x42d   : > { %3021 = vmatmul.mubr.msk.bf16.vlgmr.msra.gmra.mrb[8].mxu0 %vm677_vm3, %v766_v11  ;;  %v737_v13 = vpop.xlane.xlu0 %736 }
 0x42e   : > { %3031 = vmatpush3.bf16.msra.mxu0 %v865_v12  ;;  %3032 = vmatprep.mubr.msk.bf16.mxu0 %vm3773_vm1, %v3772_v14  ;;  %3410 = vrcp.f32 %v737_v13  ;;  %v1167_v12 = vld [vmem:[#allocation11 + $0x60] sm:$0xff] }
 0x42f   : > { %3042 = vmatprep.subr.bf16.mxu0 %v3772_v14 }
 0x431   : > { %v818_v15 = vpop.permute.xlu0 %817 }
 0x432   : > { %3025 = vmatpush3.bf16.msra.mxu1 %v818_v15 }
 0x433   : > { %3036 = vmatprep.subr.bf16.mxu1 %v3772_v14 }
 0x434   : > { %v3407_v17 = vpop.eup %3406 }
 0x435   : > { %v763_v19 = vmul.f32 %v3407_v17, %v3393_v53  ;;  %v3409_v20 = vpop.eup %3408  ;;  %v1165_v17 = vld [vmem:[#allocation11 + $0x50] sm:$0xff] }
 0x436   : > { %v760_v23 = vmul.f32 %v3409_v20, %v4157_v51 }
 0x437   : > { %v768_v21 = vpack.c.bf16 %v763_v19, %v762_v18 }
 0x438   : > { %v3411_v22 = vpop.eup %3410 }
 0x439   : > { %v761_v24 = vmul.f32 %v3411_v22, %v4162_v55  ;;  %3033 = vmatmul.mubr.msk.bf16.vlgmr.msra.gmra.mrb[12].mxu0 %vm677_vm3, %v768_v21  ;;  %v1166_v22 = vld [vmem:[#allocation11 + $0x58] sm:$0xff] }
 0x43a   : > { %3044 = vmatprep.mubr.msk.bf16.mxu0 %vm3773_vm1, %v3772_v14 }
 0x43b   : > { %v767_v25 = vpack.c.bf16 %v761_v24, %v760_v23 }
 0x43d   : > { %3027 = vmatmul.mubr.msk.bf16.vlgmr.msra.gmra.mrb[16].mxu1 %vm677_vm3, %v767_v25 }
 0x43e   : > { %3037 = vmatpush3.bf16.msra.mxu1 %v912_v26  ;;  %3038 = vmatprep.mubr.msk.bf16.mxu1 %vm3773_vm1, %v3772_v14 }
 0x43f   : > { %3048 = vmatprep.subr.bf16.mxu1 %v3772_v14 }
 0x45b   : > { %v746_v27 = vpop.xlane.xlu1 %745 }
 0x45c   : > { %3412 = vrcp.f32 %v746_v27 }
 0x45f   : > { %v1012_v29 = vpop.permute.xlu1 %1011 }
 0x460   : > { %v1017_v45 = vsel %vm463_vm2, %v1012_v29, 0  ;;  %v1168_v29 = vld [vmem:[#allocation11 + $0x68] sm:$0xff] }
 0x462   : > { %v749_v28 = vpop.xlane.xlu0 %748 }
 0x463   : > { %3414 = vrcp.f32 %v749_v28  ;;  %v1063_v38 = vpop.permute.xlu1 %1062 }
 0x464   : > { %v1068_v42 = vsel %vm463_vm2, %v1063_v38, 0  ;;  %v1170_v38 = vld [vmem:[#allocation11 + $0x78] sm:$0xff] }
 0x466   : > { %v961_v30 = vpop.permute.xlu0 %960  ;;  %v3413_v37 = vpop.eup %3412 }
 0x467   : > { %v966_v31 = vsel %vm463_vm2, %v961_v30, 0  ;;  %v764_v40 = vmul.f32 %v3413_v37, %v4174_v62  ;;  %v1114_v47 = vpop.permute.xlu1 %1113  ;;  %v1163_v62 = vld [vmem:[#allocation11 + $0x40] sm:$0xff]  ;;  %v1169_v30 = vld [vmem:[#allocation11 + $0x70] sm:$0xff] }
 0x468   : > { %3043 = vmatpush3.bf16.xpose.msra.mxu0 %v966_v31  ;;  %v1119_v48 = vsel %vm463_vm2, %v1114_v47, 0 }
 0x469   : > { %3054 = vmatprep.subr.bf16.mxu0 %v3772_v14 }
 0x46a   : > { %v959_v36 = vpop.permute.xlu0 %958 }
 0x46b   : > { %v1112_v49 = vpop.permute.xlu1 %1111 }
 0x46d   : > { %v3415_v39 = vpop.eup %3414 }
 0x46e   : > { %v765_v41 = vmul.f32 %v3415_v39, %v4178_v0  ;;  %v1010_v43 = vpop.permute.xlu0 %1009  ;;  %v1164_v0 = vld [vmem:[#allocation11 + $0x48] sm:$0xff] }
 0x46f   : > { %3045 = vmatmul.mubr.msk.bf16.vlgmr.msra.gmra.mrb[16].mxu0 %vm463_vm2, %v959_v36 }
 0x470   : > { %3055 = vmatpush3.bf16.xpose.msra.mxu0 %v1068_v42  ;;  %v769_v44 = vpack.c.bf16 %v765_v41, %v764_v40  ;;  %3056 = vmatprep.mubr.msk.bf16.mxu0 %vm3773_vm1, %v3772_v14 }
 0x471   : > { %3066 = vmatprep.subr.bf16.mxu0 %v3772_v14 }
 0x472   : > { %3039 = vmatmul.mubr.msk.bf16.vlgmr.msra.gmra.mrb[20].mxu1 %vm677_vm3, %v769_v44  ;;  %v1061_v46 = vpop.permute.xlu0 %1060 }
 0x473   : > { %3049 = vmatpush3.bf16.xpose.msra.mxu1 %v1017_v45  ;;  %3050 = vmatprep.mubr.msk.bf16.mxu1 %vm3773_vm1, %v3772_v14 }
 0x474   : > { %3060 = vmatprep.subr.bf16.mxu1 %v3772_v14 }
 0x477   : > { %3057 = vmatmul.mubr.msk.bf16.vlgmr.msra.gmra.mrb[20].mxu0 %vm463_vm2, %v1061_v46 }
 0x478   : > { %3068 = vmatprep.mubr.msk.bf16.mxu0 %vm3773_vm1, %v3772_v14 }
 0x47a   : > { %3051 = vmatmul.mubr.msk.bf16.vlgmr.msra.gmra.mrb[24].mxu1 %vm463_vm2, %v1010_v43 }
 0x47b   : > { %3061 = vmatpush3.bf16.xpose.msra.mxu1 %v1119_v48  ;;  %3062 = vmatprep.mubr.msk.bf16.mxu1 %vm3773_vm1, %v3772_v14 }
 0x47c   : > { %3072 = vmatprep.subr.bf16.mxu1 %v3772_v14 }
 0x482   : > { %3063 = vmatmul.mubr.msk.bf16.vlgmr.msra.gmra.mrb[28].mxu1 %vm463_vm2, %v1112_v49 }
 0x483   : > { %3074 = vmatprep.mubr.msk.bf16.mxu1 %vm3773_vm1, %v3772_v14 }
 0x500   : > { %v4231_v50 = vpop.f32.mrb[8].mxu0 }
 0x501   : > { %v3022_v51 = vpop.f32.mrb[9].mxu0 }
 0x502   : > { %v4233_v52 = vpop.f32.mrb[10].mxu0 }
 0x503   : > { %v3023_v53 = vpop.f32.mrb[11].mxu0 }
 0x50c   : > { %v4235_v54 = vpop.f32.mrb[12].mxu0 }
 0x50d   : > { %v3034_v55 = vpop.f32.mrb[13].mxu0 }
 0x50e   : > { %v4237_v56 = vpop.f32.mrb[14].mxu0 }
 0x50f   : > { %v3035_v57 = vpop.f32.mrb[15].mxu0 }
 0x510   : > { %v4239_v58 = vpop.f32.mrb[16].mxu1 }
 0x511   : > { %v3028_v59 = vpop.f32.mrb[17].mxu1 }
 0x512   : > { %v4241_v60 = vpop.f32.mrb[18].mxu1 }
 0x513   : > { %v3029_v61 = vpop.f32.mrb[19].mxu1 }
 0x542   : > { %v1002_v63 = vpop.f32.mrb[16].mxu0 }
 0x543   : > { %v1171_v1 = vadd.f32 %v1163_v62, %v1002_v63  ;;  %v3046_v2 = vpop.f32.mrb[17].mxu0 }
 0x544   : > { %v1005_v3 = vpop.f32.mrb[18].mxu0 }
 0x545   : > { %v1172_v4 = vadd.f32 %v1164_v0, %v1005_v3  ;;  %v4243_v5 = vpop.f32.mrb[20].mxu1  ;;  %v3047_v6 = vpop.f32.mrb[19].mxu0  ;;  %v1179_v7 = vsel %vm677_vm3, %v1171_v1, -inf }
 0x546   : > { %v3040_v8 = vpop.f32.mrb[21].mxu1  ;;  %1180 = vmax.xlane.f32.xlu0 %v1179_v7 }
 0x547   : > { %v4246_v9 = vpop.f32.mrb[22].mxu1  ;;  %v1182_v10 = vsel %vm677_vm3, %v1172_v4, -inf }
 0x548   : > { %v3041_v11 = vpop.f32.mrb[23].mxu1  ;;  %1183 = vmax.xlane.f32.xlu1 %v1182_v10 }
 0x54a   : > { %v1104_v13 = vpop.f32.mrb[20].mxu0 }
 0x54b   : > { %v1175_v15 = vadd.f32 %v1167_v12, %v1104_v13  ;;  %v3058_v16 = vpop.f32.mrb[21].mxu0 }
 0x54c   : > { %v1107_v18 = vpop.f32.mrb[22].mxu0 }
 0x54d   : > { %v1053_v19 = vpop.f32.mrb[24].mxu1  ;;  %v3059_v20 = vpop.f32.mrb[23].mxu0  ;;  %v1191_v21 = vsel %vm677_vm3, %v1175_v15, -inf  ;;  %v1176_v31 = vadd.f32 %v1168_v29, %v1107_v18 }
 0x54e   : > { %v1173_v23 = vadd.f32 %v1165_v17, %v1053_v19  ;;  %v3052_v24 = vpop.f32.mrb[25].mxu1  ;;  %1192 = vmax.xlane.f32.xlu1 %v1191_v21 }
 0x54f   : > { %v1056_v25 = vpop.f32.mrb[26].mxu1  ;;  %v1194_v45 = vsel %vm677_vm3, %v1176_v31, -inf }
 0x550   : > { %v1174_v26 = vadd.f32 %v1166_v22, %v1056_v25  ;;  %v3053_v27 = vpop.f32.mrb[27].mxu1  ;;  %v1185_v28 = vsel %vm677_vm3, %v1173_v23, -inf }
 0x551   : > { %1186 = vmax.xlane.f32.xlu0 %v1185_v28 }
 0x552   : > { %v1188_v36 = vsel %vm677_vm3, %v1174_v26, -inf }
 0x555   : > { %1189 = vmax.xlane.f32.xlu0 %v1188_v36  ;;  %v1155_v37 = vpop.f32.mrb[28].mxu1 }
 0x556   : > { %v1177_v39 = vadd.f32 %v1169_v30, %v1155_v37  ;;  %v3064_v40 = vpop.f32.mrb[29].mxu1 }
 0x557   : > { %v1158_v41 = vpop.f32.mrb[30].mxu1 }
 0x558   : > { %v1178_v42 = vadd.f32 %v1170_v38, %v1158_v41  ;;  %v3065_v43 = vpop.f32.mrb[31].mxu1  ;;  %v1197_v44 = vsel %vm677_vm3, %v1177_v39, -inf }
 0x559   : > { %1198 = vmax.xlane.f32.xlu1 %v1197_v44  ;;  %1195 = vmax.xlane.f32.xlu0 %v1194_v45 }
 0x55a   : > { %v1200_v46 = vsel %vm677_vm3, %v1178_v42, -inf }
 0x55d   : > { %1201 = vmax.xlane.f32.xlu0 %v1200_v46 }
 0x56a   : > { %1271 = vrot.lane.b32.xlu1 %v4099_v34, %s3778_s11 }
 0x56e   : > { %1365 = vrot.lane.b32.xlu1 %v4101_v35, %s3778_s11 }
 0x572   : > { %1412 = vrot.lane.b32.xlu1 %v4097_v33, %s3778_s11 }
 0x573   : > { %1318 = vrot.lane.b32.xlu0 %v4095_v32, %s3778_s11 }
 0x5d3   : > { %v1181_v47 = vpop.xlane.xlu0 %1180 }
 0x5d4   : > { %v1203_v48 = vsub.f32 %v1171_v1, %v1181_v47 }
 0x5d5   : > { %v1184_v49 = vpop.xlane.xlu1 %1183 }
 0x5d6   : > { %v1211_v51 = vmul.f32 1.442695, %v1203_v48  ;;  %v1204_v53 = vsub.f32 %v1172_v4, %v1184_v49 }
 0x5d8   : > { %3416 = vpow2.f32 %v1211_v51  ;;  %v1213_v55 = vmul.f32 1.442695, %v1204_v53 }
 0x5da   : > { %3418 = vpow2.f32 %v1213_v55 }
 0x5db   : > { %v1193_v57 = vpop.xlane.xlu1 %1192 }
 0x5dc   : > { %v1207_v59 = vsub.f32 %v1175_v15, %v1193_v57 }
 0x5de   : > { %v1187_v61 = vpop.xlane.xlu0 %1186  ;;  %v1219_v63 = vmul.f32 1.442695, %v1207_v59 }
 0x5df   : > { %v1205_v62 = vsub.f32 %v1173_v23, %v1187_v61 }
 0x5e1   : > { %v1215_v0 = vmul.f32 1.442695, %v1205_v62 }
 0x5e2   : > { %v4259_v2 = vpop.eup %3416  ;;  %v1190_v3 = vpop.xlane.xlu0 %1189 }
 0x5e3   : > { %3420 = vpow2.f32 %v1215_v0  ;;  %v1206_v6 = vsub.f32 %v1174_v26, %v1190_v3  ;;  %v1227_v1 = vsel %vm677_vm3, %v4259_v2, 0.0 }
 0x5e4   : > { %v4263_v7 = vpop.eup %3418  ;;  %1228 = vadd.xlane.f32.xlu1 %v1227_v1  ;;  %3422 = vpow2.f32 %v1219_v63 }
 0x5e5   : > { %v1217_v4 = vmul.f32 1.442695, %v1206_v6  ;;  %v1230_v8 = vsel %vm677_vm3, %v4263_v7, 0.0 }
 0x5e6   : > { %v1199_v10 = vpop.xlane.xlu1 %1198  ;;  %1231 = vadd.xlane.f32.xlu0 %v1230_v8  ;;  %v1196_v11 = vpop.xlane.xlu0 %1195 }
 0x5e7   : > { %3424 = vpow2.f32 %v1217_v4  ;;  %v1209_v12 = vsub.f32 %v1177_v39, %v1199_v10  ;;  %v1208_v13 = vsub.f32 %v1176_v31, %v1196_v11 }
 0x5e9   : > { %v1223_v15 = vmul.f32 1.442695, %v1209_v12  ;;  %v1221_v16 = vmul.f32 1.442695, %v1208_v13 }
 0x5ea   : > { %v1272_v17 = vpop.permute.xlu1 %1271  ;;  %v1202_v18 = vpop.xlane.xlu0 %1201 }
 0x5eb   : > { %3426 = vpow2.f32 %v1223_v15  ;;  %v1210_v19 = vsub.f32 %v1178_v42, %v1202_v18  ;;  %3067 = vmatpush3.bf16.msra.mxu0 %v1272_v17 }
 0x5ec   : > { %3428 = vpow2.f32 %v1221_v16  ;;  %3078 = vmatprep.subr.bf16.mxu0 %v3772_v14 }
 0x5ed   : > { %v3421_v20 = vpop.eup %3420  ;;  %v1225_v21 = vmul.f32 1.442695, %v1210_v19 }
 0x5ee   : > { %v1319_v22 = vpop.permute.xlu0 %1318  ;;  %v1233_v23 = vsel %vm677_vm3, %v3421_v20, 0.0  ;;  %v4269_v24 = vpop.eup %3422 }
 0x5ef   : > { %3430 = vpow2.f32 %v1225_v21  ;;  %1234 = vadd.xlane.f32.xlu1 %v1233_v23  ;;  %3073 = vmatpush3.bf16.msra.mxu1 %v1319_v22  ;;  %v1239_v26 = vsel %vm677_vm3, %v4269_v24, 0.0  ;;  %v1366_v38 = vpop.permute.xlu1 %1365 }
 0x5f0   : > { %3084 = vmatprep.subr.bf16.mxu1 %v3772_v14 }
 0x5f1   : > { %v3425_v25 = vpop.eup %3424 }
 0x5f2   : > { %v1236_v27 = vsel %vm677_vm3, %v3425_v25, 0.0 }
 0x5f3   : > { %1240 = vadd.xlane.f32.xlu1 %v1239_v26  ;;  %1237 = vadd.xlane.f32.xlu0 %v1236_v27  ;;  %v1413_v39 = vpop.permute.xlu1 %1412 }
 0x5f5   : > { %v4275_v28 = vpop.eup %3426 }
 0x5f6   : > { %v3429_v29 = vpop.eup %3428  ;;  %v1245_v30 = vsel %vm677_vm3, %v4275_v28, 0.0 }
 0x5f7   : > { %1246 = vadd.xlane.f32.xlu1 %v1245_v30  ;;  %v1242_v31 = vsel %vm677_vm3, %v3429_v29, 0.0 }
 0x5f8   : > { %1243 = vadd.xlane.f32.xlu0 %v1242_v31 }
 0x5f9   : > { %v3431_v36 = vpop.eup %3430 }
 0x5fa   : > { %v1248_v37 = vsel %vm677_vm3, %v3431_v36, 0.0 }
 0x5fc   : > { %1249 = vadd.xlane.f32.xlu0 %v1248_v37 }
 0x608   : > { %1512 = vrot.lane.b32.xlu1 %v4095_v32, %s3779_s13 }
 0x60c   : > { %1563 = vrot.lane.b32.xlu1 %v4101_v35, %s3779_s13 }
 0x610   : > { %1614 = vrot.lane.b32.xlu1 %v4097_v33, %s3779_s13 }
 0x612   : > { %1461 = vrot.lane.b32.xlu0 %v4099_v34, %s3779_s13  ;;  %s4560_s13 = scalar_lea.hbm %s4616_s6, %s2905_s15 }
 0x614   : > { %1612 = vrot.lane.b32.xlu1 %v4097_v33, %s3780_s19 }
 0x616   : > { %1459 = vrot.lane.b32.xlu0 %v4099_v34, %s3780_s19 }
 0x61a   : > { %1510 = vrot.lane.b32.xlu0 %v4095_v32, %s3780_s19 }
 0x61e   : > { %1561 = vrot.lane.b32.xlu0 %v4101_v35, %s3780_s19  ;;  %s3682_s19 = scalar_lea.vmem %s4563_s14, 1024 }
 0x61f   : > { %p3683_p7 = scmp.ne.s32.totalorder %s4563_s14, %s3682_s19 }
 0x621   : > { %p3684_p12 = pnand %p3683_p7, %p4635_p4 }
 0x623   : > { %p3685_p13 = pneg %p3684_p12 }
 0x671   : > { %v1229_v40 = vpop.xlane.xlu1 %1228 }
 0x672   : > { %3432 = vrcp.f32 %v1229_v40 }
 0x673   : > { %v1232_v41 = vpop.xlane.xlu0 %1231 }
 0x674   : > { %3434 = vrcp.f32 %v1232_v41 }
 0x67c   : > { %v3433_v42 = vpop.eup %3432  ;;  %v1235_v43 = vpop.xlane.xlu1 %1234 }
 0x67d   : > { %v1259_v45 = vmul.f32 %v3433_v42, %v4259_v2  ;;  %3436 = vrcp.f32 %v1235_v43 }
 0x67e   : > { %v3435_v44 = vpop.eup %3434 }
 0x67f   : > { %v1260_v46 = vmul.f32 %v3435_v44, %v4263_v7 }
 0x680   : > { %v1241_v47 = vpop.xlane.xlu1 %1240  ;;  %v1238_v48 = vpop.xlane.xlu0 %1237 }
 0x681   : > { %v1267_v49 = vpack.c.bf16 %v1260_v46, %v1259_v45  ;;  %3438 = vrcp.f32 %v1238_v48 }
 0x682   : > { %3440 = vrcp.f32 %v1241_v47  ;;  %v1664_v47 = vld [vmem:[#allocation11 + $0x80] sm:$0xff] }
 0x683   : > { %3069 = vmatmul.mubr.msk.bf16.vlgmr.msra.gmra.mrb[24].mxu0 %vm677_vm3, %v1267_v49 }
 0x684   : > { %3079 = vmatpush3.bf16.msra.mxu0 %v1366_v38  ;;  %3080 = vmatprep.mubr.msk.bf16.mxu0 %vm3773_vm1, %v3772_v14  ;;  %v1247_v51 = vpop.xlane.xlu1 %1246 }
 0x685   : > { %v1244_v53 = vpop.xlane.xlu0 %1243  ;;  %3090 = vmatprep.subr.bf16.mxu0 %v3772_v14 }
 0x686   : > { %3442 = vrcp.f32 %v1244_v53  ;;  %v1665_v53 = vld [vmem:[#allocation11 + $0x88] sm:$0xff] }
 0x687   : > { %3444 = vrcp.f32 %v1247_v51  ;;  %v3437_v57 = vpop.eup %3436 }
 0x688   : > { %v1261_v61 = vmul.f32 %v3437_v57, %v3421_v20  ;;  %v1513_v4 = vpop.permute.xlu1 %1512 }
 0x689   : > { %v1250_v55 = vpop.xlane.xlu0 %1249  ;;  %v1518_v18 = vsel %vm463_vm2, %v1513_v4, 0  ;;  %v1668_v4 = vld [vmem:[#allocation11 + $0xa0] sm:$0xff] }
 0x68a   : > { %3446 = vrcp.f32 %v1250_v55 }
 0x68b   : > { %v3439_v59 = vpop.eup %3438 }
 0x68c   : > { %v1262_v62 = vmul.f32 %v3439_v59, %v3425_v25  ;;  %v3441_v63 = vpop.eup %3440  ;;  %v1564_v17 = vpop.permute.xlu1 %1563 }
 0x68d   : > { %v1263_v3 = vmul.f32 %v3441_v63, %v4269_v24  ;;  %v1462_v7 = vpop.permute.xlu0 %1461  ;;  %v1569_v19 = vsel %vm463_vm2, %v1564_v17, 0  ;;  %v1669_v17 = vld [vmem:[#allocation11 + $0xa8] sm:$0xff] }
 0x68e   : > { %v1268_v0 = vpack.c.bf16 %v1262_v62, %v1261_v61  ;;  %v1467_v13 = vsel %vm463_vm2, %v1462_v7, 0 }
 0x690   : > { %v3443_v2 = vpop.eup %3442  ;;  %3075 = vmatmul.mubr.msk.bf16.vlgmr.msra.gmra.mrb[32].mxu1 %vm677_vm3, %v1268_v0  ;;  %v1615_v21 = vpop.permute.xlu1 %1614  ;;  %v1666_v0 = vld [vmem:[#allocation11 + $0x90] sm:$0xff] }
 0x691   : > { %v1264_v6 = vmul.f32 %v3443_v2, %v3429_v29  ;;  %v3445_v1 = vpop.eup %3444  ;;  %3085 = vmatpush3.bf16.msra.mxu1 %v1413_v39  ;;  %3086 = vmatprep.mubr.msk.bf16.mxu1 %vm3773_vm1, %v3772_v14  ;;  %v1460_v16 = vpop.permute.xlu0 %1459  ;;  %v1620_v22 = vsel %vm463_vm2, %v1615_v21, 0 }
 0x692   : > { %3096 = vmatprep.subr.bf16.mxu1 %v3772_v14  ;;  %v1265_v11 = vmul.f32 %v3445_v1, %v4275_v28 }
 0x693   : > { %v1269_v8 = vpack.c.bf16 %v1264_v6, %v1263_v3  ;;  %v1667_v6 = vld [vmem:[#allocation11 + $0x98] sm:$0xff] }
 0x694   : > { %v3447_v10 = vpop.eup %3446  ;;  %v1613_v24 = vpop.permute.xlu1 %1612 }
 0x695   : > { %v1266_v12 = vmul.f32 %v3447_v10, %v3431_v36  ;;  %3081 = vmatmul.mubr.msk.bf16.vlgmr.msra.gmra.mrb[28].mxu0 %vm677_vm3, %v1269_v8  ;;  %v1511_v20 = vpop.permute.xlu0 %1510 }
 0x696   : > { %3091 = vmatpush3.bf16.xpose.msra.mxu0 %v1467_v13  ;;  %3092 = vmatprep.mubr.msk.bf16.mxu0 %vm3773_vm1, %v3772_v14 }
 0x697   : > { %v1270_v15 = vpack.c.bf16 %v1266_v12, %v1265_v11  ;;  %3102 = vmatprep.subr.bf16.mxu0 %v3772_v14 }
 0x699   : > { %3087 = vmatmul.mubr.msk.bf16.vlgmr.msra.gmra.mrb[36].mxu1 %vm677_vm3, %v1270_v15  ;;  %v1562_v23 = vpop.permute.xlu0 %1561 }
 0x69a   : > { %3098 = vmatprep.mubr.msk.bf16.mxu1 %vm3773_vm1, %v3772_v14  ;;  %3097 = vmatpush3.bf16.xpose.msra.mxu1 %v1518_v18 }
 0x69b   : > { %3108 = vmatprep.subr.bf16.mxu1 %v3772_v14 }
 0x69d   : > { %3093 = vmatmul.mubr.msk.bf16.vlgmr.msra.gmra.mrb[32].mxu0 %vm463_vm2, %v1460_v16 }
 0x69e   : > { %3103 = vmatpush3.bf16.xpose.msra.mxu0 %v1569_v19  ;;  %3104 = vmatprep.mubr.msk.bf16.mxu0 %vm3773_vm1, %v3772_v14 }
 0x69f   : > { %3114 = vmatprep.subr.bf16.mxu0 %v3772_v14 }
 0x6a1   : > { %3099 = vmatmul.mubr.msk.bf16.vlgmr.msra.gmra.mrb[40].mxu1 %vm463_vm2, %v1511_v20  ;;  %v1670_v20 = vld [vmem:[#allocation11 + $0xb0] sm:$0xff] }
 0x6a2   : > { %3109 = vmatpush3.bf16.xpose.msra.mxu1 %v1620_v22  ;;  %3110 = vmatprep.mubr.msk.bf16.mxu1 %vm3773_vm1, %v3772_v14 }
 0x6a3   : > { %3120 = vmatprep.subr.bf16.mxu1 %v3772_v14 }
 0x6a5   : > { %3105 = vmatmul.mubr.msk.bf16.vlgmr.msra.gmra.mrb[36].mxu0 %vm463_vm2, %v1562_v23 }
 0x6a6   : > { %3116 = vmatprep.mubr.msk.bf16.mxu0 %vm3773_vm1, %v3772_v14 }
 0x6a9   : > { %3111 = vmatmul.mubr.msk.bf16.vlgmr.msra.gmra.mrb[44].mxu1 %vm463_vm2, %v1613_v24 }
 0x6aa   : > { %3122 = vmatprep.mubr.msk.bf16.mxu1 %vm3773_vm1, %v3772_v14 }
 0x756   : > { %v4327_v25 = vpop.f32.mrb[24].mxu0 }
 0x757   : > { %v3070_v26 = vpop.f32.mrb[25].mxu0 }
 0x758   : > { %v4329_v27 = vpop.f32.mrb[26].mxu0  ;;  %v1671_v26 = vld [vmem:[#allocation11 + $0xb8] sm:$0xff] }
 0x759   : > { %v3320_v28 = vpack.i.bf16 %v4329_v27, %v4327_v25  ;;  %v3071_v29 = vpop.f32.mrb[27].mxu0 }
 0x763   : > { %v4333_v30 = vpop.f32.mrb[32].mxu1 }
 0x764   : > { %v3076_v31 = vpop.f32.mrb[33].mxu1 }
 0x765   : > { %v4335_v36 = vpop.f32.mrb[34].mxu1 }
 0x766   : > { %v3325_v37 = vpack.i.bf16 %v4335_v36, %v4333_v30  ;;  %v3077_v38 = vpop.f32.mrb[35].mxu1 }
 0x768   : > { %v4339_v39 = vpop.f32.mrb[28].mxu0 }
 0x769   : > { %v3082_v40 = vpop.f32.mrb[29].mxu0 }
 0x76a   : > { %v4341_v41 = vpop.f32.mrb[30].mxu0 }
 0x76b   : > { %v3340_v42 = vpack.i.bf16 %v4341_v41, %v4339_v39  ;;  %v3083_v43 = vpop.f32.mrb[31].mxu0 }
 0x76c   : > { %v4345_v44 = vpop.f32.mrb[36].mxu1 }
 0x76d   : > { %v3088_v45 = vpop.f32.mrb[37].mxu1 }
 0x76e   : > { %v4347_v46 = vpop.f32.mrb[38].mxu1 }
 0x76f   : > { %v3345_v48 = vpack.i.bf16 %v4347_v46, %v4345_v44  ;;  %v3089_v49 = vpop.f32.mrb[39].mxu1 }
 0x770   : > { %v1503_v51 = vpop.f32.mrb[32].mxu0 }
 0x771   : > { %v1672_v55 = vadd.f32 %v1664_v47, %v1503_v51  ;;  %v3094_v57 = vpop.f32.mrb[33].mxu0 }
 0x772   : > { %v1506_v59 = vpop.f32.mrb[34].mxu0 }
 0x773   : > { %v1673_v61 = vadd.f32 %v1665_v53, %v1506_v59  ;;  %v3095_v62 = vpop.f32.mrb[35].mxu0  ;;  %v1680_v63 = vsel %vm677_vm3, %v1672_v55, -inf }
 0x774   : > { %1681 = vmax.xlane.f32.xlu0 %v1680_v63  ;;  %v1554_v2 = vpop.f32.mrb[40].mxu1 }
 0x775   : > { %v1683_v3 = vsel %vm677_vm3, %v1673_v61, -inf  ;;  %v1674_v1 = vadd.f32 %v1666_v0, %v1554_v2  ;;  %v3100_v7 = vpop.f32.mrb[41].mxu1 }
 0x776   : > { %1684 = vmax.xlane.f32.xlu1 %v1683_v3  ;;  %v1557_v8 = vpop.f32.mrb[42].mxu1 }
 0x777   : > { %v1675_v10 = vadd.f32 %v1667_v6, %v1557_v8  ;;  %v3101_v11 = vpop.f32.mrb[43].mxu1  ;;  %v1686_v12 = vsel %vm677_vm3, %v1674_v1, -inf }
 0x778   : > { %v1605_v13 = vpop.f32.mrb[36].mxu0  ;;  %1687 = vmax.xlane.f32.xlu0 %v1686_v12 }
 0x779   : > { %v1676_v15 = vadd.f32 %v1668_v4, %v1605_v13  ;;  %v3106_v16 = vpop.f32.mrb[37].mxu0  ;;  %v1689_v23 = vsel %vm677_vm3, %v1675_v10, -inf }
 0x77a   : > { %v1608_v18 = vpop.f32.mrb[38].mxu0 }
 0x77b   : > { %v3107_v19 = vpop.f32.mrb[39].mxu0  ;;  %v1692_v21 = vsel %vm677_vm3, %v1676_v15, -inf  ;;  %v1677_v22 = vadd.f32 %v1669_v17, %v1608_v18 }
 0x77c   : > { %1693 = vmax.xlane.f32.xlu1 %v1692_v21  ;;  %1690 = vmax.xlane.f32.xlu0 %v1689_v23  ;;  %v1656_v24 = vpop.f32.mrb[44].mxu1 }
 0x77d   : > { %v1678_v29 = vadd.f32 %v1670_v20, %v1656_v24  ;;  %v3112_v31 = vpop.f32.mrb[45].mxu1  ;;  %v1695_v47 = vsel %vm677_vm3, %v1677_v22, -inf }
 0x77e   : > { %v1659_v38 = vpop.f32.mrb[46].mxu1 }
 0x77f   : > { %v1679_v40 = vadd.f32 %v1671_v26, %v1659_v38  ;;  %v3113_v43 = vpop.f32.mrb[47].mxu1  ;;  %v1698_v45 = vsel %vm677_vm3, %v1678_v29, -inf }
 0x780   : > { %1699 = vmax.xlane.f32.xlu1 %v1698_v45  ;;  %1696 = vmax.xlane.f32.xlu0 %v1695_v47 }
 0x781   : > { %v1701_v49 = vsel %vm677_vm3, %v1679_v40, -inf }
 0x784   : > { %1702 = vmax.xlane.f32.xlu0 %v1701_v49 }
 0x791   : > { %1772 = vrot.lane.b32.xlu1 %v4099_v34, %s3781_s16 }
 0x795   : > { %1866 = vrot.lane.b32.xlu1 %v4101_v35, %s3781_s16 }
 0x799   : > { %1913 = vrot.lane.b32.xlu1 %v4097_v33, %s3781_s16 }
 0x79a   : > { %1819 = vrot.lane.b32.xlu0 %v4095_v32, %s3781_s16  ;;  %s3788_s16 = smov [#allocation13]  }
 0x801   : > { %v1682_v51 = vpop.xlane.xlu0 %1681 }
 0x802   : > { %v1704_v53 = vsub.f32 %v1672_v55, %v1682_v51 }
 0x803   : > { %v1685_v57 = vpop.xlane.xlu1 %1684 }
 0x804   : > { %v1712_v59 = vmul.f32 1.442695, %v1704_v53  ;;  %v1705_v62 = vsub.f32 %v1673_v61, %v1685_v57 }
 0x805   : > { %v1688_v0 = vpop.xlane.xlu0 %1687 }
 0x806   : > { %3448 = vpow2.f32 %v1712_v59  ;;  %v1714_v63 = vmul.f32 1.442695, %v1705_v62  ;;  %v1706_v2 = vsub.f32 %v1674_v1, %v1688_v0 }
 0x808   : > { %3450 = vpow2.f32 %v1714_v63  ;;  %v1716_v3 = vmul.f32 1.442695, %v1706_v2 }
 0x809   : > { %v1694_v6 = vpop.xlane.xlu1 %1693  ;;  %v1691_v4 = vpop.xlane.xlu0 %1690 }
 0x80a   : > { %v1708_v7 = vsub.f32 %v1676_v15, %v1694_v6  ;;  %3452 = vpow2.f32 %v1716_v3  ;;  %v1707_v8 = vsub.f32 %v1675_v10, %v1691_v4 }
 0x80c   : > { %v1720_v11 = vmul.f32 1.442695, %v1708_v7  ;;  %v1718_v12 = vmul.f32 1.442695, %v1707_v8 }
 0x80d   : > { %v1700_v13 = vpop.xlane.xlu1 %1699  ;;  %v1697_v16 = vpop.xlane.xlu0 %1696 }
 0x80e   : > { %3454 = vpow2.f32 %v1720_v11  ;;  %v1710_v55 = vsub.f32 %v1678_v29, %v1700_v13  ;;  %v1709_v17 = vsub.f32 %v1677_v22, %v1697_v16 }
 0x80f   : > { %3456 = vpow2.f32 %v1718_v12 }
 0x810   : > { %v3449_v61 = vpop.eup %3448  ;;  %v1724_v18 = vmul.f32 1.442695, %v1710_v55  ;;  %v1722_v19 = vmul.f32 1.442695, %v1709_v17 }
 0x811   : > { %v1728_v1 = vsel %vm677_vm3, %v3449_v61, 0.0  ;;  %v1773_v21 = vpop.permute.xlu1 %1772  ;;  %v1703_v23 = vpop.xlane.xlu0 %1702 }
 0x812   : > { %v3451_v20 = vpop.eup %3450  ;;  %1729 = vadd.xlane.f32.xlu1 %v1728_v1  ;;  %3458 = vpow2.f32 %v1724_v18  ;;  %v1711_v15 = vsub.f32 %v1679_v40, %v1703_v23  ;;  %3115 = vmatpush3.bf16.msra.mxu0 %v1773_v21 }
 0x813   : > { %v1731_v10 = vsel %vm677_vm3, %v3451_v20, 0.0  ;;  %3460 = vpow2.f32 %v1722_v19  ;;  %3126 = vmatprep.subr.bf16.mxu0 %v3772_v14 }
 0x814   : > { %1732 = vadd.xlane.f32.xlu0 %v1731_v10  ;;  %v3453_v24 = vpop.eup %3452  ;;  %v1726_v22 = vmul.f32 1.442695, %v1711_v15 }
 0x815   : > { %v1820_v26 = vpop.permute.xlu0 %1819  ;;  %v1734_v29 = vsel %vm677_vm3, %v3453_v24, 0.0  ;;  %v1867_v59 = vpop.permute.xlu1 %1866 }
 0x816   : > { %3462 = vpow2.f32 %v1726_v22  ;;  %1735 = vadd.xlane.f32.xlu1 %v1734_v29  ;;  %3121 = vmatpush3.bf16.msra.mxu1 %v1820_v26 }
 0x817   : > { %3132 = vmatprep.subr.bf16.mxu1 %v3772_v14 }
 0x818   : > { %v3455_v31 = vpop.eup %3454 }
 0x819   : > { %v3457_v38 = vpop.eup %3456  ;;  %v1740_v40 = vsel %vm677_vm3, %v3455_v31, 0.0  ;;  %v1914_v62 = vpop.permute.xlu1 %1913 }
 0x81a   : > { %v1737_v43 = vsel %vm677_vm3, %v3457_v38, 0.0  ;;  %1741 = vadd.xlane.f32.xlu1 %v1740_v40 }
 0x81b   : > { %1738 = vadd.xlane.f32.xlu0 %v1737_v43 }
 0x81c   : > { %v4370_v45 = vpop.eup %3458 }
 0x81d   : > { %v3461_v47 = vpop.eup %3460  ;;  %v1746_v49 = vsel %vm677_vm3, %v4370_v45, 0.0 }
 0x81e   : > { %1747 = vadd.xlane.f32.xlu1 %v1746_v49  ;;  %v1743_v51 = vsel %vm677_vm3, %v3461_v47, 0.0 }
 0x81f   : > { %1744 = vadd.xlane.f32.xlu0 %v1743_v51 }
 0x820   : > { %v3463_v53 = vpop.eup %3462 }
 0x821   : > { %v1749_v57 = vsel %vm677_vm3, %v3463_v53, 0.0 }
 0x823   : > { %1750 = vadd.xlane.f32.xlu0 %v1749_v57 }
 0x82f   : > { %2013 = vrot.lane.b32.xlu1 %v4095_v32, %s3782_s25 }
 0x833   : > { %2064 = vrot.lane.b32.xlu1 %v4101_v35, %s3782_s25 }
 0x837   : > { %2115 = vrot.lane.b32.xlu1 %v4097_v33, %s3782_s25 }
 0x839   : > { %1962 = vrot.lane.b32.xlu0 %v4099_v34, %s3782_s25  ;;  %s3686_s25 = sshll.u32 %s3788_s16, 4  ;;  %s3687_s25 = int_to_ptr.vmem [resolvable:$false] %s3686_s25 }
 0x83a   : > { %p3689_p1 = scmp.lt.s32.totalorder %s4563_s14, %s3687_s25 }
 0x83b   : > { %2113 = vrot.lane.b32.xlu1 %v4097_v33, %s3783_s29 }
 0x83d   : > { %1960 = vrot.lane.b32.xlu0 %v4099_v34, %s3783_s29 }
 0x841   : > { %2011 = vrot.lane.b32.xlu0 %v4095_v32, %s3783_s29 }
 0x845   : > { %2062 = vrot.lane.b32.xlu0 %v4101_v35, %s3783_s29  ;;  %s3688_s29 = scalar_lea.vmem %s3687_s25, 2048 }
 0x846   : > { %p3690_p3 = scmp.lt.s32.totalorder %s3688_s29, %s3682_s19 }
 0x848   : > { %p3691_p2 = por %p3690_p3, %p3689_p1 }
 0x84a   : > { %p3692_p8 = pnand %p3691_p2, %p3685_p13 }
 0x89f   : > { %v1730_v63 = vpop.xlane.xlu1 %1729 }
 0x8a0   : > { %3464 = vrcp.f32 %v1730_v63 }
 0x8a1   : > { %v1733_v0 = vpop.xlane.xlu0 %1732 }
 0x8a2   : > { %3466 = vrcp.f32 %v1733_v0 }
 0x8a3   : > { %v1736_v2 = vpop.xlane.xlu1 %1735 }
 0x8a4   : > { %3468 = vrcp.f32 %v1736_v2 }
 0x8a7   : > { %v1742_v3 = vpop.xlane.xlu1 %1741 }
 0x8a8   : > { %v1739_v6 = vpop.xlane.xlu0 %1738 }
 0x8a9   : > { %3470 = vrcp.f32 %v1739_v6 }
 0x8aa   : > { %v3465_v7 = vpop.eup %3464  ;;  %3472 = vrcp.f32 %v1742_v3 }
 0x8ab   : > { %v1760_v8 = vmul.f32 %v3465_v7, %v3449_v61  ;;  %v1748_v12 = vpop.xlane.xlu1 %1747 }
 0x8ac   : > { %v3467_v4 = vpop.eup %3466  ;;  %v1745_v13 = vpop.xlane.xlu0 %1744 }
 0x8ad   : > { %v1761_v11 = vmul.f32 %v3467_v4, %v3451_v20  ;;  %3474 = vrcp.f32 %v1745_v13 }
 0x8ae   : > { %3476 = vrcp.f32 %v1748_v12  ;;  %v3469_v17 = vpop.eup %3468 }
 0x8af   : > { %v1768_v16 = vpack.c.bf16 %v1761_v11, %v1760_v8  ;;  %v1762_v19 = vmul.f32 %v3469_v17, %v3453_v24  ;;  %v2014_v26 = vpop.permute.xlu1 %2013 }
 0x8b0   : > { %v1751_v55 = vpop.xlane.xlu0 %1750  ;;  %v2019_v51 = vsel %vm463_vm2, %v2014_v26, 0 }
 0x8b1   : > { %3117 = vmatmul.mubr.msk.bf16.vlgmr.msra.gmra.mrb[40].mxu0 %vm677_vm3, %v1768_v16  ;;  %3478 = vrcp.f32 %v1751_v55 }
 0x8b2   : > { %3127 = vmatpush3.bf16.msra.mxu0 %v1867_v59  ;;  %3128 = vmatprep.mubr.msk.bf16.mxu0 %vm3773_vm1, %v3772_v14 }
 0x8b3   : > { %3138 = vmatprep.subr.bf16.mxu0 %v3772_v14  ;;  %v3471_v18 = vpop.eup %3470  ;;  %v2065_v49 = vpop.permute.xlu1 %2064 }
 0x8b4   : > { %v1763_v61 = vmul.f32 %v3471_v18, %v3457_v38  ;;  %v3473_v1 = vpop.eup %3472  ;;  %v1963_v22 = vpop.permute.xlu0 %1962 }
 0x8b5   : > { %v1764_v23 = vmul.f32 %v3473_v1, %v3455_v31  ;;  %v1968_v43 = vsel %vm463_vm2, %v1963_v22, 0  ;;  %v2166_v22 = vld [vmem:[#allocation11 + $0xc8] sm:$0xff] }
 0x8b6   : > { %v1769_v20 = vpack.c.bf16 %v1763_v61, %v1762_v19 }
 0x8b7   : > { %v3475_v21 = vpop.eup %3474  ;;  %v2116_v57 = vpop.permute.xlu1 %2115 }
 0x8b8   : > { %v1765_v15 = vmul.f32 %v3475_v21, %v3461_v47  ;;  %3123 = vmatmul.mubr.msk.bf16.vlgmr.msra.gmra.mrb[48].mxu1 %vm677_vm3, %v1769_v20  ;;  %v3477_v10 = vpop.eup %3476  ;;  %v1961_v47 = vpop.permute.xlu0 %1960  ;;  %v2121_v59 = vsel %vm463_vm2, %v2116_v57, 0  ;;  %v2165_v21 = vld [vmem:[#allocation11 + $0xc0] sm:$0xff] }
 0x8b9   : > { %3133 = vmatpush3.bf16.msra.mxu1 %v1914_v62  ;;  %3134 = vmatprep.mubr.msk.bf16.mxu1 %vm3773_vm1, %v3772_v14  ;;  %v1766_v24 = vmul.f32 %v3477_v10, %v4370_v45  ;;  %v2070_v45 = vsel %vm463_vm2, %v2065_v49, 0  ;;  %v2169_v57 = vld [vmem:[#allocation11 + $0xe0] sm:$0xff] }
 0x8ba   : > { %v1770_v29 = vpack.c.bf16 %v1765_v15, %v1764_v23  ;;  %3144 = vmatprep.subr.bf16.mxu1 %v3772_v14 }
 0x8bb   : > { %v3479_v40 = vpop.eup %3478  ;;  %v2114_v63 = vpop.permute.xlu1 %2113 }
 0x8bc   : > { %v1767_v38 = vmul.f32 %v3479_v40, %v3463_v53  ;;  %3129 = vmatmul.mubr.msk.bf16.vlgmr.msra.gmra.mrb[44].mxu0 %vm677_vm3, %v1770_v29  ;;  %v2012_v53 = vpop.permute.xlu0 %2011 }
 0x8bd   : > { %3139 = vmatpush3.bf16.xpose.msra.mxu0 %v1968_v43  ;;  %3140 = vmatprep.mubr.msk.bf16.mxu0 %vm3773_vm1, %v3772_v14 }
 0x8be   : > { %v1771_v31 = vpack.c.bf16 %v1767_v38, %v1766_v24  ;;  %3150 = vmatprep.subr.bf16.mxu0 %v3772_v14 }
 0x8c0   : > { %3135 = vmatmul.mubr.msk.bf16.vlgmr.msra.gmra.mrb[52].mxu1 %vm677_vm3, %v1771_v31  ;;  %v2063_v62 = vpop.permute.xlu0 %2062  ;;  %v2167_v31 = vld [vmem:[#allocation11 + $0xd0] sm:$0xff] }
 0x8c1   : > { %3146 = vmatprep.mubr.msk.bf16.mxu1 %vm3773_vm1, %v3772_v14 }
 0x8c2   : > { %3145 = vmatpush3.bf16.xpose.msra.mxu1 %v2019_v51  ;;  %v2168_v51 = vld [vmem:[#allocation11 + $0xd8] sm:$0xff] }
 0x8c3   : > { %3156 = vmatprep.subr.bf16.mxu1 %v3772_v14 }
 0x8c4   : > { %3141 = vmatmul.mubr.msk.bf16.vlgmr.msra.gmra.mrb[48].mxu0 %vm463_vm2, %v1961_v47 }
 0x8c5   : > { %3151 = vmatpush3.bf16.xpose.msra.mxu0 %v2070_v45  ;;  %3152 = vmatprep.mubr.msk.bf16.mxu0 %vm3773_vm1, %v3772_v14 }
 0x8c6   : > { %3162 = vmatprep.subr.bf16.mxu0 %v3772_v14 }
 0x8c9   : > { %3147 = vmatmul.mubr.msk.bf16.vlgmr.msra.gmra.mrb[56].mxu1 %vm463_vm2, %v2012_v53 }
 0x8ca   : > { %3157 = vmatpush3.bf16.xpose.msra.mxu1 %v2121_v59  ;;  %3158 = vmatprep.mubr.msk.bf16.mxu1 %vm3773_vm1, %v3772_v14 }
 0x8cb   : > { %3168 = vmatprep.subr.bf16.mxu1 %v3772_v14 }
 0x8cc   : > { %3153 = vmatmul.mubr.msk.bf16.vlgmr.msra.gmra.mrb[52].mxu0 %vm463_vm2, %v2063_v62 }
 0x8cd   : > { %3164 = vmatprep.mubr.msk.bf16.mxu0 %vm3773_vm1, %v3772_v14 }
 0x8d1   : > { %3159 = vmatmul.mubr.msk.bf16.vlgmr.msra.gmra.mrb[60].mxu1 %vm463_vm2, %v2114_v63 }
 0x8d2   : > { %3170 = vmatprep.mubr.msk.bf16.mxu1 %vm3773_vm1, %v3772_v14 }
 0x984   : > { %v4419_v0 = vpop.f32.mrb[40].mxu0 }
 0x985   : > { %v3118_v2 = vpop.f32.mrb[41].mxu0 }
 0x986   : > { %v4421_v3 = vpop.f32.mrb[42].mxu0 }
 0x987   : > { %v3330_v6 = vpack.i.bf16 %v4421_v3, %v4419_v0  ;;  %v3119_v7 = vpop.f32.mrb[43].mxu0 }
 0x98b   : > { %v4425_v4 = vpop.f32.mrb[48].mxu1 }
 0x98c   : > { %v3124_v8 = vpop.f32.mrb[49].mxu1 }
 0x98d   : > { %v4427_v11 = vpop.f32.mrb[50].mxu1 }
 0x98e   : > { %v3335_v12 = vpack.i.bf16 %v4427_v11, %v4425_v4  ;;  %v3125_v13 = vpop.f32.mrb[51].mxu1 }
 0x98f   : > { %v4431_v16 = vpop.f32.mrb[44].mxu0 }
 0x990   : > { %v3130_v55 = vpop.f32.mrb[45].mxu0 }
 0x991   : > { %v4433_v17 = vpop.f32.mrb[46].mxu0  ;;  %v2170_v55 = vld [vmem:[#allocation11 + $0xe8] sm:$0xff] }
 0x992   : > { %v3355_v18 = vpack.i.bf16 %v4433_v17, %v4431_v16  ;;  %v3131_v19 = vpop.f32.mrb[47].mxu0 }
 0x993   : > { %v4437_v61 = vpop.f32.mrb[52].mxu1 }
 0x994   : > { %v3136_v1 = vpop.f32.mrb[53].mxu1 }
 0x995   : > { %v4439_v20 = vpop.f32.mrb[54].mxu1 }
 0x996   : > { %v3365_v23 = vpack.i.bf16 %v4439_v20, %v4437_v61  ;;  %v3137_v15 = vpop.f32.mrb[55].mxu1 }
 0x997   : > { %v2004_v10 = vpop.f32.mrb[48].mxu0 }
 0x998   : > { %v2173_v26 = vadd.f32 %v2165_v21, %v2004_v10  ;;  %v3142_v29 = vpop.f32.mrb[49].mxu0  ;;  %v2171_v21 = vld [vmem:[#allocation11 + $0xf0] sm:$0xff] }
 0x999   : > { %v2007_v40 = vpop.f32.mrb[50].mxu0 }
 0x99a   : > { %v2174_v24 = vadd.f32 %v2166_v22, %v2007_v40  ;;  %v3143_v38 = vpop.f32.mrb[51].mxu0  ;;  %v2181_v43 = vsel %vm677_vm3, %v2173_v26, -inf  ;;  %v2172_v40 = vld [vmem:[#allocation11 + $0xf8] sm:$0xff] }
 0x99b   : > { %2182 = vmax.xlane.f32.xlu0 %v2181_v43 }
 0x99c   : > { %v2055_v47 = vpop.f32.mrb[56].mxu1  ;;  %v2184_v49 = vsel %vm677_vm3, %v2174_v24, -inf }
 0x99d   : > { %v2175_v45 = vadd.f32 %v2167_v31, %v2055_v47  ;;  %v3148_v53 = vpop.f32.mrb[57].mxu1  ;;  %2185 = vmax.xlane.f32.xlu1 %v2184_v49 }
 0x99e   : > { %v2058_v59 = vpop.f32.mrb[58].mxu1 }
 0x99f   : > { %v2176_v62 = vadd.f32 %v2168_v51, %v2058_v59  ;;  %v3149_v63 = vpop.f32.mrb[59].mxu1  ;;  %v2187_v2 = vsel %vm677_vm3, %v2175_v45, -inf  ;;  %v2106_v7 = vpop.f32.mrb[52].mxu0 }
 0x9a0   : > { %2188 = vmax.xlane.f32.xlu0 %v2187_v2  ;;  %v2177_v8 = vadd.f32 %v2169_v57, %v2106_v7  ;;  %v3154_v13 = vpop.f32.mrb[53].mxu0 }
 0x9a1   : > { %v2109_v19 = vpop.f32.mrb[54].mxu0  ;;  %v2190_v22 = vsel %vm677_vm3, %v2176_v62, -inf }
 0x9a2   : > { %v3155_v1 = vpop.f32.mrb[55].mxu0  ;;  %v2193_v15 = vsel %vm677_vm3, %v2177_v8, -inf  ;;  %v2178_v10 = vadd.f32 %v2170_v55, %v2109_v19 }
 0x9a3   : > { %2194 = vmax.xlane.f32.xlu1 %v2193_v15 }
 0x9a4   : > { %2191 = vmax.xlane.f32.xlu0 %v2190_v22  ;;  %v2157_v29 = vpop.f32.mrb[60].mxu1  ;;  %v2196_v53 = vsel %vm677_vm3, %v2178_v10, -inf }
 0x9a5   : > { %v2179_v38 = vadd.f32 %v2171_v21, %v2157_v29  ;;  %v3160_v43 = vpop.f32.mrb[61].mxu1 }
 0x9a6   : > { %v2160_v31 = vpop.f32.mrb[62].mxu1 }
 0x9a7   : > { %v2180_v47 = vadd.f32 %v2172_v40, %v2160_v31  ;;  %v3161_v49 = vpop.f32.mrb[63].mxu1  ;;  %v2199_v51 = vsel %vm677_vm3, %v2179_v38, -inf }
 0x9a8   : > { %2200 = vmax.xlane.f32.xlu1 %v2199_v51  ;;  %2197 = vmax.xlane.f32.xlu0 %v2196_v53 }
 0x9a9   : > { %v2202_v57 = vsel %vm677_vm3, %v2180_v47, -inf }
 0x9ac   : > { %2203 = vmax.xlane.f32.xlu0 %v2202_v57 }
 0x9b9   : > { %2273 = vrot.lane.b32.xlu1 %v4099_v34, %s3784_s10 }
 0xa28   : > { %v2183_v59 = vpop.xlane.xlu0 %2182 }
 0xa29   : > { %v2205_v63 = vsub.f32 %v2173_v26, %v2183_v59 }
 0xa2a   : > { %v2186_v2 = vpop.xlane.xlu1 %2185 }
 0xa2b   : > { %v2213_v7 = vmul.f32 1.442695, %v2205_v63  ;;  %v2206_v13 = vsub.f32 %v2174_v24, %v2186_v2 }
 0xa2d   : > { %3480 = vpow2.f32 %v2213_v7  ;;  %v2215_v55 = vmul.f32 1.442695, %v2206_v13  ;;  %v2189_v19 = vpop.xlane.xlu0 %2188 }
 0xa2e   : > { %v2207_v1 = vsub.f32 %v2175_v45, %v2189_v19 }
 0xa2f   : > { %3482 = vpow2.f32 %v2215_v55 }
 0xa30   : > { %v2217_v21 = vmul.f32 1.442695, %v2207_v1  ;;  %v2195_v15 = vpop.xlane.xlu1 %2194 }
 0xa31   : > { %v2209_v22 = vsub.f32 %v2177_v8, %v2195_v15  ;;  %v2192_v29 = vpop.xlane.xlu0 %2191 }
 0xa32   : > { %3484 = vpow2.f32 %v2217_v21  ;;  %v2208_v40 = vsub.f32 %v2176_v62, %v2192_v29 }
 0xa33   : > { %v2221_v43 = vmul.f32 1.442695, %v2209_v22 }
 0xa34   : > { %v2219_v31 = vmul.f32 1.442695, %v2208_v40 }
 0xa35   : > { %3486 = vpow2.f32 %v2221_v43  ;;  %v2201_v34 = vpop.xlane.xlu1 %2200  ;;  %v2198_v49 = vpop.xlane.xlu0 %2197 }
 0xa36   : > { %3488 = vpow2.f32 %v2219_v31  ;;  %v2211_v26 = vsub.f32 %v2179_v38, %v2201_v34  ;;  %v2210_v51 = vsub.f32 %v2178_v10, %v2198_v49 }
 0xa37   : > { %v3481_v24 = vpop.eup %3480 }
 0xa38   : > { %v2225_v53 = vmul.f32 1.442695, %v2211_v26  ;;  %v2223_v57 = vmul.f32 1.442695, %v2210_v51  ;;  %v2229_v45 = vsel %vm677_vm3, %v3481_v24, 0.0 }
 0xa39   : > { %v3483_v59 = vpop.eup %3482  ;;  %v2274_v63 = vpop.permute.xlu1 %2273  ;;  %2230 = vadd.xlane.f32.xlu1 %v2229_v45 }
 0xa3a   : > { %v2204_v2 = vpop.xlane.xlu0 %2203  ;;  %3490 = vpow2.f32 %v2225_v53  ;;  %3163 = vmatpush3.bf16.msra.mxu0 %v2274_v63  ;;  %v2232_v62 = vsel %vm677_vm3, %v3483_v59, 0.0  ;;  %v3383_v63 = vld [vmem:[#allocation8 + $0x8] sm:$0xff]  }
 0xa3b   : > { %v2212_v8 = vsub.f32 %v2180_v47, %v2204_v2  ;;  %3492 = vpow2.f32 %v2223_v57  ;;  %2233 = vadd.xlane.f32.xlu0 %v2232_v62  ;;  %3174 = vmatprep.subr.bf16.mxu0 %v3772_v14 }
 0xa3c   : > { %v3485_v38 = vpop.eup %3484 }
 0xa3d   : > { %v2227_v10 = vmul.f32 1.442695, %v2212_v8  ;;  %v2235_v7 = vsel %vm677_vm3, %v3485_v38, 0.0 }
 0xa3e   : > { %2236 = vadd.xlane.f32.xlu1 %v2235_v7 }
 0xa3f   : > { %3494 = vpow2.f32 %v2227_v10  ;;  %v3487_v13 = vpop.eup %3486 }
 0xa40   : > { %v3489_v55 = vpop.eup %3488  ;;  %v2241_v19 = vsel %vm677_vm3, %v3487_v13, 0.0 }
 0xa41   : > { %v2238_v1 = vsel %vm677_vm3, %v3489_v55, 0.0 }
 0xa42   : > { %2242 = vadd.xlane.f32.xlu1 %v2241_v19  ;;  %2239 = vadd.xlane.f32.xlu0 %v2238_v1 }
 0xa44   : > { %v4459_v47 = vpop.eup %3490 }
 0xa45   : > { %v3493_v21 = vpop.eup %3492  ;;  %v2247_v15 = vsel %vm677_vm3, %v4459_v47, 0.0 }
 0xa46   : > { %2248 = vadd.xlane.f32.xlu1 %v2247_v15  ;;  %v2244_v22 = vsel %vm677_vm3, %v3493_v21, 0.0 }
 0xa47   : > { %2245 = vadd.xlane.f32.xlu0 %v2244_v22 }
 0xa49   : > { %v3495_v29 = vpop.eup %3494 }
 0xa4a   : > { %v2250_v40 = vsel %vm677_vm3, %v3495_v29, 0.0 }
 0xa4b   : > { %2251 = vadd.xlane.f32.xlu0 %v2250_v40 }
 0xa57   : > { %2367 = vrot.lane.b32.xlu1 %v4101_v35, %s3784_s10 }
 0xa5b   : > { %2414 = vrot.lane.b32.xlu1 %v4097_v33, %s3784_s10 }
 0xa5f   : > { %3326 = vrot.lane.b32.xlu1 %v3325_v37, %s3785_s12 }
 0xa61   : > { %2320 = vrot.lane.b32.xlu0 %v4095_v32, %s3784_s10 }
 0xa63   : > { %3336 = vrot.lane.b32.xlu1 %v3335_v12, %s3786_s9 }
 0xa65   : > { %3321 = vrot.lane.b32.xlu0 %v3320_v28, %s3785_s12 }
 0xa67   : > { %3346 = vrot.lane.b32.xlu1 %v3345_v48, %s3785_s12 }
 0xa69   : > { %3331 = vrot.lane.b32.xlu0 %v3330_v6, %s3786_s9 }
 0xa6d   : > { %3341 = vrot.lane.b32.xlu0 %v3340_v42, %s3785_s12 }
 0xac6   : > { %v2231_v32 = vpop.xlane.xlu1 %2230 }
 0xac7   : > { %3496 = vrcp.f32 %v2231_v32 }
 0xac8   : > { %v2234_v33 = vpop.xlane.xlu0 %2233 }
 0xac9   : > { %3498 = vrcp.f32 %v2234_v33 }
 0xacb   : > { %v2237_v35 = vpop.xlane.xlu1 %2236 }
 0xacc   : > { %3500 = vrcp.f32 %v2237_v35 }
 0xacf   : > { %v2243_v25 = vpop.xlane.xlu1 %2242  ;;  %v2240_v27 = vpop.xlane.xlu0 %2239 }
 0xad0   : > { %3502 = vrcp.f32 %v2240_v27 }
 0xad1   : > { %v3497_v28 = vpop.eup %3496  ;;  %3504 = vrcp.f32 %v2243_v25 }
 0xad2   : > { %v2261_v37 = vmul.f32 %v3497_v28, %v3481_v24 }
 0xad3   : > { %v3499_v30 = vpop.eup %3498  ;;  %v2249_v36 = vpop.xlane.xlu1 %2248 }
 0xad4   : > { %v2262_v44 = vmul.f32 %v3499_v30, %v3483_v59  ;;  %v2246_v46 = vpop.xlane.xlu0 %2245  ;;  %v3382_v59 = vld [vmem:[#allocation8] sm:$0xff]  }
 0xad5   : > { %3506 = vrcp.f32 %v2246_v46 }
 0xad6   : > { %v2269_v48 = vpack.c.bf16 %v2262_v44, %v2261_v37  ;;  %3508 = vrcp.f32 %v2249_v36  ;;  %v3501_v42 = vpop.eup %3500 }
 0xad7   : > { %v2368_v39 = vpop.permute.xlu1 %2367  ;;  %v2263_v3 = vmul.f32 %v3501_v42, %v3485_v38 }
 0xad8   : > { %v2252_v41 = vpop.xlane.xlu0 %2251  ;;  %3165 = vmatmul.mubr.msk.bf16.vlgmr.msra.gmra.mrb[56].mxu0 %vm677_vm3, %v2269_v48 }
 0xad9   : > { %3510 = vrcp.f32 %v2252_v41  ;;  %3175 = vmatpush3.bf16.msra.mxu0 %v2368_v39  ;;  %3176 = vmatprep.mubr.msk.bf16.mxu0 %vm3773_vm1, %v3772_v14 }
 0xada   : > { %v3503_v0 = vpop.eup %3502  ;;  %3186 = vmatprep.subr.bf16.mxu0 %v3382_v59 }
 0xadb   : > { %v2264_v6 = vmul.f32 %v3503_v0, %v3489_v55  ;;  %v3505_v11 = vpop.eup %3504  ;;  %v2415_v49 = vpop.permute.xlu1 %2414 }
 0xadc   : > { %v2321_v4 = vpop.permute.xlu0 %2320  ;;  %v2265_v31 = vmul.f32 %v3505_v11, %v3487_v13 }
 0xadd   : > { %3169 = vmatpush3.bf16.msra.mxu1 %v2321_v4  ;;  %v2270_v12 = vpack.c.bf16 %v2264_v6, %v2263_v3 }
 0xade   : > { %3180 = vmatprep.subr.bf16.mxu1 %v3772_v14 }
 0xadf   : > { %v3507_v43 = vpop.eup %3506  ;;  %v3327_v35 = vpop.permute.xlu1 %3326 }
 0xae0   : > { %v2266_v34 = vmul.f32 %v3507_v43, %v3493_v21  ;;  %3171 = vmatmul.mubr.msk.bf16.vlgmr.msra.gmra.mrb[64].mxu1 %vm677_vm3, %v2270_v12  ;;  %v3509_v26 = vpop.eup %3508  ;;  %v3329_v0 = vunpack.i.h.bf16 %v3327_v35  ;;  %v3328_v3 = vunpack.i.l.bf16 %v3327_v35 }
 0xae1   : > { %3181 = vmatpush3.bf16.msra.mxu1 %v2415_v49  ;;  %3182 = vmatprep.mubr.msk.bf16.mxu1 %vm3773_vm1, %v3772_v14  ;;  %v2267_v53 = vmul.f32 %v3509_v26, %v4459_v47 }
 0xae2   : > { %v2271_v51 = vpack.c.bf16 %v2266_v34, %v2265_v31  ;;  %v2559_v43 = vsel %vm463_vm2, %v4239_v58, %v3328_v3 }
 0xae3   : > { %v3511_v24 = vpop.eup %3510  ;;  %v3337_v30 = vpop.permute.xlu1 %3336 }
 0xae4   : > { %v2268_v57 = vmul.f32 %v3511_v24, %v3495_v29  ;;  %3177 = vmatmul.mubr.msk.bf16.vlgmr.msra.gmra.mrb[60].mxu0 %vm677_vm3, %v2271_v51  ;;  %v3339_v11 = vunpack.i.h.bf16 %v3337_v30  ;;  %v3338_v12 = vunpack.i.l.bf16 %v3337_v30 }
 0xae5   : > { %3187 = vmatpush3.bf16.msra.mxu0 %v3382_v59 }
 0xae6   : > { %v2272_v45 = vpack.c.bf16 %v2268_v57, %v2267_v53  ;;  %3188 = vmatprep.subr.bf16.mxu0 %v3383_v63  ;;  %v2567_v24 = vsel %vm677_vm3, %v2559_v43, %v3338_v12 }
 0xae7   : > { %v3347_v6 = vpop.permute.xlu1 %3346 }
 0xae8   : > { %3183 = vmatmul.mubr.msk.bf16.vlgmr.msra.gmra.mrb[68].mxu1 %vm677_vm3, %v2272_v45 }
 0xae9   : > { %3189 = vmatpush3.bf16.msra.mxu0 %v3383_v63 }
 0xbab   : > { %v2313_v2 = vpop.f32.mrb[56].mxu0 }
 0xbac   : > { %v3166_v8 = vpop.f32.mrb[57].mxu0 }
 0xbad   : > { %v2316_v62 = vpop.f32.mrb[58].mxu0 }
 0xbae   : > { %v3350_v14 = vpack.i.bf16 %v2316_v62, %v2313_v2  ;;  %v3167_v38 = vpop.f32.mrb[59].mxu0  ;;  %v3349_v2 = vunpack.i.h.bf16 %v3347_v6 }
 0xbb0   : > { %3351 = vrot.lane.b32.xlu0 %v3350_v14, %s3787_s28 }
 0xbb3   : > { %v2360_v10 = vpop.f32.mrb[64].mxu1 }
 0xbb4   : > { %v3172_v7 = vpop.f32.mrb[65].mxu1  ;;  %3356 = vrot.lane.b32.xlu0 %v3355_v18, %s3786_s9  ;;  %v3322_v18 = vpop.permute.xlu0 %3321 }
 0xbb5   : > { %v2363_v13 = vpop.f32.mrb[66].mxu1  ;;  %v3324_v27 = vunpack.i.h.bf16 %v3322_v18  ;;  %v3323_v28 = vunpack.i.l.bf16 %v3322_v18 }
 0xbb6   : > { %v3360_v55 = vpack.i.bf16 %v2363_v13, %v2360_v10  ;;  %v3173_v19 = vpop.f32.mrb[67].mxu1 }
 0xbb7   : > { %v2407_v1 = vpop.f32.mrb[60].mxu0  ;;  %v2558_v61 = vsel %vm463_vm2, %v4233_v52, %v3324_v27  ;;  %v2557_v20 = vsel %vm463_vm2, %v4231_v50, %v3323_v28  ;;  %v2560_v50 = vsel %vm463_vm2, %v4241_v60, %v3329_v0  ;;  %v3348_v60 = vunpack.i.l.bf16 %v3347_v6 }
 0xbb8   : > { %v3178_v47 = vpop.f32.mrb[61].mxu0  ;;  %3361 = vrot.lane.b32.xlu1 %v3360_v55, %s3787_s28  ;;  %v3332_v33 = vpop.permute.xlu0 %3331  ;;  %v2568_v53 = vsel %vm677_vm3, %v2560_v50, %v3339_v11 }
 0xbb9   : > { %v2410_v21 = vpop.f32.mrb[62].mxu0  ;;  %v3334_v36 = vunpack.i.h.bf16 %v3332_v33  ;;  %v3333_v37 = vunpack.i.l.bf16 %v3332_v33 }
 0xbba   : > { %v3370_v15 = vpack.i.bf16 %v2410_v21, %v2407_v1  ;;  %v3179_v22 = vpop.f32.mrb[63].mxu0 }
 0xbbb   : > { %v2454_v29 = vpop.f32.mrb[68].mxu1  ;;  %v2565_v48 = vsel %vm677_vm3, %v2557_v20, %v3333_v37  ;;  %v2566_v39 = vsel %vm677_vm3, %v2558_v61, %v3334_v36 }
 0xbbc   : > { %3371 = vrot.lane.b32.xlu0 %v3370_v15, %s3787_s28  ;;  %3366 = vrot.lane.b32.xlu1 %v3365_v23, %s3786_s9  ;;  %v3184_v40 = vpop.f32.mrb[69].mxu1  ;;  %v3342_v25 = vpop.permute.xlu0 %3341 }
 0xbbd   : > { %v2457_v32 = vpop.f32.mrb[70].mxu1  ;;  %v3344_v34 = vunpack.i.h.bf16 %v3342_v25  ;;  %v3343_v49 = vunpack.i.l.bf16 %v3342_v25 }
 0xbbe   : > { %v3375_v16 = vpack.i.bf16 %v2457_v32, %v2454_v29  ;;  %v3185_v17 = vpop.f32.mrb[71].mxu1 }
 0xbbf   : > { %v2562_v14 = vsel %vm463_vm2, %v4237_v56, %v3344_v34  ;;  %v2561_v38 = vsel %vm463_vm2, %v4235_v54, %v3343_v49  ;;  %v2564_v56 = vsel %vm463_vm2, %v4246_v9, %v3349_v2  ;;  %v2563_v54 = vsel %vm463_vm2, %v4243_v5, %v3348_v60  ;;  %v2889_v9 = vld [vmem:[#allocation10] ss:$0 sm:$0xff] }
 0xbc0   : > { %3376 = vrot.lane.b32.xlu1 %v3375_v16, %s3787_s28 }
 0xc22   : > { %v3352_v44 = vpop.permute.xlu0 %3351 }
 0xc23   : > { %v3354_v23 = vunpack.i.h.bf16 %v3352_v44  ;;  %v3353_v46 = vunpack.i.l.bf16 %v3352_v44 }
 0xc25   : > { %v2574_v41 = vsel %vm2573_vm4, %v2565_v48, %v3353_v46  ;;  %v2575_v42 = vsel %vm2573_vm4, %v2566_v39, %v3354_v23 }
 0xc26   : > { %v2582_v4 = vpack.c.bf16 %v2575_v42, %v2574_v41  ;;  %v3357_v52 = vpop.permute.xlu0 %3356 }
 0xc27   : > { %v3359_v57 = vunpack.i.h.bf16 %v3357_v52  ;;  %v3358_v45 = vunpack.i.l.bf16 %v3357_v52 }
 0xc28   : > { %3190 = vmatprep.mubr.msk.bf16.mxu0 %vm378_vm0, %v2582_v4 }
 0xc29   : > { %v2569_v13 = vsel %vm677_vm3, %v2561_v38, %v3358_v45  ;;  %v2570_v55 = vsel %vm677_vm3, %v2562_v14, %v3359_v57 }
 0xc2a   : > { %v3362_v31 = vpop.permute.xlu1 %3361 }
 0xc2b   : > { %v3364_v26 = vunpack.i.h.bf16 %v3362_v31  ;;  %v3363_v51 = vunpack.i.l.bf16 %v3362_v31 }
 0xc2d   : > { %v2577_v59 = vsel %vm2573_vm4, %v2568_v53, %v3364_v26  ;;  %v2576_v63 = vsel %vm2573_vm4, %v2567_v24, %v3363_v51 }
 0xc2e   : > { %v2583_v8 = vpack.c.bf16 %v2577_v59, %v2576_v63  ;;  %v3367_v62 = vpop.permute.xlu1 %3366  ;;  %v3372_v58 = vpop.permute.xlu0 %3371 }
 0xc2f   : > { %v3374_v10 = vunpack.i.h.bf16 %v3372_v58  ;;  %v3373_v7 = vunpack.i.l.bf16 %v3372_v58  ;;  %v3369_v19 = vunpack.i.h.bf16 %v3367_v62  ;;  %v3368_v1 = vunpack.i.l.bf16 %v3367_v62 }
 0xc30   : > { %3191 = vmatmul.mubr.msk.bf16.vlgmr.msra.gmra.mrb[64].mxu0 %vm378_vm0, %v2583_v8 }
 0xc31   : > { %v2578_v47 = vsel %vm2573_vm4, %v2569_v13, %v3373_v7  ;;  %v2579_v21 = vsel %vm2573_vm4, %v2570_v55, %v3374_v10  ;;  %v2572_v32 = vsel %vm677_vm3, %v2564_v56, %v3369_v19  ;;  %v2571_v16 = vsel %vm677_vm3, %v2563_v54, %v3368_v1 }
 0xc32   : > { %v2584_v15 = vpack.c.bf16 %v2579_v21, %v2578_v47  ;;  %v3377_v22 = vpop.permute.xlu1 %3376 }
 0xc33   : > { %v3379_v29 = vunpack.i.h.bf16 %v3377_v22  ;;  %v3378_v40 = vunpack.i.l.bf16 %v3377_v22 }
 0xc34   : > { %3194 = vmatprep.mubr.msk.bf16.mxu0 %vm378_vm0, %v2584_v15 }
 0xc35   : > { %v2581_v17 = vsel %vm2573_vm4, %v2572_v32, %v3379_v29  ;;  %v2580_v18 = vsel %vm2573_vm4, %v2571_v16, %v3378_v40 }
 0xc36   : > { %v2585_v33 = vpack.c.bf16 %v2581_v17, %v2580_v18 }
 0xc38   : > { %3195 = vmatmul.mubr.msk.bf16.gmra.mrb[68].mxu0 %vm378_vm0, %v2585_v33 }
 0xd03   : > { %v3192_v35 = vpop.f32.mrb[64].mxu0 }
 0xd04   : > { %v2664_v5 = vadd.f32 %v3192_v35, %v2889_v9  ;;  %v2655_v25 = vpop.f32.mrb[65].mxu0 }
 0xd05   : > { %v2656_v27 = vadd.f32 %v2889_v9, %v2655_v25  ;;  %v3193_v28 = vpop.f32.mrb[66].mxu0 }
 0xd06   : > { %2688 = vst.msk [vmem:[%s339_s26 + $0x10] sm:$0xff] %vm378_vm0, %v2664_v5  ;;  %v2667_v30 = vadd.f32 %v3193_v28, %v2889_v9  ;;  %v2658_v36 = vpop.f32.mrb[67].mxu0 }
 0xd07   : > { %2686 = vst.msk [vmem:[%s339_s26] sm:$0xff] %vm378_vm0, %v2656_v27  ;;  %v2659_v37 = vadd.f32 %v2889_v9, %v2658_v36 }
 0xd08   : > { %2689 = vst.msk [vmem:[%s339_s26 + $0x18] sm:$0xff] %vm378_vm0, %v2667_v30 }
 0xd09   : > { %2687 = vst.msk [vmem:[%s339_s26 + $0x8] sm:$0xff] %vm378_vm0, %v2659_v37 }
 0xd0b   : > { %v3196_v44 = vpop.f32.mrb[68].mxu0 }
 0xd0c   : > { %v2680_v61 = vadd.f32 %v3196_v44, %v2889_v9  ;;  %v2671_v20 = vpop.f32.mrb[69].mxu0 }
 0xd0d   : > { %v2672_v23 = vadd.f32 %v2889_v9, %v2671_v20  ;;  %v3197_v46 = vpop.f32.mrb[70].mxu0 }
 0xd0e   : > { %2692 = vst.msk [vmem:[%s339_s26 + $0x30] sm:$0xff] %vm378_vm0, %v2680_v61  ;;  %v2683_v48 = vadd.f32 %v3197_v46, %v2889_v9  ;;  %v2674_v39 = vpop.f32.mrb[71].mxu0 }
 0xd0f   : > { %2690 = vst.msk [vmem:[%s339_s26 + $0x20] sm:$0xff] %vm378_vm0, %v2672_v23  ;;  %v2675_v41 = vadd.f32 %v2889_v9, %v2674_v39 }
 0xd10   : > { %2693 = vst.msk [vmem:[%s339_s26 + $0x38] sm:$0xff] %vm378_vm0, %v2683_v48 }
 0xd11   : > { %2691 = vst.msk [vmem:[%s339_s26 + $0x28] sm:$0xff] %vm378_vm0, %v2675_v41 }
 0xd12   : > { %3695 = shalt.err (!%p3692_p8)
}
 0xd13   : > { %s3696_s10 = scalar_lea.hbm %s4560_s13, 1024  ;;  %s3700_s26 = scalar_lea.hbm %s4616_s6, 2048 }
 0xd14   : > { %p3697_p6 = scmp.ne.s32.totalorder %s4560_s13, %s3696_s10  ;;  %p3701_p0 = scmp.lt.u32.totalorder %s4560_s13, %s4616_s6 }
 0xd15   : > { %p3702_p5 = scmp.lt.u32.totalorder %s3700_s26, %s3696_s10  ;;  %p3704_p7 = scmp.lt.u32.totalorder %s3696_s10, %s4560_s13 }
 0xd16   : > { %p3698_p10 = pnand %p3697_p6, %p4635_p4 }
 0xd17   : > { %p3703_p9 = por %p3702_p5, %p3701_p0 }
 0xd18   : > { %p3699_p11 = pneg %p3698_p10 }
 0xd19   : > { %p3705_p12 = por %p3704_p7, %p3703_p9 }
 0xd1b   : > { %p3706_p13 = pnand %p3705_p12, %p3699_p11 }
 0xd1d   : > { %3709 = shalt.err (!%p3706_p13)
}
 0xd1e   : > { %s3789_s11 = smov 128  }
 0xd1f   : > { %3224 = dma.vmem_to_hbm [thread:$0]  (%p4635_p4), %s4563_s14, 1024, %s4560_s13, %s2695_s27, %s3789_s11, %s3789_s11, %s3785_s12  }
 0xd20 PF: > { %s2724_s19 = sand.u32 1, %s3748_s21   ;;  %p4636_p1 = scmp.ne.s32.totalorder %s4626_s17, 0 }
 0xd21   : > { %p4637_p3 = scmp.ge.s32.totalorder %s3760_s24, 2  ;;  %s2725_s16 = scalar_lea.sflag [#allocation4], %s2724_s19 }
 0xd23   : > { %p3247_p2 = pnand %p4637_p3, %p4636_p1 }
 0xd25   : > { %3743 = dma.done.wait (!%p3247_p2), %s2725_s16, 1024  }
 0xd26   : > { %3745 = vsyncadd (!%p3247_p2), %s2725_s16, 4294966272  ;;  %p22_p8 = scmp.ge.s32.totalorder %s3987_s30, 4   ;;  %s4638_s21 = smov %s3752_s22 }
 0xd27   : > { %s4639_s22 = smov %s3756_s23  ;;  %s4640_s23 = smov %s3999_s7 }
 0xd28   : > { %s4641_s24 = smov %s3987_s30  ;;  %24 = sbr.rel (!%p22_p8) target bundleno = 8 (0x8), region = 112 }
 0xd2f   :  { %2730 = vsyncpa [#allocation3], 1 }
 0xd30   :  { %2732 = vsyncpa [#allocation3 + $0x1], 1 }
 0xd31   :  { %2733 = vsyncpa [#allocation6], 1 }
 0xd32   :  { %2734 = vsyncpa [#allocation9], 1 }
 0xd33   :  { %2735 = vsyncpa [#allocation12], 1 }
 0xd34   :  { %2736 = vsyncpa [#allocation4], 1 }
 0xd35   :  { %2738 = vsyncpa [#allocation4 + $0x1], 1 }

// kernel: tpu_custom_call.1
= control target key start
LH: loop header
LB: loop body
LE: loop exit
PB: predicated region body
PF: predicated region fallthrough
CT: control target
= control target key end

     0   :  { %11 = vsyncpa [#allocation3], 0  ;;  %s4610_s0 = inlined_call_operand.hbm [shape: f32[8,16,32], index: 0, kind: input, shape index: {}]   ;;  %s4611_s1 = inlined_call_operand.hbm [shape: bf16[32,96], index: 1, kind: input, shape index: {}]   ;;  %s4612_s2 = inlined_call_operand.hbm [shape: f32[1,96], index: 2, kind: input, shape index: {}]   ;;  %s4613_s3 = inlined_call_operand.hbm [shape: bf16[32,32], index: 3, kind: input, shape index: {}]   ;;  %s4614_s4 = inlined_call_operand.hbm [shape: f32[1,32], index: 4, kind: input, shape index: {}]   ;;  %s4615_s5 = inlined_call_operand.hbm [shape: f32[4,4,16,16], index: 5, kind: input, shape index: {}]   ;;  %s4616_s6 = inlined_call_operand.hbm [shape: f32[8,16,32], index: 6, kind: output, shape index: {}]  }
   0x1   :  { %13 = vsyncpa [#allocation3 + $0x1], 0 }
   0x2   :  { %14 = vsyncpa [#allocation6], 0 }
   0x3   :  { %15 = vsyncpa [#allocation9], 0 }
   0x4   :  { %16 = vsyncpa [#allocation12], 0 }
   0x5   :  { %17 = vsyncpa [#allocation4], 0 }
   0x6   :  { %19 = vsyncpa [#allocation4 + $0x1], 0  ;;  %s3825_s21 = smov 0   ;;  %s3827_s22 = smov 0  }
   0x7   :  { %s3829_s23 = smov 0   ;;  %s3831_s24 = smov 0  }
   0x8 LB: > { %s3762_s25 = smov [#allocation5]   ;;  %s3846_s27 = sadd.s32 4294967295, %s3760_s24   ;;  %s3760_s24 = sphi %s3831_s24, %s4641_s24   ;;  %s3756_s23 = sphi %s3829_s23, %s4640_s23   ;;  %s3752_s22 = sphi %s3827_s22, %s4639_s22   ;;  %s3748_s21 = sphi %s3825_s21, %s4638_s21  }
   0x9   : > { %s199_s26 = sshll.u32 %s3762_s25, 4  ;;  %p2831_p0 = scmp.ge.s32.totalorder %s3760_s24, 1  ;;  %s3851_s26 = int_to_ptr.vmem [resolvable:$true] %s199_s26 }
   0xa   : > { %p4617_p1 = scmp.eq.s32.totalorder %s3846_s27, 0  ;;  %p187_p2 = scmp.lt.s32.totalorder %s3760_s24, 3 }
   0xb   : > { %s3763_s29 = smov [#allocation8]   ;;  %s3764_s8 = smov [#allocation7]  }
   0xc   : > { %p3853_p3 = pnand %p2831_p0, %p187_p2  ;;  %s223_s30 = sshll.u32 %s3763_s29, 4  ;;  %s3866_s30 = int_to_ptr.vmem [resolvable:$true] %s223_s30 }
   0xd   : > { %s213_s9 = sshll.u32 %s3764_s8, 4  ;;  %s3512_s12 = scalar_lea.hbm %s4611_s1, 256  ;;  %s3868_s9 = int_to_ptr.vmem [resolvable:$true] %s213_s9 }
   0xe   : > { %s4620_s28 = scalar_select %p3853_p3, 1, 0 }
   0xf   : > { %p3226_p5 = pneg %p3853_p3  ;;  %p3513_p7 = scmp.ne.s32.totalorder %s4611_s1, %s3512_s12 }
  0x10   : > { %p3519_p11 = scmp.lt.u32.totalorder %s3512_s12, %s4611_s1 }
  0x11   : > { %p3862_p6 = pnand %p3226_p5, %p4617_p1 }
  0x13   : > { %p3878_p8 = pneg %p3862_p6 }
  0x15   : > { %p3515_p9 = pnand %p3878_p8, %p3513_p7 }
  0x17   : > { %p3516_p10 = pneg %p3515_p9 }
  0x19   : > { %p3521_p12 = pnand %p3519_p11, %p3516_p10 }
  0x1b   : > { %3524 = shalt.err (!%p3521_p12)
}
  0x1c   : > { %s3525_s18 = scalar_lea.vmem %s3851_s26, 256  ;;  %p3533_p5 = scmp.lt.s32.totalorder %s3851_s26, %s3851_s26 }
  0x1d   : > { %p3526_p13 = scmp.ne.s32.totalorder %s3851_s26, %s3525_s18  ;;  %p3534_p4 = scmp.lt.s32.totalorder %s3525_s18, %s3525_s18 }
  0x1f   : > { %p3528_p0 = pnand %p3526_p13, %p3878_p8  ;;  %p3535_p7 = por %p3534_p4, %p3533_p5 }
  0x21   : > { %p3529_p2 = pneg %p3528_p0 }
  0x23   : > { %p3536_p9 = pnand %p3535_p7, %p3529_p2 }
  0x25   : > { %3539 = shalt.err (!%p3536_p9)
}
  0x26   : > { %s3765_s19 = smov 64   ;;  %s3766_s20 = smov 4  }
  0x27   : > { %3229 = dma.hbm_to_vmem [thread:$0]  (!%p3862_p6), %s4611_s1, 256, %s3851_s26, [#allocation6], %s3765_s19, %s3765_s19, %s3766_s20  }
  0x28   : > { %s3540_s11 = scalar_lea.hbm %s4613_s3, 256 }
  0x29   : > { %p3541_p4 = scmp.ne.s32.totalorder %s4613_s3, %s3540_s11  ;;  %p3547_p12 = scmp.lt.u32.totalorder %s3540_s11, %s4613_s3 }
  0x2b   : > { %p3543_p10 = pnand %p3541_p4, %p3878_p8 }
  0x2d   : > { %p3544_p11 = pneg %p3543_p10 }
  0x2f   : > { %p3549_p13 = pnand %p3547_p12, %p3544_p11 }
  0x31   : > { %3552 = shalt.err (!%p3549_p13)
}
  0x32   : > { %s3553_s26 = scalar_lea.vmem %s3866_s30, 256  ;;  %p3561_p7 = scmp.lt.s32.totalorder %s3866_s30, %s3866_s30 }
  0x33   : > { %p3554_p0 = scmp.ne.s32.totalorder %s3866_s30, %s3553_s26  ;;  %p3562_p9 = scmp.lt.s32.totalorder %s3553_s26, %s3553_s26 }
  0x35   : > { %p3556_p2 = pnand %p3554_p0, %p3878_p8  ;;  %p3563_p4 = por %p3562_p9, %p3561_p7 }
  0x37   : > { %p3557_p5 = pneg %p3556_p2 }
  0x39   : > { %p3564_p10 = pnand %p3563_p4, %p3557_p5 }
  0x3b   : > { %3567 = shalt.err (!%p3564_p10)
}
  0x3c   : > { %3235 = dma.hbm_to_vmem [thread:$0]  (!%p3862_p6), %s4613_s3, 256, %s3866_s30, [#allocation9], %s3765_s19, %s3765_s19, %s3766_s20  }
  0x3d   : > { %s3568_s8 = scalar_lea.hbm %s4612_s2, 16 }
  0x3e   : > { %p3569_p11 = scmp.ne.s32.totalorder %s4612_s2, %s3568_s8  ;;  %p3575_p0 = scmp.lt.u32.totalorder %s3568_s8, %s4612_s2 }
  0x40   : > { %p3571_p12 = pnand %p3569_p11, %p3878_p8 }
  0x42   : > { %p3572_p13 = pneg %p3571_p12 }
  0x44   : > { %p3577_p2 = pnand %p3575_p0, %p3572_p13 }
  0x46   : > { %3580 = shalt.err (!%p3577_p2)
}
  0x47   : > { %s3581_s30 = scalar_lea.vmem %s3868_s9, 16  ;;  %s3588_s19 = scalar_lea.vmem %s3868_s9, 32 }
  0x48   : > { %p3582_p5 = scmp.ne.s32.totalorder %s3868_s9, %s3581_s30  ;;  %p3589_p4 = scmp.lt.s32.totalorder %s3868_s9, %s3868_s9 }
  0x49   : > { %p3590_p10 = scmp.lt.s32.totalorder %s3588_s19, %s3581_s30 }
  0x4a   : > { %p3584_p7 = pnand %p3582_p5, %p3878_p8 }
  0x4b   : > { %p3591_p11 = por %p3590_p10, %p3589_p4 }
  0x4c   : > { %p3585_p9 = pneg %p3584_p7 }
  0x4e   : > { %p3592_p12 = pnand %p3591_p11, %p3585_p9 }
  0x50   : > { %3595 = shalt.err (!%p3592_p12)
}
  0x51   : > { %3232 = dma.hbm_to_vmem [thread:$0]  (!%p3862_p6), %s4612_s2, 16, %s3868_s9, [#allocation6]  }
  0x52   : > { %s3767_s16 = smov [#allocation10]   ;;  %s3768_s17 = smov [#allocation11]  }
  0x53   : > { %s237_s26 = sshll.u32 %s3767_s16, 4  ;;  %s247_s18 = sshll.u32 %s3768_s17, 4  ;;  %s238_s26 = int_to_ptr.vmem [resolvable:$true] %s237_s26  ;;  %s248_s18 = int_to_ptr.vmem [resolvable:$true] %s247_s18 }
  0x54   : > { %s3596_s8 = scalar_lea.hbm %s4614_s4, 16 }
  0x55   : > { %p3597_p13 = scmp.ne.s32.totalorder %s4614_s4, %s3596_s8  ;;  %p3603_p5 = scmp.lt.u32.totalorder %s3596_s8, %s4614_s4 }
  0x57   : > { %p3599_p0 = pnand %p3597_p13, %p3878_p8 }
  0x59   : > { %p3600_p2 = pneg %p3599_p0 }
  0x5b   : > { %p3605_p7 = pnand %p3603_p5, %p3600_p2 }
  0x5d   : > { %3608 = shalt.err (!%p3605_p7)
}
  0x5e   : > { %s3609_s9 = scalar_lea.vmem %s238_s26, 16  ;;  %s3616_s30 = scalar_lea.vmem %s238_s26, 32 }
  0x5f   : > { %p3610_p9 = scmp.ne.s32.totalorder %s238_s26, %s3609_s9  ;;  %p3617_p11 = scmp.lt.s32.totalorder %s238_s26, %s238_s26 }
  0x60   : > { %p3618_p12 = scmp.lt.s32.totalorder %s3616_s30, %s3609_s9 }
  0x61   : > { %p3612_p4 = pnand %p3610_p9, %p3878_p8 }
  0x62   : > { %p3619_p1 = por %p3618_p12, %p3617_p11 }
  0x63   : > { %p3613_p10 = pneg %p3612_p4 }
  0x65   : > { %p3620_p3 = pnand %p3619_p1, %p3613_p10 }
  0x67   : > { %3623 = shalt.err (!%p3620_p3)
}
  0x68   : > { %3238 = dma.hbm_to_vmem [thread:$0]  (!%p3862_p6), %s4614_s4, 16, %s238_s26, [#allocation9]  }
  0x69   : > { %s3624_s17 = scalar_lea.hbm %s4615_s5, 4096 }
  0x6a   : > { %p3625_p13 = scmp.ne.s32.totalorder %s4615_s5, %s3624_s17  ;;  %p3631_p3 = scmp.lt.u32.totalorder %s3624_s17, %s4615_s5 }
  0x6c   : > { %p3627_p0 = pnand %p3625_p13, %p3878_p8 }
  0x6e   : > { %p3628_p1 = pneg %p3627_p0 }
  0x70   : > { %p3633_p2 = pnand %p3631_p3, %p3628_p1 }
  0x72   : > { %3636 = shalt.err (!%p3633_p2)
}
  0x73   : > { %s3637_s11 = scalar_lea.vmem %s248_s18, 4096  ;;  %p3645_p4 = scmp.lt.s32.totalorder %s248_s18, %s248_s18 }
  0x74   : > { %p3638_p5 = scmp.ne.s32.totalorder %s248_s18, %s3637_s11  ;;  %p3646_p10 = scmp.lt.s32.totalorder %s3637_s11, %s3637_s11 }
  0x76   : > { %p3640_p7 = pnand %p3638_p5, %p3878_p8  ;;  %p3647_p11 = por %p3646_p10, %p3645_p4 }
  0x78   : > { %p3641_p9 = pneg %p3640_p7 }
  0x7a   : > { %p3648_p12 = pnand %p3647_p11, %p3641_p9 }
  0x7c   : > { %3651 = shalt.err (!%p3648_p12)
}
  0x7d   : > { %s3769_s26 = smov 128   ;;  %s3770_s15 = smov 8  }
  0x7e   : > { %3241 = dma.hbm_to_vmem [thread:$0]  (!%p3862_p6), %s4615_s5, 4096, %s248_s18, [#allocation12], %s3769_s26, %s3769_s26, %s3770_s15  }
  0x7f   : > { %s2830_s9 = sadd.s32 4294967294, %s3760_s24   ;;  %s3987_s30 = sadd.s32 1, %s3760_s24  }
  0x80   : > { %s32_s19 = sadd.s32 1, %s3756_s23  ;;  %s29_s20 = ssub.s32 %s3760_s24, %s3987_s30 }
  0x81   : > { %p39_p8 = scmp.ne.s32.totalorder %s3756_s23, %s3752_s22  ;;  %p30_p13 = scmp.eq.s32.totalorder %s29_s20, 0 }
  0x82   : > { %p40_p0 = scmp.eq.s32.totalorder %s3760_s24, 0  ;;  %p45_p1 = scmp.ne.s32.totalorder %s3752_s22, %s3748_s21 }
  0x83   : > { %p174_p3 = scmp.eq.s32.totalorder %s3846_s27, 1  ;;  %p4623_p5 = scmp.eq.s32.totalorder %s3846_s27, 0 }
  0x84   : > { %s3999_s7 = scalar_select %p30_p13, %s3756_s23, %s32_s19  }
  0x85   : > { %p41_p2 = por %p40_p0, %p39_p8  ;;  %p4003_p7 = por %p4623_p5, %p45_p1 }
  0x86   : > { %p4007_p6 = por %p174_p3, %p39_p8  ;;  %p180_p9 = scmp.eq.s32.totalorder %s2830_s9, 1 }
  0x87   : > { %p3255_p4 = scmp.lt.s32.totalorder %s3760_s24, 2  ;;  %s261_s16 = sand.u32 1, %s3756_s23  }
  0x88   : > { %s4625_s18 = scalar_select %p4007_p6, 1, 0 }
  0x89   : > { %p4013_p10 = por %p180_p9, %p45_p1  ;;  %s2838_s25 = sshll.u32 %s261_s16, 6 }
  0x8a   : > { %s2903_s29 = sshll.u32 %s3760_s24, 10  ;;  %s265_s12 = scalar_lea.vmem [#allocation2], %s2838_s25 }
  0x8b   : > { %s4626_s17 = scalar_select %p4013_p10, 1, 0 }
  0x8c   : > { %s4021_s11 = scalar_lea.hbm %s4610_s0, %s2903_s29  ;;  %s273_s13 = sshll.u32 %s265_s12, 4  ;;  %s4027_s13 = int_to_ptr.vmem [resolvable:$true] %s273_s13 }
  0x8d   : > { %p4023_p11 = pnand %p3255_p4, %p41_p2  ;;  %s4029_s19 = scalar_lea.sflag [#allocation3], %s261_s16 }
  0x8e   : > { %s3652_s20 = scalar_lea.hbm %s4021_s11, 1024  ;;  %s3657_s8 = scalar_lea.hbm %s4610_s0, 2048 }
  0x8f   : > { %p3653_p12 = scmp.ne.s32.totalorder %s4021_s11, %s3652_s20  ;;  %p3654_p8 = pneg %p4023_p11 }
  0x90   : > { %p3658_p1 = scmp.lt.u32.totalorder %s4021_s11, %s4610_s0  ;;  %p3659_p3 = scmp.lt.u32.totalorder %s3657_s8, %s3652_s20 }
  0x91   : > { %p3655_p13 = pnand %p3654_p8, %p3653_p12  ;;  %p3661_p5 = scmp.lt.u32.totalorder %s3652_s20, %s4021_s11 }
  0x92   : > { %p3660_p2 = por %p3659_p3, %p3658_p1 }
  0x93   : > { %p3656_p0 = pneg %p3655_p13 }
  0x94   : > { %p3662_p9 = por %p3661_p5, %p3660_p2 }
  0x96   : > { %p3663_p4 = pnand %p3662_p9, %p3656_p0 }
  0x98   : > { %3666 = shalt.err (!%p3663_p4)
}
  0x99   : > { %s3667_s16 = scalar_lea.vmem %s4027_s13, 1024  ;;  %s3771_s25 = smov [#allocation2]  }
  0x9a   : > { %p3668_p12 = scmp.ne.s32.totalorder %s4027_s13, %s3667_s16  ;;  %s3672_s29 = sshll.u32 %s3771_s25, 4  ;;  %s3673_s29 = int_to_ptr.vmem [resolvable:$false] %s3672_s29 }
  0x9b   : > { %s3674_s10 = scalar_lea.vmem %s3673_s29, 2048  ;;  %p3675_p6 = scmp.lt.s32.totalorder %s4027_s13, %s3673_s29 }
  0x9c   : > { %p3670_p13 = pnand %p3668_p12, %p3654_p8  ;;  %p3676_p1 = scmp.lt.s32.totalorder %s3674_s10, %s3667_s16 }
  0x9e   : > { %p3671_p10 = pneg %p3670_p13  ;;  %p3677_p3 = por %p3676_p1, %p3675_p6 }
  0xa0   : > { %p3678_p2 = pnand %p3677_p3, %p3671_p10 }
  0xa2   : > { %3681 = shalt.err (!%p3678_p2)
}
  0xa3   : > { %3245 = dma.hbm_to_vmem [thread:$0]  (!%p4023_p11), %s4021_s11, 1024, %s4027_s13, %s4029_s19, %s3769_s26, %s3769_s26, %s3770_s15  }
  0xa4   : > { %p4628_p8 = scmp.ne.s32.totalorder %s4620_s28, 0 }
  0xa5   : > { %s4063_s20 = sand.u32 (!%p4628_p8), 1, %s3752_s22  }
  0xa6   : > { %285 = sbr.rel (%p4628_p8) target bundleno = 3360 (0xd20), region = 44  ;;  %s2843_s8 = sshll.u32 (!%p4628_p8), %s4063_s20, 6 }
  0xa7   : > { %s288_s12 = scalar_lea.sflag (!%p4628_p8), [#allocation3], %s4063_s20  ;;  %s291_s9 = scalar_lea.vmem (!%p4628_p8), [#allocation2], %s2843_s8 }
  0xad   : > { %3727 = dma.done.wait (%p4003_p7), %s288_s12, 1024  }
  0xae   : > { %3729 = vsyncadd (%p4003_p7), %s288_s12, 4294966272  ;;  %p4629_p6 = scmp.eq.s32.totalorder %s3846_s27, 0 }
  0xb0   : > { %3731 = dma.done.wait (%p4629_p6), [#allocation6], 272   ;;  %p4630_p10 = pmov %p4629_p6 }
  0xb1   : > { %p4631_p11 = pmov %p4629_p6 }
  0xb2   : > { %3733 = vsyncadd (%p4630_p10), [#allocation6], 4294967024 }
  0xb3   : > { %3735 = dma.done.wait (%p4631_p11), [#allocation9], 272   ;;  %p4632_p0 = pmov %p4629_p6 }
  0xb5   : > { %3737 = vsyncadd (%p4632_p0), [#allocation9], 4294967024  ;;  %p4633_p5 = pmov %p4632_p0 }
  0xb6   : > { %p4634_p9 = pmov %p4632_p0 }
  0xb7   : > { %3739 = dma.done.wait (%p4633_p5), [#allocation12], 4096  }
  0xb8   : > { %3741 = vsyncadd (%p4634_p9), [#allocation12], 4294963200  ;;  %v3380_v0 = vld [vmem:[#allocation5] sm:$0xff]   ;;  %v3381_v1 = vld [vmem:[#allocation5 + $0x8] sm:$0xff]   ;;  %vm378_vm0 = vcmask 261120   ;;  %v3772_v14 = vmov 0.0  }
  0xb9   : > { %2982 = vmatprep.subr.bf16.mxu0 %v3380_v0  ;;  %3198 = vmatprep.subr.bf16.mxu1 %v3380_v0  ;;  %v343_v2 = vld [vmem:[%s291_s9] sm:$0xff]  ;;  %v344_v3 = vld [vmem:[%s291_s9 + $0x8] sm:$0xff]  ;;  %v345_v7 = vld [vmem:[%s291_s9 + $0x10] sm:$0xff]  ;;  %vm3773_vm1 = vmmov 0   ;;  %s3774_s28 = smov 96   ;;  %vm463_vm2 = vcmask 64512  }
  0xba   : > { %v347_v4 = vld [vmem:[%s291_s9 + $0x20] sm:$0xff]  ;;  %2983 = vmatpush3.bf16.msra.mxu0 %v3380_v0  ;;  %3200 = vmatpush3.bf16.msra.mxu1 %v3380_v0  ;;  %v351_v5 = vpack.c.bf16 %v344_v3, %v343_v2  ;;  %v348_v6 = vld [vmem:[%s291_s9 + $0x28] sm:$0xff]  ;;  %v346_v8 = vld [vmem:[%s291_s9 + $0x18] sm:$0xff]  ;;  %vm677_vm3 = vcmask 130048   ;;  %s3775_s26 = smov 64   ;;  %s3776_s15 = smov 88  }
  0xbb   : > { %2984 = vmatprep.subr.bf16.mxu0 %v3381_v1  ;;  %3199 = vmatprep.subr.bf16.mxu1 %v3381_v1  ;;  %v353_v9 = vpack.c.bf16 %v348_v6, %v347_v4  ;;  %v349_v10 = vld [vmem:[%s291_s9 + $0x30] sm:$0xff]  ;;  %v350_v11 = vld [vmem:[%s291_s9 + $0x38] sm:$0xff]  ;;  %v352_v12 = vpack.c.bf16 %v346_v8, %v345_v7  ;;  %v661_v44 = vld [vmem:[#allocation11] sm:$0xff]  ;;  %s3777_s14 = smov 120   ;;  %s3778_s11 = smov 56   ;;  %vm2573_vm4 = vcmask 195584  }
  0xbc   : > { %2986 = vmatprep.mubr.msk.bf16.mxu0 %vm378_vm0, %v351_v5  ;;  %v354_v13 = vpack.c.bf16 %v350_v11, %v349_v10  ;;  %v2850_v16 = vld [vmem:[#allocation7] ss:$0 sm:$0xff]  ;;  %v665_v45 = vld [vmem:[#allocation11 + $0x20] sm:$0xff]  ;;  %v663_v60 = vld [vmem:[#allocation11 + $0x10] sm:$0xff]  ;;  %s3779_s13 = smov 80   ;;  %s3780_s19 = smov 112  }
  0xbd   : > { %2990 = vmatprep.mubr.msk.bf16.mxu1 %vm378_vm0, %v353_v9  ;;  %v662_v48 = vld [vmem:[#allocation11 + $0x8] sm:$0xff]  ;;  %v664_v63 = vld [vmem:[#allocation11 + $0x18] sm:$0xff]  ;;  %v667_v7 = vld [vmem:[#allocation11 + $0x30] sm:$0xff]  ;;  %s3781_s16 = smov 48   ;;  %s3782_s25 = smov 72  }
  0xbe   : > { %2985 = vmatpush3.bf16.msra.mxu0 %v3381_v1  ;;  %3201 = vmatpush3.bf16.msra.mxu1 %v3381_v1  ;;  %v666_v6 = vld [vmem:[#allocation11 + $0x28] sm:$0xff]  ;;  %v668_v11 = vld [vmem:[#allocation11 + $0x38] sm:$0xff]  ;;  %s3783_s29 = smov 104   ;;  %s3784_s10 = smov 40  }
  0xbf   : > { %2994 = vmatprep.subr.bf16.mxu1 %v3772_v14  ;;  %3006 = vmatprep.subr.bf16.mxu0 %v3772_v14  ;;  %s3785_s12 = smov 8   ;;  %s3786_s9 = smov 16  }
  0xc0   : > { %p4635_p4 = scmp.ne.s32.totalorder %s4625_s18, 0 }
  0xc1   : > { %2987 = vmatmul.mubr.msk.bf16.vlgmr.msra.gmra.mrb[0].mxu0 %vm378_vm0, %v352_v12  ;;  %2991 = vmatmul.mubr.msk.bf16.vlgmr.msra.gmra.mrb[0].mxu1 %vm378_vm0, %v354_v13 }
  0xc2   : > { %2996 = vmatprep.mubr.msk.bf16.mxu1 %vm3773_vm1, %v3772_v14  ;;  %3008 = vmatprep.mubr.msk.bf16.mxu0 %vm3773_vm1, %v3772_v14 }
 0x194   : > { %v2988_v15 = vpop.f32.mrb[0].mxu0  ;;  %v2992_v17 = vpop.f32.mrb[0].mxu1 }
 0x195   : > { %v450_v18 = vadd.f32 %v2992_v17, %v2850_v16  ;;  %v425_v19 = vpop.f32.mrb[1].mxu0  ;;  %v441_v20 = vpop.f32.mrb[1].mxu1  ;;  %v434_v24 = vadd.f32 %v2988_v15, %v2850_v16 }
 0x196   : > { %v442_v21 = vadd.f32 %v2850_v16, %v441_v20  ;;  %v2989_v22 = vpop.f32.mrb[2].mxu0  ;;  %v2993_v23 = vpop.f32.mrb[2].mxu1  ;;  %v426_v29 = vadd.f32 %v2850_v16, %v425_v19 }
 0x197   : > { %v437_v25 = vadd.f32 %v2989_v22, %v2850_v16  ;;  %v453_v26 = vadd.f32 %v2993_v23, %v2850_v16  ;;  %v428_v27 = vpop.f32.mrb[3].mxu0  ;;  %v444_v28 = vpop.f32.mrb[3].mxu1 }
 0x198   : > { %v429_v30 = vadd.f32 %v2850_v16, %v428_v27  ;;  %v445_v31 = vadd.f32 %v2850_v16, %v444_v28 }
 0x199   : > { %v4095_v32 = vpack.c.bf16 %v437_v25, %v434_v24  ;;  %v4097_v33 = vpack.c.bf16 %v453_v26, %v450_v18 }
 0x19a   : > { %v4099_v34 = vpack.c.bf16 %v429_v30, %v426_v29  ;;  %v4101_v35 = vpack.c.bf16 %v445_v31, %v442_v21 }
 0x19c   : > { %562 = vrot.lane.b32.xlu1 %v4101_v35, %s3774_s28  ;;  %461 = vrot.lane.b32.xlu0 %v4099_v34, %s3774_s28 }
 0x1a0   : > { %512 = vrot.lane.b32.xlu0 %v4095_v32, %s3774_s28  ;;  %612 = vrot.lane.b32.xlu1 %v4097_v33, %s3774_s28  ;;  %s3787_s28 = smov 24  }
 0x20e   : > { %v563_v36 = vpop.permute.xlu1 %562  ;;  %v462_v37 = vpop.permute.xlu0 %461 }
 0x20f   : > { %v568_v38 = vsel %vm463_vm2, %v563_v36, 0  ;;  %v468_v39 = vsel %vm463_vm2, %v462_v37, 0 }
 0x210   : > { %2995 = vmatpush3.bf16.xpose.msra.mxu1 %v468_v39  ;;  %3007 = vmatpush3.bf16.xpose.msra.mxu0 %v568_v38 }
 0x211   : > { %3000 = vmatprep.subr.bf16.mxu1 %v3772_v14  ;;  %3018 = vmatprep.subr.bf16.mxu0 %v3772_v14 }
 0x212   : > { %v513_v40 = vpop.permute.xlu0 %512  ;;  %v613_v42 = vpop.permute.xlu1 %612 }
 0x213   : > { %v518_v41 = vsel %vm463_vm2, %v513_v40, 0  ;;  %v618_v43 = vsel %vm463_vm2, %v613_v42, 0 }
 0x217   : > { %2997 = vmatmul.mubr.msk.bf16.vlgmr.msra.gmra.mrb[4].mxu1 %vm463_vm2, %v4099_v34  ;;  %3009 = vmatmul.mubr.msk.bf16.vlgmr.msra.gmra.mrb[4].mxu0 %vm463_vm2, %v4101_v35 }
 0x218   : > { %3001 = vmatpush3.bf16.xpose.msra.mxu1 %v518_v41  ;;  %3002 = vmatprep.mubr.msk.bf16.mxu1 %vm3773_vm1, %v3772_v14 }
 0x219   : > { %3012 = vmatprep.subr.bf16.mxu1 %v3772_v14  ;;  %3020 = vmatprep.mubr.msk.bf16.mxu0 %vm3773_vm1, %v3772_v14 }
 0x21f   : > { %3003 = vmatmul.mubr.msk.bf16.vlgmr.msra.gmra.mrb[8].mxu1 %vm463_vm2, %v4095_v32 }
 0x220   : > { %3013 = vmatpush3.bf16.xpose.msra.mxu1 %v618_v43  ;;  %3014 = vmatprep.mubr.msk.bf16.mxu1 %vm3773_vm1, %v3772_v14 }
 0x221   : > { %3024 = vmatprep.subr.bf16.mxu1 %v3772_v14 }
 0x227   : > { %3015 = vmatmul.mubr.msk.bf16.vlgmr.msra.gmra.mrb[12].mxu1 %vm463_vm2, %v4097_v33 }
 0x228   : > { %3026 = vmatprep.mubr.msk.bf16.mxu1 %vm3773_vm1, %v3772_v14 }
 0x2ea   : > { %v504_v46 = vpop.f32.mrb[4].mxu1  ;;  %v604_v47 = vpop.f32.mrb[4].mxu0 }
 0x2eb   : > { %v669_v49 = vadd.f32 %v661_v44, %v504_v46  ;;  %v673_v50 = vadd.f32 %v665_v45, %v604_v47  ;;  %v2998_v51 = vpop.f32.mrb[5].mxu1  ;;  %v3010_v52 = vpop.f32.mrb[5].mxu0 }
 0x2ec   : > { %v507_v53 = vpop.f32.mrb[6].mxu1  ;;  %v607_v54 = vpop.f32.mrb[6].mxu0 }
 0x2ed   : > { %v670_v55 = vadd.f32 %v662_v48, %v507_v53  ;;  %v2999_v56 = vpop.f32.mrb[7].mxu1  ;;  %v3011_v57 = vpop.f32.mrb[7].mxu0  ;;  %v690_v58 = vsel %vm677_vm3, %v673_v50, -inf  ;;  %v678_v59 = vsel %vm677_vm3, %v669_v49, -inf  ;;  %v674_v8 = vadd.f32 %v666_v6, %v607_v54 }
 0x2ee   : > { %691 = vmax.xlane.f32.xlu1 %v690_v58  ;;  %679 = vmax.xlane.f32.xlu0 %v678_v59 }
 0x2ef   : > { %v681_v61 = vsel %vm677_vm3, %v670_v55, -inf  ;;  %v693_v18 = vsel %vm677_vm3, %v674_v8, -inf }
 0x2f2   : > { %682 = vmax.xlane.f32.xlu1 %v681_v61  ;;  %v554_v62 = vpop.f32.mrb[8].mxu1 }
 0x2f3   : > { %v671_v0 = vadd.f32 %v663_v60, %v554_v62  ;;  %v3004_v1 = vpop.f32.mrb[9].mxu1 }
 0x2f4   : > { %v557_v2 = vpop.f32.mrb[10].mxu1 }
 0x2f5   : > { %v672_v3 = vadd.f32 %v664_v63, %v557_v2  ;;  %v3005_v4 = vpop.f32.mrb[11].mxu1  ;;  %v684_v5 = vsel %vm677_vm3, %v671_v0, -inf }
 0x2f6   : > { %685 = vmax.xlane.f32.xlu0 %v684_v5 }
 0x2f7   : > { %v687_v9 = vsel %vm677_vm3, %v672_v3, -inf }
 0x2fa   : > { %688 = vmax.xlane.f32.xlu0 %v687_v9  ;;  %v654_v10 = vpop.f32.mrb[12].mxu1 }
 0x2fb   : > { %v4136_v12 = vadd.f32 %v667_v7, %v654_v10  ;;  %v3016_v13 = vpop.f32.mrb[13].mxu1 }
 0x2fc   : > { %v657_v15 = vpop.f32.mrb[14].mxu1 }
 0x2fd   : > { %v4138_v16 = vadd.f32 %v668_v11, %v657_v15  ;;  %v3017_v17 = vpop.f32.mrb[15].mxu1  ;;  %v696_v19 = vsel %vm677_vm3, %v4136_v12, -inf }
 0x2fe   : > { %694 = vmax.xlane.f32.xlu0 %v693_v18  ;;  %697 = vmax.xlane.f32.xlu1 %v696_v19 }
 0x2ff   : > { %v699_v20 = vsel %vm677_vm3, %v4138_v16, -inf }
 0x302   : > { %700 = vmax.xlane.f32.xlu0 %v699_v20 }
 0x30f   : > { %770 = vrot.lane.b32.xlu1 %v4099_v34, %s3775_s26 }
 0x37b   : > { %v692_v21 = vpop.xlane.xlu1 %691  ;;  %v680_v22 = vpop.xlane.xlu0 %679 }
 0x37c   : > { %v706_v23 = vsub.f32 %v673_v50, %v692_v21  ;;  %v702_v24 = vsub.f32 %v669_v49, %v680_v22 }
 0x37e   : > { %v710_v25 = vmul.f32 1.442695, %v702_v24  ;;  %v718_v26 = vmul.f32 1.442695, %v706_v23 }
 0x37f   : > { %v683_v27 = vpop.xlane.xlu1 %682 }
 0x380   : > { %v703_v28 = vsub.f32 %v670_v55, %v683_v27  ;;  %3384 = vpow2.f32 %v710_v25 }
 0x381   : > { %3386 = vpow2.f32 %v718_v26 }
 0x382   : > { %v712_v29 = vmul.f32 1.442695, %v703_v28 }
 0x383   : > { %v686_v30 = vpop.xlane.xlu0 %685 }
 0x384   : > { %3388 = vpow2.f32 %v712_v29  ;;  %v704_v31 = vsub.f32 %v671_v0, %v686_v30 }
 0x386   : > { %v714_v36 = vmul.f32 1.442695, %v704_v31 }
 0x387   : > { %v689_v37 = vpop.xlane.xlu0 %688 }
 0x388   : > { %3390 = vpow2.f32 %v714_v36  ;;  %v705_v39 = vsub.f32 %v672_v3, %v689_v37 }
 0x38a   : > { %v4147_v38 = vpop.eup %3384  ;;  %v716_v47 = vmul.f32 1.442695, %v705_v39 }
 0x38b   : > { %v698_v40 = vpop.xlane.xlu1 %697  ;;  %v695_v41 = vpop.xlane.xlu0 %694  ;;  %v726_v43 = vsel %vm677_vm3, %v4147_v38, 0.0 }
 0x38c   : > { %v707_v42 = vsub.f32 %v674_v8, %v695_v41  ;;  %v4151_v44 = vpop.eup %3386  ;;  %727 = vadd.xlane.f32.xlu1 %v726_v43  ;;  %v708_v57 = vsub.f32 %v4136_v12, %v698_v40 }
 0x38d   : > { %v738_v50 = vsel %vm677_vm3, %v4151_v44, 0.0 }
 0x38e   : > { %v3389_v45 = vpop.eup %3388  ;;  %v720_v46 = vmul.f32 1.442695, %v707_v42  ;;  %v722_v58 = vmul.f32 1.442695, %v708_v57 }
 0x38f   : > { %v771_v48 = vpop.permute.xlu1 %770  ;;  %v729_v49 = vsel %vm677_vm3, %v3389_v45, 0.0  ;;  %v701_v59 = vpop.xlane.xlu0 %700 }
 0x390   : > { %3019 = vmatpush3.bf16.msra.mxu0 %v771_v48  ;;  %730 = vadd.xlane.f32.xlu0 %v729_v49  ;;  %3392 = vpow2.f32 %v720_v46  ;;  %v709_v60 = vsub.f32 %v4138_v16, %v701_v59 }
 0x391   : > { %739 = vadd.xlane.f32.xlu1 %v738_v50  ;;  %3030 = vmatprep.subr.bf16.mxu0 %v3772_v14  ;;  %3394 = vpow2.f32 %v716_v47 }
 0x392   : > { %v4157_v51 = vpop.eup %3390  ;;  %3396 = vpow2.f32 %v722_v58  ;;  %v724_v61 = vmul.f32 1.442695, %v709_v60 }
 0x393   : > { %v732_v52 = vsel %vm677_vm3, %v4157_v51, 0.0 }
 0x394   : > { %3398 = vpow2.f32 %v724_v61 }
 0x395   : > { %733 = vadd.xlane.f32.xlu1 %v732_v52 }
 0x39a   : > { %v3393_v53 = vpop.eup %3392 }
 0x39b   : > { %v741_v54 = vsel %vm677_vm3, %v3393_v53, 0.0  ;;  %v4162_v55 = vpop.eup %3394 }
 0x39c   : > { %742 = vadd.xlane.f32.xlu0 %v741_v54  ;;  %v735_v56 = vsel %vm677_vm3, %v4162_v55, 0.0  ;;  %v4174_v62 = vpop.eup %3396 }
 0x39d   : > { %v744_v63 = vsel %vm677_vm3, %v4174_v62, 0.0 }
 0x39e   : > { %v4178_v0 = vpop.eup %3398 }
 0x39f   : > { %v747_v1 = vsel %vm677_vm3, %v4178_v0, 0.0 }
 0x3a0   : > { %736 = vadd.xlane.f32.xlu0 %v735_v56 }
 0x3a6   : > { %864 = vrot.lane.b32.xlu1 %v4101_v35, %s3775_s26 }
 0x3aa   : > { %911 = vrot.lane.b32.xlu1 %v4097_v33, %s3775_s26 }
 0x3b6   : > { %817 = vrot.lane.b32.xlu0 %v4095_v32, %s3775_s26  ;;  %s339_s26 = scalar_lea.vmem [#allocation13], %s2843_s8 }
 0x3ce   : > { %745 = vadd.xlane.f32.xlu1 %v744_v63 }
 0x3d5   : > { %748 = vadd.xlane.f32.xlu0 %v747_v1 }
 0x3df   : > { %1011 = vrot.lane.b32.xlu1 %v4095_v32, %s3776_s15 }
 0x3e3   : > { %1062 = vrot.lane.b32.xlu1 %v4101_v35, %s3776_s15 }
 0x3e7   : > { %1113 = vrot.lane.b32.xlu1 %v4097_v33, %s3776_s15 }
 0x3eb   : > { %1111 = vrot.lane.b32.xlu1 %v4097_v33, %s3777_s14  ;;  %960 = vrot.lane.b32.xlu0 %v4099_v34, %s3776_s15  ;;  %s2905_s15 = sshll.u32 %s3846_s27, 10  ;;  %s2695_s27 = scalar_lea.sflag [#allocation4], %s4063_s20 }
 0x3ef   : > { %958 = vrot.lane.b32.xlu0 %v4099_v34, %s3777_s14 }
 0x3f3   : > { %1009 = vrot.lane.b32.xlu0 %v4095_v32, %s3777_s14 }
 0x3f7   : > { %1060 = vrot.lane.b32.xlu0 %v4101_v35, %s3777_s14  ;;  %s2709_s14 = sshll.u32 %s339_s26, 4  ;;  %s4563_s14 = int_to_ptr.vmem [resolvable:$true] %s2709_s14 }
 0x419   : > { %v728_v2 = vpop.xlane.xlu1 %727 }
 0x41a   : > { %3400 = vrcp.f32 %v728_v2 }
 0x41d   : > { %v731_v3 = vpop.xlane.xlu0 %730 }
 0x41e   : > { %3402 = vrcp.f32 %v731_v3  ;;  %v740_v4 = vpop.xlane.xlu1 %739 }
 0x41f   : > { %3404 = vrcp.f32 %v740_v4 }
 0x422   : > { %v734_v6 = vpop.xlane.xlu1 %733 }
 0x424   : > { %v3401_v5 = vpop.eup %3400 }
 0x425   : > { %v758_v8 = vmul.f32 %v3401_v5, %v4147_v38 }
 0x426   : > { %v865_v12 = vpop.permute.xlu1 %864 }
 0x428   : > { %v3403_v7 = vpop.eup %3402 }
 0x429   : > { %v759_v9 = vmul.f32 %v3403_v7, %v3389_v45  ;;  %v743_v10 = vpop.xlane.xlu0 %742  ;;  %v3405_v16 = vpop.eup %3404 }
 0x42a   : > { %3406 = vrcp.f32 %v743_v10  ;;  %v762_v18 = vmul.f32 %v3405_v16, %v4151_v44  ;;  %v912_v26 = vpop.permute.xlu1 %911 }
 0x42b   : > { %v766_v11 = vpack.c.bf16 %v759_v9, %v758_v8  ;;  %3408 = vrcp.f32 %v734_v6 }
 0x42d   : > { %3021 = vmatmul.mubr.msk.bf16.vlgmr.msra.gmra.mrb[8].mxu0 %vm677_vm3, %v766_v11  ;;  %v737_v13 = vpop.xlane.xlu0 %736 }
 0x42e   : > { %3031 = vmatpush3.bf16.msra.mxu0 %v865_v12  ;;  %3032 = vmatprep.mubr.msk.bf16.mxu0 %vm3773_vm1, %v3772_v14  ;;  %3410 = vrcp.f32 %v737_v13  ;;  %v1167_v12 = vld [vmem:[#allocation11 + $0x60] sm:$0xff] }
 0x42f   : > { %3042 = vmatprep.subr.bf16.mxu0 %v3772_v14 }
 0x431   : > { %v818_v15 = vpop.permute.xlu0 %817 }
 0x432   : > { %3025 = vmatpush3.bf16.msra.mxu1 %v818_v15 }
 0x433   : > { %3036 = vmatprep.subr.bf16.mxu1 %v3772_v14 }
 0x434   : > { %v3407_v17 = vpop.eup %3406 }
 0x435   : > { %v763_v19 = vmul.f32 %v3407_v17, %v3393_v53  ;;  %v3409_v20 = vpop.eup %3408  ;;  %v1165_v17 = vld [vmem:[#allocation11 + $0x50] sm:$0xff] }
 0x436   : > { %v760_v23 = vmul.f32 %v3409_v20, %v4157_v51 }
 0x437   : > { %v768_v21 = vpack.c.bf16 %v763_v19, %v762_v18 }
 0x438   : > { %v3411_v22 = vpop.eup %3410 }
 0x439   : > { %v761_v24 = vmul.f32 %v3411_v22, %v4162_v55  ;;  %3033 = vmatmul.mubr.msk.bf16.vlgmr.msra.gmra.mrb[12].mxu0 %vm677_vm3, %v768_v21  ;;  %v1166_v22 = vld [vmem:[#allocation11 + $0x58] sm:$0xff] }
 0x43a   : > { %3044 = vmatprep.mubr.msk.bf16.mxu0 %vm3773_vm1, %v3772_v14 }
 0x43b   : > { %v767_v25 = vpack.c.bf16 %v761_v24, %v760_v23 }
 0x43d   : > { %3027 = vmatmul.mubr.msk.bf16.vlgmr.msra.gmra.mrb[16].mxu1 %vm677_vm3, %v767_v25 }
 0x43e   : > { %3037 = vmatpush3.bf16.msra.mxu1 %v912_v26  ;;  %3038 = vmatprep.mubr.msk.bf16.mxu1 %vm3773_vm1, %v3772_v14 }
 0x43f   : > { %3048 = vmatprep.subr.bf16.mxu1 %v3772_v14 }
 0x45b   : > { %v746_v27 = vpop.xlane.xlu1 %745 }
 0x45c   : > { %3412 = vrcp.f32 %v746_v27 }
 0x45f   : > { %v1012_v29 = vpop.permute.xlu1 %1011 }
 0x460   : > { %v1017_v45 = vsel %vm463_vm2, %v1012_v29, 0  ;;  %v1168_v29 = vld [vmem:[#allocation11 + $0x68] sm:$0xff] }
 0x462   : > { %v749_v28 = vpop.xlane.xlu0 %748 }
 0x463   : > { %3414 = vrcp.f32 %v749_v28  ;;  %v1063_v38 = vpop.permute.xlu1 %1062 }
 0x464   : > { %v1068_v42 = vsel %vm463_vm2, %v1063_v38, 0  ;;  %v1170_v38 = vld [vmem:[#allocation11 + $0x78] sm:$0xff] }
 0x466   : > { %v961_v30 = vpop.permute.xlu0 %960  ;;  %v3413_v37 = vpop.eup %3412 }
 0x467   : > { %v966_v31 = vsel %vm463_vm2, %v961_v30, 0  ;;  %v764_v40 = vmul.f32 %v3413_v37, %v4174_v62  ;;  %v1114_v47 = vpop.permute.xlu1 %1113  ;;  %v1163_v62 = vld [vmem:[#allocation11 + $0x40] sm:$0xff]  ;;  %v1169_v30 = vld [vmem:[#allocation11 + $0x70] sm:$0xff] }
 0x468   : > { %3043 = vmatpush3.bf16.xpose.msra.mxu0 %v966_v31  ;;  %v1119_v48 = vsel %vm463_vm2, %v1114_v47, 0 }
 0x469   : > { %3054 = vmatprep.subr.bf16.mxu0 %v3772_v14 }
 0x46a   : > { %v959_v36 = vpop.permute.xlu0 %958 }
 0x46b   : > { %v1112_v49 = vpop.permute.xlu1 %1111 }
 0x46d   : > { %v3415_v39 = vpop.eup %3414 }
 0x46e   : > { %v765_v41 = vmul.f32 %v3415_v39, %v4178_v0  ;;  %v1010_v43 = vpop.permute.xlu0 %1009  ;;  %v1164_v0 = vld [vmem:[#allocation11 + $0x48] sm:$0xff] }
 0x46f   : > { %3045 = vmatmul.mubr.msk.bf16.vlgmr.msra.gmra.mrb[16].mxu0 %vm463_vm2, %v959_v36 }
 0x470   : > { %3055 = vmatpush3.bf16.xpose.msra.mxu0 %v1068_v42  ;;  %v769_v44 = vpack.c.bf16 %v765_v41, %v764_v40  ;;  %3056 = vmatprep.mubr.msk.bf16.mxu0 %vm3773_vm1, %v3772_v14 }
 0x471   : > { %3066 = vmatprep.subr.bf16.mxu0 %v3772_v14 }
 0x472   : > { %3039 = vmatmul.mubr.msk.bf16.vlgmr.msra.gmra.mrb[20].mxu1 %vm677_vm3, %v769_v44  ;;  %v1061_v46 = vpop.permute.xlu0 %1060 }
 0x473   : > { %3049 = vmatpush3.bf16.xpose.msra.mxu1 %v1017_v45  ;;  %3050 = vmatprep.mubr.msk.bf16.mxu1 %vm3773_vm1, %v3772_v14 }
 0x474   : > { %3060 = vmatprep.subr.bf16.mxu1 %v3772_v14 }
 0x477   : > { %3057 = vmatmul.mubr.msk.bf16.vlgmr.msra.gmra.mrb[20].mxu0 %vm463_vm2, %v1061_v46 }
 0x478   : > { %3068 = vmatprep.mubr.msk.bf16.mxu0 %vm3773_vm1, %v3772_v14 }
 0x47a   : > { %3051 = vmatmul.mubr.msk.bf16.vlgmr.msra.gmra.mrb[24].mxu1 %vm463_vm2, %v1010_v43 }
 0x47b   : > { %3061 = vmatpush3.bf16.xpose.msra.mxu1 %v1119_v48  ;;  %3062 = vmatprep.mubr.msk.bf16.mxu1 %vm3773_vm1, %v3772_v14 }
 0x47c   : > { %3072 = vmatprep.subr.bf16.mxu1 %v3772_v14 }
 0x482   : > { %3063 = vmatmul.mubr.msk.bf16.vlgmr.msra.gmra.mrb[28].mxu1 %vm463_vm2, %v1112_v49 }
 0x483   : > { %3074 = vmatprep.mubr.msk.bf16.mxu1 %vm3773_vm1, %v3772_v14 }
 0x500   : > { %v4231_v50 = vpop.f32.mrb[8].mxu0 }
 0x501   : > { %v3022_v51 = vpop.f32.mrb[9].mxu0 }
 0x502   : > { %v4233_v52 = vpop.f32.mrb[10].mxu0 }
 0x503   : > { %v3023_v53 = vpop.f32.mrb[11].mxu0 }
 0x50c   : > { %v4235_v54 = vpop.f32.mrb[12].mxu0 }
 0x50d   : > { %v3034_v55 = vpop.f32.mrb[13].mxu0 }
 0x50e   : > { %v4237_v56 = vpop.f32.mrb[14].mxu0 }
 0x50f   : > { %v3035_v57 = vpop.f32.mrb[15].mxu0 }
 0x510   : > { %v4239_v58 = vpop.f32.mrb[16].mxu1 }
 0x511   : > { %v3028_v59 = vpop.f32.mrb[17].mxu1 }
 0x512   : > { %v4241_v60 = vpop.f32.mrb[18].mxu1 }
 0x513   : > { %v3029_v61 = vpop.f32.mrb[19].mxu1 }
 0x542   : > { %v1002_v63 = vpop.f32.mrb[16].mxu0 }
 0x543   : > { %v1171_v1 = vadd.f32 %v1163_v62, %v1002_v63  ;;  %v3046_v2 = vpop.f32.mrb[17].mxu0 }
 0x544   : > { %v1005_v3 = vpop.f32.mrb[18].mxu0 }
 0x545   : > { %v1172_v4 = vadd.f32 %v1164_v0, %v1005_v3  ;;  %v4243_v5 = vpop.f32.mrb[20].mxu1  ;;  %v3047_v6 = vpop.f32.mrb[19].mxu0  ;;  %v1179_v7 = vsel %vm677_vm3, %v1171_v1, -inf }
 0x546   : > { %v3040_v8 = vpop.f32.mrb[21].mxu1  ;;  %1180 = vmax.xlane.f32.xlu0 %v1179_v7 }
 0x547   : > { %v4246_v9 = vpop.f32.mrb[22].mxu1  ;;  %v1182_v10 = vsel %vm677_vm3, %v1172_v4, -inf }
 0x548   : > { %v3041_v11 = vpop.f32.mrb[23].mxu1  ;;  %1183 = vmax.xlane.f32.xlu1 %v1182_v10 }
 0x54a   : > { %v1104_v13 = vpop.f32.mrb[20].mxu0 }
 0x54b   : > { %v1175_v15 = vadd.f32 %v1167_v12, %v1104_v13  ;;  %v3058_v16 = vpop.f32.mrb[21].mxu0 }
 0x54c   : > { %v1107_v18 = vpop.f32.mrb[22].mxu0 }
 0x54d   : > { %v1053_v19 = vpop.f32.mrb[24].mxu1  ;;  %v3059_v20 = vpop.f32.mrb[23].mxu0  ;;  %v1191_v21 = vsel %vm677_vm3, %v1175_v15, -inf  ;;  %v1176_v31 = vadd.f32 %v1168_v29, %v1107_v18 }
 0x54e   : > { %v1173_v23 = vadd.f32 %v1165_v17, %v1053_v19  ;;  %v3052_v24 = vpop.f32.mrb[25].mxu1  ;;  %1192 = vmax.xlane.f32.xlu1 %v1191_v21 }
 0x54f   : > { %v1056_v25 = vpop.f32.mrb[26].mxu1  ;;  %v1194_v45 = vsel %vm677_vm3, %v1176_v31, -inf }
 0x550   : > { %v1174_v26 = vadd.f32 %v1166_v22, %v1056_v25  ;;  %v3053_v27 = vpop.f32.mrb[27].mxu1  ;;  %v1185_v28 = vsel %vm677_vm3, %v1173_v23, -inf }
 0x551   : > { %1186 = vmax.xlane.f32.xlu0 %v1185_v28 }
 0x552   : > { %v1188_v36 = vsel %vm677_vm3, %v1174_v26, -inf }
 0x555   : > { %1189 = vmax.xlane.f32.xlu0 %v1188_v36  ;;  %v1155_v37 = vpop.f32.mrb[28].mxu1 }
 0x556   : > { %v1177_v39 = vadd.f32 %v1169_v30, %v1155_v37  ;;  %v3064_v40 = vpop.f32.mrb[29].mxu1 }
 0x557   : > { %v1158_v41 = vpop.f32.mrb[30].mxu1 }
 0x558   : > { %v1178_v42 = vadd.f32 %v1170_v38, %v1158_v41  ;;  %v3065_v43 = vpop.f32.mrb[31].mxu1  ;;  %v1197_v44 = vsel %vm677_vm3, %v1177_v39, -inf }
 0x559   : > { %1198 = vmax.xlane.f32.xlu1 %v1197_v44  ;;  %1195 = vmax.xlane.f32.xlu0 %v1194_v45 }
 0x55a   : > { %v1200_v46 = vsel %vm677_vm3, %v1178_v42, -inf }
 0x55d   : > { %1201 = vmax.xlane.f32.xlu0 %v1200_v46 }
 0x56a   : > { %1271 = vrot.lane.b32.xlu1 %v4099_v34, %s3778_s11 }
 0x56e   : > { %1365 = vrot.lane.b32.xlu1 %v4101_v35, %s3778_s11 }
 0x572   : > { %1412 = vrot.lane.b32.xlu1 %v4097_v33, %s3778_s11 }
 0x573   : > { %1318 = vrot.lane.b32.xlu0 %v4095_v32, %s3778_s11 }
 0x5d3   : > { %v1181_v47 = vpop.xlane.xlu0 %1180 }
 0x5d4   : > { %v1203_v48 = vsub.f32 %v1171_v1, %v1181_v47 }
 0x5d5   : > { %v1184_v49 = vpop.xlane.xlu1 %1183 }
 0x5d6   : > { %v1211_v51 = vmul.f32 1.442695, %v1203_v48  ;;  %v1204_v53 = vsub.f32 %v1172_v4, %v1184_v49 }
 0x5d8   : > { %3416 = vpow2.f32 %v1211_v51  ;;  %v1213_v55 = vmul.f32 1.442695, %v1204_v53 }
 0x5da   : > { %3418 = vpow2.f32 %v1213_v55 }
 0x5db   : > { %v1193_v57 = vpop.xlane.xlu1 %1192 }
 0x5dc   : > { %v1207_v59 = vsub.f32 %v1175_v15, %v1193_v57 }
 0x5de   : > { %v1187_v61 = vpop.xlane.xlu0 %1186  ;;  %v1219_v63 = vmul.f32 1.442695, %v1207_v59 }
 0x5df   : > { %v1205_v62 = vsub.f32 %v1173_v23, %v1187_v61 }
 0x5e1   : > { %v1215_v0 = vmul.f32 1.442695, %v1205_v62 }
 0x5e2   : > { %v4259_v2 = vpop.eup %3416  ;;  %v1190_v3 = vpop.xlane.xlu0 %1189 }
 0x5e3   : > { %3420 = vpow2.f32 %v1215_v0  ;;  %v1206_v6 = vsub.f32 %v1174_v26, %v1190_v3  ;;  %v1227_v1 = vsel %vm677_vm3, %v4259_v2, 0.0 }
 0x5e4   : > { %v4263_v7 = vpop.eup %3418  ;;  %1228 = vadd.xlane.f32.xlu1 %v1227_v1  ;;  %3422 = vpow2.f32 %v1219_v63 }
 0x5e5   : > { %v1217_v4 = vmul.f32 1.442695, %v1206_v6  ;;  %v1230_v8 = vsel %vm677_vm3, %v4263_v7, 0.0 }
 0x5e6   : > { %v1199_v10 = vpop.xlane.xlu1 %1198  ;;  %1231 = vadd.xlane.f32.xlu0 %v1230_v8  ;;  %v1196_v11 = vpop.xlane.xlu0 %1195 }
 0x5e7   : > { %3424 = vpow2.f32 %v1217_v4  ;;  %v1209_v12 = vsub.f32 %v1177_v39, %v1199_v10  ;;  %v1208_v13 = vsub.f32 %v1176_v31, %v1196_v11 }
 0x5e9   : > { %v1223_v15 = vmul.f32 1.442695, %v1209_v12  ;;  %v1221_v16 = vmul.f32 1.442695, %v1208_v13 }
 0x5ea   : > { %v1272_v17 = vpop.permute.xlu1 %1271  ;;  %v1202_v18 = vpop.xlane.xlu0 %1201 }
 0x5eb   : > { %3426 = vpow2.f32 %v1223_v15  ;;  %v1210_v19 = vsub.f32 %v1178_v42, %v1202_v18  ;;  %3067 = vmatpush3.bf16.msra.mxu0 %v1272_v17 }
 0x5ec   : > { %3428 = vpow2.f32 %v1221_v16  ;;  %3078 = vmatprep.subr.bf16.mxu0 %v3772_v14 }
 0x5ed   : > { %v3421_v20 = vpop.eup %3420  ;;  %v1225_v21 = vmul.f32 1.442695, %v1210_v19 }
 0x5ee   : > { %v1319_v22 = vpop.permute.xlu0 %1318  ;;  %v1233_v23 = vsel %vm677_vm3, %v3421_v20, 0.0  ;;  %v4269_v24 = vpop.eup %3422 }
 0x5ef   : > { %3430 = vpow2.f32 %v1225_v21  ;;  %1234 = vadd.xlane.f32.xlu1 %v1233_v23  ;;  %3073 = vmatpush3.bf16.msra.mxu1 %v1319_v22  ;;  %v1239_v26 = vsel %vm677_vm3, %v4269_v24, 0.0  ;;  %v1366_v38 = vpop.permute.xlu1 %1365 }
 0x5f0   : > { %3084 = vmatprep.subr.bf16.mxu1 %v3772_v14 }
 0x5f1   : > { %v3425_v25 = vpop.eup %3424 }
 0x5f2   : > { %v1236_v27 = vsel %vm677_vm3, %v3425_v25, 0.0 }
 0x5f3   : > { %1240 = vadd.xlane.f32.xlu1 %v1239_v26  ;;  %1237 = vadd.xlane.f32.xlu0 %v1236_v27  ;;  %v1413_v39 = vpop.permute.xlu1 %1412 }
 0x5f5   : > { %v4275_v28 = vpop.eup %3426 }
 0x5f6   : > { %v3429_v29 = vpop.eup %3428  ;;  %v1245_v30 = vsel %vm677_vm3, %v4275_v28, 0.0 }
 0x5f7   : > { %1246 = vadd.xlane.f32.xlu1 %v1245_v30  ;;  %v1242_v31 = vsel %vm677_vm3, %v3429_v29, 0.0 }
 0x5f8   : > { %1243 = vadd.xlane.f32.xlu0 %v1242_v31 }
 0x5f9   : > { %v3431_v36 = vpop.eup %3430 }
 0x5fa   : > { %v1248_v37 = vsel %vm677_vm3, %v3431_v36, 0.0 }
 0x5fc   : > { %1249 = vadd.xlane.f32.xlu0 %v1248_v37 }
 0x608   : > { %1512 = vrot.lane.b32.xlu1 %v4095_v32, %s3779_s13 }
 0x60c   : > { %1563 = vrot.lane.b32.xlu1 %v4101_v35, %s3779_s13 }
 0x610   : > { %1614 = vrot.lane.b32.xlu1 %v4097_v33, %s3779_s13 }
 0x612   : > { %1461 = vrot.lane.b32.xlu0 %v4099_v34, %s3779_s13  ;;  %s4560_s13 = scalar_lea.hbm %s4616_s6, %s2905_s15 }
 0x614   : > { %1612 = vrot.lane.b32.xlu1 %v4097_v33, %s3780_s19 }
 0x616   : > { %1459 = vrot.lane.b32.xlu0 %v4099_v34, %s3780_s19 }
 0x61a   : > { %1510 = vrot.lane.b32.xlu0 %v4095_v32, %s3780_s19 }
 0x61e   : > { %1561 = vrot.lane.b32.xlu0 %v4101_v35, %s3780_s19  ;;  %s3682_s19 = scalar_lea.vmem %s4563_s14, 1024 }
 0x61f   : > { %p3683_p7 = scmp.ne.s32.totalorder %s4563_s14, %s3682_s19 }
 0x621   : > { %p3684_p12 = pnand %p3683_p7, %p4635_p4 }
 0x623   : > { %p3685_p13 = pneg %p3684_p12 }
 0x671   : > { %v1229_v40 = vpop.xlane.xlu1 %1228 }
 0x672   : > { %3432 = vrcp.f32 %v1229_v40 }
 0x673   : > { %v1232_v41 = vpop.xlane.xlu0 %1231 }
 0x674   : > { %3434 = vrcp.f32 %v1232_v41 }
 0x67c   : > { %v3433_v42 = vpop.eup %3432  ;;  %v1235_v43 = vpop.xlane.xlu1 %1234 }
 0x67d   : > { %v1259_v45 = vmul.f32 %v3433_v42, %v4259_v2  ;;  %3436 = vrcp.f32 %v1235_v43 }
 0x67e   : > { %v3435_v44 = vpop.eup %3434 }
 0x67f   : > { %v1260_v46 = vmul.f32 %v3435_v44, %v4263_v7 }
 0x680   : > { %v1241_v47 = vpop.xlane.xlu1 %1240  ;;  %v1238_v48 = vpop.xlane.xlu0 %1237 }
 0x681   : > { %v1267_v49 = vpack.c.bf16 %v1260_v46, %v1259_v45  ;;  %3438 = vrcp.f32 %v1238_v48 }
 0x682   : > { %3440 = vrcp.f32 %v1241_v47  ;;  %v1664_v47 = vld [vmem:[#allocation11 + $0x80] sm:$0xff] }
 0x683   : > { %3069 = vmatmul.mubr.msk.bf16.vlgmr.msra.gmra.mrb[24].mxu0 %vm677_vm3, %v1267_v49 }
 0x684   : > { %3079 = vmatpush3.bf16.msra.mxu0 %v1366_v38  ;;  %3080 = vmatprep.mubr.msk.bf16.mxu0 %vm3773_vm1, %v3772_v14  ;;  %v1247_v51 = vpop.xlane.xlu1 %1246 }
 0x685   : > { %v1244_v53 = vpop.xlane.xlu0 %1243  ;;  %3090 = vmatprep.subr.bf16.mxu0 %v3772_v14 }
 0x686   : > { %3442 = vrcp.f32 %v1244_v53  ;;  %v1665_v53 = vld [vmem:[#allocation11 + $0x88] sm:$0xff] }
 0x687   : > { %3444 = vrcp.f32 %v1247_v51  ;;  %v3437_v57 = vpop.eup %3436 }
 0x688   : > { %v1261_v61 = vmul.f32 %v3437_v57, %v3421_v20  ;;  %v1513_v4 = vpop.permute.xlu1 %1512 }
 0x689   : > { %v1250_v55 = vpop.xlane.xlu0 %1249  ;;  %v1518_v18 = vsel %vm463_vm2, %v1513_v4, 0  ;;  %v1668_v4 = vld [vmem:[#allocation11 + $0xa0] sm:$0xff] }
 0x68a   : > { %3446 = vrcp.f32 %v1250_v55 }
 0x68b   : > { %v3439_v59 = vpop.eup %3438 }
 0x68c   : > { %v1262_v62 = vmul.f32 %v3439_v59, %v3425_v25  ;;  %v3441_v63 = vpop.eup %3440  ;;  %v1564_v17 = vpop.permute.xlu1 %1563 }
 0x68d   : > { %v1263_v3 = vmul.f32 %v3441_v63, %v4269_v24  ;;  %v1462_v7 = vpop.permute.xlu0 %1461  ;;  %v1569_v19 = vsel %vm463_vm2, %v1564_v17, 0  ;;  %v1669_v17 = vld [vmem:[#allocation11 + $0xa8] sm:$0xff] }
 0x68e   : > { %v1268_v0 = vpack.c.bf16 %v1262_v62, %v1261_v61  ;;  %v1467_v13 = vsel %vm463_vm2, %v1462_v7, 0 }
 0x690   : > { %v3443_v2 = vpop.eup %3442  ;;  %3075 = vmatmul.mubr.msk.bf16.vlgmr.msra.gmra.mrb[32].mxu1 %vm677_vm3, %v1268_v0  ;;  %v1615_v21 = vpop.permute.xlu1 %1614  ;;  %v1666_v0 = vld [vmem:[#allocation11 + $0x90] sm:$0xff] }
 0x691   : > { %v1264_v6 = vmul.f32 %v3443_v2, %v3429_v29  ;;  %v3445_v1 = vpop.eup %3444  ;;  %3085 = vmatpush3.bf16.msra.mxu1 %v1413_v39  ;;  %3086 = vmatprep.mubr.msk.bf16.mxu1 %vm3773_vm1, %v3772_v14  ;;  %v1460_v16 = vpop.permute.xlu0 %1459  ;;  %v1620_v22 = vsel %vm463_vm2, %v1615_v21, 0 }
 0x692   : > { %3096 = vmatprep.subr.bf16.mxu1 %v3772_v14  ;;  %v1265_v11 = vmul.f32 %v3445_v1, %v4275_v28 }
 0x693   : > { %v1269_v8 = vpack.c.bf16 %v1264_v6, %v1263_v3  ;;  %v1667_v6 = vld [vmem:[#allocation11 + $0x98] sm:$0xff] }
 0x694   : > { %v3447_v10 = vpop.eup %3446  ;;  %v1613_v24 = vpop.permute.xlu1 %1612 }
 0x695   : > { %v1266_v12 = vmul.f32 %v3447_v10, %v3431_v36  ;;  %3081 = vmatmul.mubr.msk.bf16.vlgmr.msra.gmra.mrb[28].mxu0 %vm677_vm3, %v1269_v8  ;;  %v1511_v20 = vpop.permute.xlu0 %1510 }
 0x696   : > { %3091 = vmatpush3.bf16.xpose.msra.mxu0 %v1467_v13  ;;  %3092 = vmatprep.mubr.msk.bf16.mxu0 %vm3773_vm1, %v3772_v14 }
 0x697   : > { %v1270_v15 = vpack.c.bf16 %v1266_v12, %v1265_v11  ;;  %3102 = vmatprep.subr.bf16.mxu0 %v3772_v14 }
 0x699   : > { %3087 = vmatmul.mubr.msk.bf16.vlgmr.msra.gmra.mrb[36].mxu1 %vm677_vm3, %v1270_v15  ;;  %v1562_v23 = vpop.permute.xlu0 %1561 }
 0x69a   : > { %3098 = vmatprep.mubr.msk.bf16.mxu1 %vm3773_vm1, %v3772_v14  ;;  %3097 = vmatpush3.bf16.xpose.msra.mxu1 %v1518_v18 }
 0x69b   : > { %3108 = vmatprep.subr.bf16.mxu1 %v3772_v14 }
 0x69d   : > { %3093 = vmatmul.mubr.msk.bf16.vlgmr.msra.gmra.mrb[32].mxu0 %vm463_vm2, %v1460_v16 }
 0x69e   : > { %3103 = vmatpush3.bf16.xpose.msra.mxu0 %v1569_v19  ;;  %3104 = vmatprep.mubr.msk.bf16.mxu0 %vm3773_vm1, %v3772_v14 }
 0x69f   : > { %3114 = vmatprep.subr.bf16.mxu0 %v3772_v14 }
 0x6a1   : > { %3099 = vmatmul.mubr.msk.bf16.vlgmr.msra.gmra.mrb[40].mxu1 %vm463_vm2, %v1511_v20  ;;  %v1670_v20 = vld [vmem:[#allocation11 + $0xb0] sm:$0xff] }
 0x6a2   : > { %3109 = vmatpush3.bf16.xpose.msra.mxu1 %v1620_v22  ;;  %3110 = vmatprep.mubr.msk.bf16.mxu1 %vm3773_vm1, %v3772_v14 }
 0x6a3   : > { %3120 = vmatprep.subr.bf16.mxu1 %v3772_v14 }
 0x6a5   : > { %3105 = vmatmul.mubr.msk.bf16.vlgmr.msra.gmra.mrb[36].mxu0 %vm463_vm2, %v1562_v23 }
 0x6a6   : > { %3116 = vmatprep.mubr.msk.bf16.mxu0 %vm3773_vm1, %v3772_v14 }
 0x6a9   : > { %3111 = vmatmul.mubr.msk.bf16.vlgmr.msra.gmra.mrb[44].mxu1 %vm463_vm2, %v1613_v24 }
 0x6aa   : > { %3122 = vmatprep.mubr.msk.bf16.mxu1 %vm3773_vm1, %v3772_v14 }
 0x756   : > { %v4327_v25 = vpop.f32.mrb[24].mxu0 }
 0x757   : > { %v3070_v26 = vpop.f32.mrb[25].mxu0 }
 0x758   : > { %v4329_v27 = vpop.f32.mrb[26].mxu0  ;;  %v1671_v26 = vld [vmem:[#allocation11 + $0xb8] sm:$0xff] }
 0x759   : > { %v3320_v28 = vpack.i.bf16 %v4329_v27, %v4327_v25  ;;  %v3071_v29 = vpop.f32.mrb[27].mxu0 }
 0x763   : > { %v4333_v30 = vpop.f32.mrb[32].mxu1 }
 0x764   : > { %v3076_v31 = vpop.f32.mrb[33].mxu1 }
 0x765   : > { %v4335_v36 = vpop.f32.mrb[34].mxu1 }
 0x766   : > { %v3325_v37 = vpack.i.bf16 %v4335_v36, %v4333_v30  ;;  %v3077_v38 = vpop.f32.mrb[35].mxu1 }
 0x768   : > { %v4339_v39 = vpop.f32.mrb[28].mxu0 }
 0x769   : > { %v3082_v40 = vpop.f32.mrb[29].mxu0 }
 0x76a   : > { %v4341_v41 = vpop.f32.mrb[30].mxu0 }
 0x76b   : > { %v3340_v42 = vpack.i.bf16 %v4341_v41, %v4339_v39  ;;  %v3083_v43 = vpop.f32.mrb[31].mxu0 }
 0x76c   : > { %v4345_v44 = vpop.f32.mrb[36].mxu1 }
 0x76d   : > { %v3088_v45 = vpop.f32.mrb[37].mxu1 }
 0x76e   : > { %v4347_v46 = vpop.f32.mrb[38].mxu1 }
 0x76f   : > { %v3345_v48 = vpack.i.bf16 %v4347_v46, %v4345_v44  ;;  %v3089_v49 = vpop.f32.mrb[39].mxu1 }
 0x770   : > { %v1503_v51 = vpop.f32.mrb[32].mxu0 }
 0x771   : > { %v1672_v55 = vadd.f32 %v1664_v47, %v1503_v51  ;;  %v3094_v57 = vpop.f32.mrb[33].mxu0 }
 0x772   : > { %v1506_v59 = vpop.f32.mrb[34].mxu0 }
 0x773   : > { %v1673_v61 = vadd.f32 %v1665_v53, %v1506_v59  ;;  %v3095_v62 = vpop.f32.mrb[35].mxu0  ;;  %v1680_v63 = vsel %vm677_vm3, %v1672_v55, -inf }
 0x774   : > { %1681 = vmax.xlane.f32.xlu0 %v1680_v63  ;;  %v1554_v2 = vpop.f32.mrb[40].mxu1 }
 0x775   : > { %v1683_v3 = vsel %vm677_vm3, %v1673_v61, -inf  ;;  %v1674_v1 = vadd.f32 %v1666_v0, %v1554_v2  ;;  %v3100_v7 = vpop.f32.mrb[41].mxu1 }
 0x776   : > { %1684 = vmax.xlane.f32.xlu1 %v1683_v3  ;;  %v1557_v8 = vpop.f32.mrb[42].mxu1 }
 0x777   : > { %v1675_v10 = vadd.f32 %v1667_v6, %v1557_v8  ;;  %v3101_v11 = vpop.f32.mrb[43].mxu1  ;;  %v1686_v12 = vsel %vm677_vm3, %v1674_v1, -inf }
 0x778   : > { %v1605_v13 = vpop.f32.mrb[36].mxu0  ;;  %1687 = vmax.xlane.f32.xlu0 %v1686_v12 }
 0x779   : > { %v1676_v15 = vadd.f32 %v1668_v4, %v1605_v13  ;;  %v3106_v16 = vpop.f32.mrb[37].mxu0  ;;  %v1689_v23 = vsel %vm677_vm3, %v1675_v10, -inf }
 0x77a   : > { %v1608_v18 = vpop.f32.mrb[38].mxu0 }
 0x77b   : > { %v3107_v19 = vpop.f32.mrb[39].mxu0  ;;  %v1692_v21 = vsel %vm677_vm3, %v1676_v15, -inf  ;;  %v1677_v22 = vadd.f32 %v1669_v17, %v1608_v18 }
 0x77c   : > { %1693 = vmax.xlane.f32.xlu1 %v1692_v21  ;;  %1690 = vmax.xlane.f32.xlu0 %v1689_v23  ;;  %v1656_v24 = vpop.f32.mrb[44].mxu1 }
 0x77d   : > { %v1678_v29 = vadd.f32 %v1670_v20, %v1656_v24  ;;  %v3112_v31 = vpop.f32.mrb[45].mxu1  ;;  %v1695_v47 = vsel %vm677_vm3, %v1677_v22, -inf }
 0x77e   : > { %v1659_v38 = vpop.f32.mrb[46].mxu1 }
 0x77f   : > { %v1679_v40 = vadd.f32 %v1671_v26, %v1659_v38  ;;  %v3113_v43 = vpop.f32.mrb[47].mxu1  ;;  %v1698_v45 = vsel %vm677_vm3, %v1678_v29, -inf }
 0x780   : > { %1699 = vmax.xlane.f32.xlu1 %v1698_v45  ;;  %1696 = vmax.xlane.f32.xlu0 %v1695_v47 }
 0x781   : > { %v1701_v49 = vsel %vm677_vm3, %v1679_v40, -inf }
 0x784   : > { %1702 = vmax.xlane.f32.xlu0 %v1701_v49 }
 0x791   : > { %1772 = vrot.lane.b32.xlu1 %v4099_v34, %s3781_s16 }
 0x795   : > { %1866 = vrot.lane.b32.xlu1 %v4101_v35, %s3781_s16 }
 0x799   : > { %1913 = vrot.lane.b32.xlu1 %v4097_v33, %s3781_s16 }
 0x79a   : > { %1819 = vrot.lane.b32.xlu0 %v4095_v32, %s3781_s16  ;;  %s3788_s16 = smov [#allocation13]  }
 0x801   : > { %v1682_v51 = vpop.xlane.xlu0 %1681 }
 0x802   : > { %v1704_v53 = vsub.f32 %v1672_v55, %v1682_v51 }
 0x803   : > { %v1685_v57 = vpop.xlane.xlu1 %1684 }
 0x804   : > { %v1712_v59 = vmul.f32 1.442695, %v1704_v53  ;;  %v1705_v62 = vsub.f32 %v1673_v61, %v1685_v57 }
 0x805   : > { %v1688_v0 = vpop.xlane.xlu0 %1687 }
 0x806   : > { %3448 = vpow2.f32 %v1712_v59  ;;  %v1714_v63 = vmul.f32 1.442695, %v1705_v62  ;;  %v1706_v2 = vsub.f32 %v1674_v1, %v1688_v0 }
 0x808   : > { %3450 = vpow2.f32 %v1714_v63  ;;  %v1716_v3 = vmul.f32 1.442695, %v1706_v2 }
 0x809   : > { %v1694_v6 = vpop.xlane.xlu1 %1693  ;;  %v1691_v4 = vpop.xlane.xlu0 %1690 }
 0x80a   : > { %v1708_v7 = vsub.f32 %v1676_v15, %v1694_v6  ;;  %3452 = vpow2.f32 %v1716_v3  ;;  %v1707_v8 = vsub.f32 %v1675_v10, %v1691_v4 }
 0x80c   : > { %v1720_v11 = vmul.f32 1.442695, %v1708_v7  ;;  %v1718_v12 = vmul.f32 1.442695, %v1707_v8 }
 0x80d   : > { %v1700_v13 = vpop.xlane.xlu1 %1699  ;;  %v1697_v16 = vpop.xlane.xlu0 %1696 }
 0x80e   : > { %3454 = vpow2.f32 %v1720_v11  ;;  %v1710_v55 = vsub.f32 %v1678_v29, %v1700_v13  ;;  %v1709_v17 = vsub.f32 %v1677_v22, %v1697_v16 }
 0x80f   : > { %3456 = vpow2.f32 %v1718_v12 }
 0x810   : > { %v3449_v61 = vpop.eup %3448  ;;  %v1724_v18 = vmul.f32 1.442695, %v1710_v55  ;;  %v1722_v19 = vmul.f32 1.442695, %v1709_v17 }
 0x811   : > { %v1728_v1 = vsel %vm677_vm3, %v3449_v61, 0.0  ;;  %v1773_v21 = vpop.permute.xlu1 %1772  ;;  %v1703_v23 = vpop.xlane.xlu0 %1702 }
 0x812   : > { %v3451_v20 = vpop.eup %3450  ;;  %1729 = vadd.xlane.f32.xlu1 %v1728_v1  ;;  %3458 = vpow2.f32 %v1724_v18  ;;  %v1711_v15 = vsub.f32 %v1679_v40, %v1703_v23  ;;  %3115 = vmatpush3.bf16.msra.mxu0 %v1773_v21 }
 0x813   : > { %v1731_v10 = vsel %vm677_vm3, %v3451_v20, 0.0  ;;  %3460 = vpow2.f32 %v1722_v19  ;;  %3126 = vmatprep.subr.bf16.mxu0 %v3772_v14 }
 0x814   : > { %1732 = vadd.xlane.f32.xlu0 %v1731_v10  ;;  %v3453_v24 = vpop.eup %3452  ;;  %v1726_v22 = vmul.f32 1.442695, %v1711_v15 }
 0x815   : > { %v1820_v26 = vpop.permute.xlu0 %1819  ;;  %v1734_v29 = vsel %vm677_vm3, %v3453_v24, 0.0  ;;  %v1867_v59 = vpop.permute.xlu1 %1866 }
 0x816   : > { %3462 = vpow2.f32 %v1726_v22  ;;  %1735 = vadd.xlane.f32.xlu1 %v1734_v29  ;;  %3121 = vmatpush3.bf16.msra.mxu1 %v1820_v26 }
 0x817   : > { %3132 = vmatprep.subr.bf16.mxu1 %v3772_v14 }
 0x818   : > { %v3455_v31 = vpop.eup %3454 }
 0x819   : > { %v3457_v38 = vpop.eup %3456  ;;  %v1740_v40 = vsel %vm677_vm3, %v3455_v31, 0.0  ;;  %v1914_v62 = vpop.permute.xlu1 %1913 }
 0x81a   : > { %v1737_v43 = vsel %vm677_vm3, %v3457_v38, 0.0  ;;  %1741 = vadd.xlane.f32.xlu1 %v1740_v40 }
 0x81b   : > { %1738 = vadd.xlane.f32.xlu0 %v1737_v43 }
 0x81c   : > { %v4370_v45 = vpop.eup %3458 }
 0x81d   : > { %v3461_v47 = vpop.eup %3460  ;;  %v1746_v49 = vsel %vm677_vm3, %v4370_v45, 0.0 }
 0x81e   : > { %1747 = vadd.xlane.f32.xlu1 %v1746_v49  ;;  %v1743_v51 = vsel %vm677_vm3, %v3461_v47, 0.0 }
 0x81f   : > { %1744 = vadd.xlane.f32.xlu0 %v1743_v51 }
 0x820   : > { %v3463_v53 = vpop.eup %3462 }
 0x821   : > { %v1749_v57 = vsel %vm677_vm3, %v3463_v53, 0.0 }
 0x823   : > { %1750 = vadd.xlane.f32.xlu0 %v1749_v57 }
 0x82f   : > { %2013 = vrot.lane.b32.xlu1 %v4095_v32, %s3782_s25 }
 0x833   : > { %2064 = vrot.lane.b32.xlu1 %v4101_v35, %s3782_s25 }
 0x837   : > { %2115 = vrot.lane.b32.xlu1 %v4097_v33, %s3782_s25 }
 0x839   : > { %1962 = vrot.lane.b32.xlu0 %v4099_v34, %s3782_s25  ;;  %s3686_s25 = sshll.u32 %s3788_s16, 4  ;;  %s3687_s25 = int_to_ptr.vmem [resolvable:$false] %s3686_s25 }
 0x83a   : > { %p3689_p1 = scmp.lt.s32.totalorder %s4563_s14, %s3687_s25 }
 0x83b   : > { %2113 = vrot.lane.b32.xlu1 %v4097_v33, %s3783_s29 }
 0x83d   : > { %1960 = vrot.lane.b32.xlu0 %v4099_v34, %s3783_s29 }
 0x841   : > { %2011 = vrot.lane.b32.xlu0 %v4095_v32, %s3783_s29 }
 0x845   : > { %2062 = vrot.lane.b32.xlu0 %v4101_v35, %s3783_s29  ;;  %s3688_s29 = scalar_lea.vmem %s3687_s25, 2048 }
 0x846   : > { %p3690_p3 = scmp.lt.s32.totalorder %s3688_s29, %s3682_s19 }
 0x848   : > { %p3691_p2 = por %p3690_p3, %p3689_p1 }
 0x84a   : > { %p3692_p8 = pnand %p3691_p2, %p3685_p13 }
 0x89f   : > { %v1730_v63 = vpop.xlane.xlu1 %1729 }
 0x8a0   : > { %3464 = vrcp.f32 %v1730_v63 }
 0x8a1   : > { %v1733_v0 = vpop.xlane.xlu0 %1732 }
 0x8a2   : > { %3466 = vrcp.f32 %v1733_v0 }
 0x8a3   : > { %v1736_v2 = vpop.xlane.xlu1 %1735 }
 0x8a4   : > { %3468 = vrcp.f32 %v1736_v2 }
 0x8a7   : > { %v1742_v3 = vpop.xlane.xlu1 %1741 }
 0x8a8   : > { %v1739_v6 = vpop.xlane.xlu0 %1738 }
 0x8a9   : > { %3470 = vrcp.f32 %v1739_v6 }
 0x8aa   : > { %v3465_v7 = vpop.eup %3464  ;;  %3472 = vrcp.f32 %v1742_v3 }
 0x8ab   : > { %v1760_v8 = vmul.f32 %v3465_v7, %v3449_v61  ;;  %v1748_v12 = vpop.xlane.xlu1 %1747 }
 0x8ac   : > { %v3467_v4 = vpop.eup %3466  ;;  %v1745_v13 = vpop.xlane.xlu0 %1744 }
 0x8ad   : > { %v1761_v11 = vmul.f32 %v3467_v4, %v3451_v20  ;;  %3474 = vrcp.f32 %v1745_v13 }
 0x8ae   : > { %3476 = vrcp.f32 %v1748_v12  ;;  %v3469_v17 = vpop.eup %3468 }
 0x8af   : > { %v1768_v16 = vpack.c.bf16 %v1761_v11, %v1760_v8  ;;  %v1762_v19 = vmul.f32 %v3469_v17, %v3453_v24  ;;  %v2014_v26 = vpop.permute.xlu1 %2013 }
 0x8b0   : > { %v1751_v55 = vpop.xlane.xlu0 %1750  ;;  %v2019_v51 = vsel %vm463_vm2, %v2014_v26, 0 }
 0x8b1   : > { %3117 = vmatmul.mubr.msk.bf16.vlgmr.msra.gmra.mrb[40].mxu0 %vm677_vm3, %v1768_v16  ;;  %3478 = vrcp.f32 %v1751_v55 }
 0x8b2   : > { %3127 = vmatpush3.bf16.msra.mxu0 %v1867_v59  ;;  %3128 = vmatprep.mubr.msk.bf16.mxu0 %vm3773_vm1, %v3772_v14 }
 0x8b3   : > { %3138 = vmatprep.subr.bf16.mxu0 %v3772_v14  ;;  %v3471_v18 = vpop.eup %3470  ;;  %v2065_v49 = vpop.permute.xlu1 %2064 }
 0x8b4   : > { %v1763_v61 = vmul.f32 %v3471_v18, %v3457_v38  ;;  %v3473_v1 = vpop.eup %3472  ;;  %v1963_v22 = vpop.permute.xlu0 %1962 }
 0x8b5   : > { %v1764_v23 = vmul.f32 %v3473_v1, %v3455_v31  ;;  %v1968_v43 = vsel %vm463_vm2, %v1963_v22, 0  ;;  %v2166_v22 = vld [vmem:[#allocation11 + $0xc8] sm:$0xff] }
 0x8b6   : > { %v1769_v20 = vpack.c.bf16 %v1763_v61, %v1762_v19 }
 0x8b7   : > { %v3475_v21 = vpop.eup %3474  ;;  %v2116_v57 = vpop.permute.xlu1 %2115 }
 0x8b8   : > { %v1765_v15 = vmul.f32 %v3475_v21, %v3461_v47  ;;  %3123 = vmatmul.mubr.msk.bf16.vlgmr.msra.gmra.mrb[48].mxu1 %vm677_vm3, %v1769_v20  ;;  %v3477_v10 = vpop.eup %3476  ;;  %v1961_v47 = vpop.permute.xlu0 %1960  ;;  %v2121_v59 = vsel %vm463_vm2, %v2116_v57, 0  ;;  %v2165_v21 = vld [vmem:[#allocation11 + $0xc0] sm:$0xff] }
 0x8b9   : > { %3133 = vmatpush3.bf16.msra.mxu1 %v1914_v62  ;;  %3134 = vmatprep.mubr.msk.bf16.mxu1 %vm3773_vm1, %v3772_v14  ;;  %v1766_v24 = vmul.f32 %v3477_v10, %v4370_v45  ;;  %v2070_v45 = vsel %vm463_vm2, %v2065_v49, 0  ;;  %v2169_v57 = vld [vmem:[#allocation11 + $0xe0] sm:$0xff] }
 0x8ba   : > { %v1770_v29 = vpack.c.bf16 %v1765_v15, %v1764_v23  ;;  %3144 = vmatprep.subr.bf16.mxu1 %v3772_v14 }
 0x8bb   : > { %v3479_v40 = vpop.eup %3478  ;;  %v2114_v63 = vpop.permute.xlu1 %2113 }
 0x8bc   : > { %v1767_v38 = vmul.f32 %v3479_v40, %v3463_v53  ;;  %3129 = vmatmul.mubr.msk.bf16.vlgmr.msra.gmra.mrb[44].mxu0 %vm677_vm3, %v1770_v29  ;;  %v2012_v53 = vpop.permute.xlu0 %2011 }
 0x8bd   : > { %3139 = vmatpush3.bf16.xpose.msra.mxu0 %v1968_v43  ;;  %3140 = vmatprep.mubr.msk.bf16.mxu0 %vm3773_vm1, %v3772_v14 }
 0x8be   : > { %v1771_v31 = vpack.c.bf16 %v1767_v38, %v1766_v24  ;;  %3150 = vmatprep.subr.bf16.mxu0 %v3772_v14 }
 0x8c0   : > { %3135 = vmatmul.mubr.msk.bf16.vlgmr.msra.gmra.mrb[52].mxu1 %vm677_vm3, %v1771_v31  ;;  %v2063_v62 = vpop.permute.xlu0 %2062  ;;  %v2167_v31 = vld [vmem:[#allocation11 + $0xd0] sm:$0xff] }
 0x8c1   : > { %3146 = vmatprep.mubr.msk.bf16.mxu1 %vm3773_vm1, %v3772_v14 }
 0x8c2   : > { %3145 = vmatpush3.bf16.xpose.msra.mxu1 %v2019_v51  ;;  %v2168_v51 = vld [vmem:[#allocation11 + $0xd8] sm:$0xff] }
 0x8c3   : > { %3156 = vmatprep.subr.bf16.mxu1 %v3772_v14 }
 0x8c4   : > { %3141 = vmatmul.mubr.msk.bf16.vlgmr.msra.gmra.mrb[48].mxu0 %vm463_vm2, %v1961_v47 }
 0x8c5   : > { %3151 = vmatpush3.bf16.xpose.msra.mxu0 %v2070_v45  ;;  %3152 = vmatprep.mubr.msk.bf16.mxu0 %vm3773_vm1, %v3772_v14 }
 0x8c6   : > { %3162 = vmatprep.subr.bf16.mxu0 %v3772_v14 }
 0x8c9   : > { %3147 = vmatmul.mubr.msk.bf16.vlgmr.msra.gmra.mrb[56].mxu1 %vm463_vm2, %v2012_v53 }
 0x8ca   : > { %3157 = vmatpush3.bf16.xpose.msra.mxu1 %v2121_v59  ;;  %3158 = vmatprep.mubr.msk.bf16.mxu1 %vm3773_vm1, %v3772_v14 }
 0x8cb   : > { %3168 = vmatprep.subr.bf16.mxu1 %v3772_v14 }
 0x8cc   : > { %3153 = vmatmul.mubr.msk.bf16.vlgmr.msra.gmra.mrb[52].mxu0 %vm463_vm2, %v2063_v62 }
 0x8cd   : > { %3164 = vmatprep.mubr.msk.bf16.mxu0 %vm3773_vm1, %v3772_v14 }
 0x8d1   : > { %3159 = vmatmul.mubr.msk.bf16.vlgmr.msra.gmra.mrb[60].mxu1 %vm463_vm2, %v2114_v63 }
 0x8d2   : > { %3170 = vmatprep.mubr.msk.bf16.mxu1 %vm3773_vm1, %v3772_v14 }
 0x984   : > { %v4419_v0 = vpop.f32.mrb[40].mxu0 }
 0x985   : > { %v3118_v2 = vpop.f32.mrb[41].mxu0 }
 0x986   : > { %v4421_v3 = vpop.f32.mrb[42].mxu0 }
 0x987   : > { %v3330_v6 = vpack.i.bf16 %v4421_v3, %v4419_v0  ;;  %v3119_v7 = vpop.f32.mrb[43].mxu0 }
 0x98b   : > { %v4425_v4 = vpop.f32.mrb[48].mxu1 }
 0x98c   : > { %v3124_v8 = vpop.f32.mrb[49].mxu1 }
 0x98d   : > { %v4427_v11 = vpop.f32.mrb[50].mxu1 }
 0x98e   : > { %v3335_v12 = vpack.i.bf16 %v4427_v11, %v4425_v4  ;;  %v3125_v13 = vpop.f32.mrb[51].mxu1 }
 0x98f   : > { %v4431_v16 = vpop.f32.mrb[44].mxu0 }
 0x990   : > { %v3130_v55 = vpop.f32.mrb[45].mxu0 }
 0x991   : > { %v4433_v17 = vpop.f32.mrb[46].mxu0  ;;  %v2170_v55 = vld [vmem:[#allocation11 + $0xe8] sm:$0xff] }
 0x992   : > { %v3355_v18 = vpack.i.bf16 %v4433_v17, %v4431_v16  ;;  %v3131_v19 = vpop.f32.mrb[47].mxu0 }
 0x993   : > { %v4437_v61 = vpop.f32.mrb[52].mxu1 }
 0x994   : > { %v3136_v1 = vpop.f32.mrb[53].mxu1 }
 0x995   : > { %v4439_v20 = vpop.f32.mrb[54].mxu1 }
 0x996   : > { %v3365_v23 = vpack.i.bf16 %v4439_v20, %v4437_v61  ;;  %v3137_v15 = vpop.f32.mrb[55].mxu1 }
 0x997   : > { %v2004_v10 = vpop.f32.mrb[48].mxu0 }
 0x998   : > { %v2173_v26 = vadd.f32 %v2165_v21, %v2004_v10  ;;  %v3142_v29 = vpop.f32.mrb[49].mxu0  ;;  %v2171_v21 = vld [vmem:[#allocation11 + $0xf0] sm:$0xff] }
 0x999   : > { %v2007_v40 = vpop.f32.mrb[50].mxu0 }
 0x99a   : > { %v2174_v24 = vadd.f32 %v2166_v22, %v2007_v40  ;;  %v3143_v38 = vpop.f32.mrb[51].mxu0  ;;  %v2181_v43 = vsel %vm677_vm3, %v2173_v26, -inf  ;;  %v2172_v40 = vld [vmem:[#allocation11 + $0xf8] sm:$0xff] }
 0x99b   : > { %2182 = vmax.xlane.f32.xlu0 %v2181_v43 }
 0x99c   : > { %v2055_v47 = vpop.f32.mrb[56].mxu1  ;;  %v2184_v49 = vsel %vm677_vm3, %v2174_v24, -inf }
 0x99d   : > { %v2175_v45 = vadd.f32 %v2167_v31, %v2055_v47  ;;  %v3148_v53 = vpop.f32.mrb[57].mxu1  ;;  %2185 = vmax.xlane.f32.xlu1 %v2184_v49 }
 0x99e   : > { %v2058_v59 = vpop.f32.mrb[58].mxu1 }
 0x99f   : > { %v2176_v62 = vadd.f32 %v2168_v51, %v2058_v59  ;;  %v3149_v63 = vpop.f32.mrb[59].mxu1  ;;  %v2187_v2 = vsel %vm677_vm3, %v2175_v45, -inf  ;;  %v2106_v7 = vpop.f32.mrb[52].mxu0 }
 0x9a0   : > { %2188 = vmax.xlane.f32.xlu0 %v2187_v2  ;;  %v2177_v8 = vadd.f32 %v2169_v57, %v2106_v7  ;;  %v3154_v13 = vpop.f32.mrb[53].mxu0 }
 0x9a1   : > { %v2109_v19 = vpop.f32.mrb[54].mxu0  ;;  %v2190_v22 = vsel %vm677_vm3, %v2176_v62, -inf }
 0x9a2   : > { %v3155_v1 = vpop.f32.mrb[55].mxu0  ;;  %v2193_v15 = vsel %vm677_vm3, %v2177_v8, -inf  ;;  %v2178_v10 = vadd.f32 %v2170_v55, %v2109_v19 }
 0x9a3   : > { %2194 = vmax.xlane.f32.xlu1 %v2193_v15 }
 0x9a4   : > { %2191 = vmax.xlane.f32.xlu0 %v2190_v22  ;;  %v2157_v29 = vpop.f32.mrb[60].mxu1  ;;  %v2196_v53 = vsel %vm677_vm3, %v2178_v10, -inf }
 0x9a5   : > { %v2179_v38 = vadd.f32 %v2171_v21, %v2157_v29  ;;  %v3160_v43 = vpop.f32.mrb[61].mxu1 }
 0x9a6   : > { %v2160_v31 = vpop.f32.mrb[62].mxu1 }
 0x9a7   : > { %v2180_v47 = vadd.f32 %v2172_v40, %v2160_v31  ;;  %v3161_v49 = vpop.f32.mrb[63].mxu1  ;;  %v2199_v51 = vsel %vm677_vm3, %v2179_v38, -inf }
 0x9a8   : > { %2200 = vmax.xlane.f32.xlu1 %v2199_v51  ;;  %2197 = vmax.xlane.f32.xlu0 %v2196_v53 }
 0x9a9   : > { %v2202_v57 = vsel %vm677_vm3, %v2180_v47, -inf }
 0x9ac   : > { %2203 = vmax.xlane.f32.xlu0 %v2202_v57 }
 0x9b9   : > { %2273 = vrot.lane.b32.xlu1 %v4099_v34, %s3784_s10 }
 0xa28   : > { %v2183_v59 = vpop.xlane.xlu0 %2182 }
 0xa29   : > { %v2205_v63 = vsub.f32 %v2173_v26, %v2183_v59 }
 0xa2a   : > { %v2186_v2 = vpop.xlane.xlu1 %2185 }
 0xa2b   : > { %v2213_v7 = vmul.f32 1.442695, %v2205_v63  ;;  %v2206_v13 = vsub.f32 %v2174_v24, %v2186_v2 }
 0xa2d   : > { %3480 = vpow2.f32 %v2213_v7  ;;  %v2215_v55 = vmul.f32 1.442695, %v2206_v13  ;;  %v2189_v19 = vpop.xlane.xlu0 %2188 }
 0xa2e   : > { %v2207_v1 = vsub.f32 %v2175_v45, %v2189_v19 }
 0xa2f   : > { %3482 = vpow2.f32 %v2215_v55 }
 0xa30   : > { %v2217_v21 = vmul.f32 1.442695, %v2207_v1  ;;  %v2195_v15 = vpop.xlane.xlu1 %2194 }
 0xa31   : > { %v2209_v22 = vsub.f32 %v2177_v8, %v2195_v15  ;;  %v2192_v29 = vpop.xlane.xlu0 %2191 }
 0xa32   : > { %3484 = vpow2.f32 %v2217_v21  ;;  %v2208_v40 = vsub.f32 %v2176_v62, %v2192_v29 }
 0xa33   : > { %v2221_v43 = vmul.f32 1.442695, %v2209_v22 }
 0xa34   : > { %v2219_v31 = vmul.f32 1.442695, %v2208_v40 }
 0xa35   : > { %3486 = vpow2.f32 %v2221_v43  ;;  %v2201_v34 = vpop.xlane.xlu1 %2200  ;;  %v2198_v49 = vpop.xlane.xlu0 %2197 }
 0xa36   : > { %3488 = vpow2.f32 %v2219_v31  ;;  %v2211_v26 = vsub.f32 %v2179_v38, %v2201_v34  ;;  %v2210_v51 = vsub.f32 %v2178_v10, %v2198_v49 }
 0xa37   : > { %v3481_v24 = vpop.eup %3480 }
 0xa38   : > { %v2225_v53 = vmul.f32 1.442695, %v2211_v26  ;;  %v2223_v57 = vmul.f32 1.442695, %v2210_v51  ;;  %v2229_v45 = vsel %vm677_vm3, %v3481_v24, 0.0 }
 0xa39   : > { %v3483_v59 = vpop.eup %3482  ;;  %v2274_v63 = vpop.permute.xlu1 %2273  ;;  %2230 = vadd.xlane.f32.xlu1 %v2229_v45 }
 0xa3a   : > { %v2204_v2 = vpop.xlane.xlu0 %2203  ;;  %3490 = vpow2.f32 %v2225_v53  ;;  %3163 = vmatpush3.bf16.msra.mxu0 %v2274_v63  ;;  %v2232_v62 = vsel %vm677_vm3, %v3483_v59, 0.0  ;;  %v3383_v63 = vld [vmem:[#allocation8 + $0x8] sm:$0xff]  }
 0xa3b   : > { %v2212_v8 = vsub.f32 %v2180_v47, %v2204_v2  ;;  %3492 = vpow2.f32 %v2223_v57  ;;  %2233 = vadd.xlane.f32.xlu0 %v2232_v62  ;;  %3174 = vmatprep.subr.bf16.mxu0 %v3772_v14 }
 0xa3c   : > { %v3485_v38 = vpop.eup %3484 }
 0xa3d   : > { %v2227_v10 = vmul.f32 1.442695, %v2212_v8  ;;  %v2235_v7 = vsel %vm677_vm3, %v3485_v38, 0.0 }
 0xa3e   : > { %2236 = vadd.xlane.f32.xlu1 %v2235_v7 }
 0xa3f   : > { %3494 = vpow2.f32 %v2227_v10  ;;  %v3487_v13 = vpop.eup %3486 }
 0xa40   : > { %v3489_v55 = vpop.eup %3488  ;;  %v2241_v19 = vsel %vm677_vm3, %v3487_v13, 0.0 }
 0xa41   : > { %v2238_v1 = vsel %vm677_vm3, %v3489_v55, 0.0 }
 0xa42   : > { %2242 = vadd.xlane.f32.xlu1 %v2241_v19  ;;  %2239 = vadd.xlane.f32.xlu0 %v2238_v1 }
 0xa44   : > { %v4459_v47 = vpop.eup %3490 }
 0xa45   : > { %v3493_v21 = vpop.eup %3492  ;;  %v2247_v15 = vsel %vm677_vm3, %v4459_v47, 0.0 }
 0xa46   : > { %2248 = vadd.xlane.f32.xlu1 %v2247_v15  ;;  %v2244_v22 = vsel %vm677_vm3, %v3493_v21, 0.0 }
 0xa47   : > { %2245 = vadd.xlane.f32.xlu0 %v2244_v22 }
 0xa49   : > { %v3495_v29 = vpop.eup %3494 }
 0xa4a   : > { %v2250_v40 = vsel %vm677_vm3, %v3495_v29, 0.0 }
 0xa4b   : > { %2251 = vadd.xlane.f32.xlu0 %v2250_v40 }
 0xa57   : > { %2367 = vrot.lane.b32.xlu1 %v4101_v35, %s3784_s10 }
 0xa5b   : > { %2414 = vrot.lane.b32.xlu1 %v4097_v33, %s3784_s10 }
 0xa5f   : > { %3326 = vrot.lane.b32.xlu1 %v3325_v37, %s3785_s12 }
 0xa61   : > { %2320 = vrot.lane.b32.xlu0 %v4095_v32, %s3784_s10 }
 0xa63   : > { %3336 = vrot.lane.b32.xlu1 %v3335_v12, %s3786_s9 }
 0xa65   : > { %3321 = vrot.lane.b32.xlu0 %v3320_v28, %s3785_s12 }
 0xa67   : > { %3346 = vrot.lane.b32.xlu1 %v3345_v48, %s3785_s12 }
 0xa69   : > { %3331 = vrot.lane.b32.xlu0 %v3330_v6, %s3786_s9 }
 0xa6d   : > { %3341 = vrot.lane.b32.xlu0 %v3340_v42, %s3785_s12 }
 0xac6   : > { %v2231_v32 = vpop.xlane.xlu1 %2230 }
 0xac7   : > { %3496 = vrcp.f32 %v2231_v32 }
 0xac8   : > { %v2234_v33 = vpop.xlane.xlu0 %2233 }
 0xac9   : > { %3498 = vrcp.f32 %v2234_v33 }
 0xacb   : > { %v2237_v35 = vpop.xlane.xlu1 %2236 }
 0xacc   : > { %3500 = vrcp.f32 %v2237_v35 }
 0xacf   : > { %v2243_v25 = vpop.xlane.xlu1 %2242  ;;  %v2240_v27 = vpop.xlane.xlu0 %2239 }
 0xad0   : > { %3502 = vrcp.f32 %v2240_v27 }
 0xad1   : > { %v3497_v28 = vpop.eup %3496  ;;  %3504 = vrcp.f32 %v2243_v25 }
 0xad2   : > { %v2261_v37 = vmul.f32 %v3497_v28, %v3481_v24 }
 0xad3   : > { %v3499_v30 = vpop.eup %3498  ;;  %v2249_v36 = vpop.xlane.xlu1 %2248 }
 0xad4   : > { %v2262_v44 = vmul.f32 %v3499_v30, %v3483_v59  ;;  %v2246_v46 = vpop.xlane.xlu0 %2245  ;;  %v3382_v59 = vld [vmem:[#allocation8] sm:$0xff]  }
 0xad5   : > { %3506 = vrcp.f32 %v2246_v46 }
 0xad6   : > { %v2269_v48 = vpack.c.bf16 %v2262_v44, %v2261_v37  ;;  %3508 = vrcp.f32 %v2249_v36  ;;  %v3501_v42 = vpop.eup %3500 }
 0xad7   : > { %v2368_v39 = vpop.permute.xlu1 %2367  ;;  %v2263_v3 = vmul.f32 %v3501_v42, %v3485_v38 }
 0xad8   : > { %v2252_v41 = vpop.xlane.xlu0 %2251  ;;  %3165 = vmatmul.mubr.msk.bf16.vlgmr.msra.gmra.mrb[56].mxu0 %vm677_vm3, %v2269_v48 }
 0xad9   : > { %3510 = vrcp.f32 %v2252_v41  ;;  %3175 = vmatpush3.bf16.msra.mxu0 %v2368_v39  ;;  %3176 = vmatprep.mubr.msk.bf16.mxu0 %vm3773_vm1, %v3772_v14 }
 0xada   : > { %v3503_v0 = vpop.eup %3502  ;;  %3186 = vmatprep.subr.bf16.mxu0 %v3382_v59 }
 0xadb   : > { %v2264_v6 = vmul.f32 %v3503_v0, %v3489_v55  ;;  %v3505_v11 = vpop.eup %3504  ;;  %v2415_v49 = vpop.permute.xlu1 %2414 }
 0xadc   : > { %v2321_v4 = vpop.permute.xlu0 %2320  ;;  %v2265_v31 = vmul.f32 %v3505_v11, %v3487_v13 }
 0xadd   : > { %3169 = vmatpush3.bf16.msra.mxu1 %v2321_v4  ;;  %v2270_v12 = vpack.c.bf16 %v2264_v6, %v2263_v3 }
 0xade   : > { %3180 = vmatprep.subr.bf16.mxu1 %v3772_v14 }
 0xadf   : > { %v3507_v43 = vpop.eup %3506  ;;  %v3327_v35 = vpop.permute.xlu1 %3326 }
 0xae0   : > { %v2266_v34 = vmul.f32 %v3507_v43, %v3493_v21  ;;  %3171 = vmatmul.mubr.msk.bf16.vlgmr.msra.gmra.mrb[64].mxu1 %vm677_vm3, %v2270_v12  ;;  %v3509_v26 = vpop.eup %3508  ;;  %v3329_v0 = vunpack.i.h.bf16 %v3327_v35  ;;  %v3328_v3 = vunpack.i.l.bf16 %v3327_v35 }
 0xae1   : > { %3181 = vmatpush3.bf16.msra.mxu1 %v2415_v49  ;;  %3182 = vmatprep.mubr.msk.bf16.mxu1 %vm3773_vm1, %v3772_v14  ;;  %v2267_v53 = vmul.f32 %v3509_v26, %v4459_v47 }
 0xae2   : > { %v2271_v51 = vpack.c.bf16 %v2266_v34, %v2265_v31  ;;  %v2559_v43 = vsel %vm463_vm2, %v4239_v58, %v3328_v3 }
 0xae3   : > { %v3511_v24 = vpop.eup %3510  ;;  %v3337_v30 = vpop.permute.xlu1 %3336 }
 0xae4   : > { %v2268_v57 = vmul.f32 %v3511_v24, %v3495_v29  ;;  %3177 = vmatmul.mubr.msk.bf16.vlgmr.msra.gmra.mrb[60].mxu0 %vm677_vm3, %v2271_v51  ;;  %v3339_v11 = vunpack.i.h.bf16 %v3337_v30  ;;  %v3338_v12 = vunpack.i.l.bf16 %v3337_v30 }
 0xae5   : > { %3187 = vmatpush3.bf16.msra.mxu0 %v3382_v59 }
 0xae6   : > { %v2272_v45 = vpack.c.bf16 %v2268_v57, %v2267_v53  ;;  %3188 = vmatprep.subr.bf16.mxu0 %v3383_v63  ;;  %v2567_v24 = vsel %vm677_vm3, %v2559_v43, %v3338_v12 }
 0xae7   : > { %v3347_v6 = vpop.permute.xlu1 %3346 }
 0xae8   : > { %3183 = vmatmul.mubr.msk.bf16.vlgmr.msra.gmra.mrb[68].mxu1 %vm677_vm3, %v2272_v45 }
 0xae9   : > { %3189 = vmatpush3.bf16.msra.mxu0 %v3383_v63 }
 0xbab   : > { %v2313_v2 = vpop.f32.mrb[56].mxu0 }
 0xbac   : > { %v3166_v8 = vpop.f32.mrb[57].mxu0 }
 0xbad   : > { %v2316_v62 = vpop.f32.mrb[58].mxu0 }
 0xbae   : > { %v3350_v14 = vpack.i.bf16 %v2316_v62, %v2313_v2  ;;  %v3167_v38 = vpop.f32.mrb[59].mxu0  ;;  %v3349_v2 = vunpack.i.h.bf16 %v3347_v6 }
 0xbb0   : > { %3351 = vrot.lane.b32.xlu0 %v3350_v14, %s3787_s28 }
 0xbb3   : > { %v2360_v10 = vpop.f32.mrb[64].mxu1 }
 0xbb4   : > { %v3172_v7 = vpop.f32.mrb[65].mxu1  ;;  %3356 = vrot.lane.b32.xlu0 %v3355_v18, %s3786_s9  ;;  %v3322_v18 = vpop.permute.xlu0 %3321 }
 0xbb5   : > { %v2363_v13 = vpop.f32.mrb[66].mxu1  ;;  %v3324_v27 = vunpack.i.h.bf16 %v3322_v18  ;;  %v3323_v28 = vunpack.i.l.bf16 %v3322_v18 }
 0xbb6   : > { %v3360_v55 = vpack.i.bf16 %v2363_v13, %v2360_v10  ;;  %v3173_v19 = vpop.f32.mrb[67].mxu1 }
 0xbb7   : > { %v2407_v1 = vpop.f32.mrb[60].mxu0  ;;  %v2558_v61 = vsel %vm463_vm2, %v4233_v52, %v3324_v27  ;;  %v2557_v20 = vsel %vm463_vm2, %v4231_v50, %v3323_v28  ;;  %v2560_v50 = vsel %vm463_vm2, %v4241_v60, %v3329_v0  ;;  %v3348_v60 = vunpack.i.l.bf16 %v3347_v6 }
 0xbb8   : > { %v3178_v47 = vpop.f32.mrb[61].mxu0  ;;  %3361 = vrot.lane.b32.xlu1 %v3360_v55, %s3787_s28  ;;  %v3332_v33 = vpop.permute.xlu0 %3331  ;;  %v2568_v53 = vsel %vm677_vm3, %v2560_v50, %v3339_v11 }
 0xbb9   : > { %v2410_v21 = vpop.f32.mrb[62].mxu0  ;;  %v3334_v36 = vunpack.i.h.bf16 %v3332_v33  ;;  %v3333_v37 = vunpack.i.l.bf16 %v3332_v33 }
 0xbba   : > { %v3370_v15 = vpack.i.bf16 %v2410_v21, %v2407_v1  ;;  %v3179_v22 = vpop.f32.mrb[63].mxu0 }
 0xbbb   : > { %v2454_v29 = vpop.f32.mrb[68].mxu1  ;;  %v2565_v48 = vsel %vm677_vm3, %v2557_v20, %v3333_v37  ;;  %v2566_v39 = vsel %vm677_vm3, %v2558_v61, %v3334_v36 }
 0xbbc   : > { %3371 = vrot.lane.b32.xlu0 %v3370_v15, %s3787_s28  ;;  %3366 = vrot.lane.b32.xlu1 %v3365_v23, %s3786_s9  ;;  %v3184_v40 = vpop.f32.mrb[69].mxu1  ;;  %v3342_v25 = vpop.permute.xlu0 %3341 }
 0xbbd   : > { %v2457_v32 = vpop.f32.mrb[70].mxu1  ;;  %v3344_v34 = vunpack.i.h.bf16 %v3342_v25  ;;  %v3343_v49 = vunpack.i.l.bf16 %v3342_v25 }
 0xbbe   : > { %v3375_v16 = vpack.i.bf16 %v2457_v32, %v2454_v29  ;;  %v3185_v17 = vpop.f32.mrb[71].mxu1 }
 0xbbf   : > { %v2562_v14 = vsel %vm463_vm2, %v4237_v56, %v3344_v34  ;;  %v2561_v38 = vsel %vm463_vm2, %v4235_v54, %v3343_v49  ;;  %v2564_v56 = vsel %vm463_vm2, %v4246_v9, %v3349_v2  ;;  %v2563_v54 = vsel %vm463_vm2, %v4243_v5, %v3348_v60  ;;  %v2889_v9 = vld [vmem:[#allocation10] ss:$0 sm:$0xff] }
 0xbc0   : > { %3376 = vrot.lane.b32.xlu1 %v3375_v16, %s3787_s28 }
 0xc22   : > { %v3352_v44 = vpop.permute.xlu0 %3351 }
 0xc23   : > { %v3354_v23 = vunpack.i.h.bf16 %v3352_v44  ;;  %v3353_v46 = vunpack.i.l.bf16 %v3352_v44 }
 0xc25   : > { %v2574_v41 = vsel %vm2573_vm4, %v2565_v48, %v3353_v46  ;;  %v2575_v42 = vsel %vm2573_vm4, %v2566_v39, %v3354_v23 }
 0xc26   : > { %v2582_v4 = vpack.c.bf16 %v2575_v42, %v2574_v41  ;;  %v3357_v52 = vpop.permute.xlu0 %3356 }
 0xc27   : > { %v3359_v57 = vunpack.i.h.bf16 %v3357_v52  ;;  %v3358_v45 = vunpack.i.l.bf16 %v3357_v52 }
 0xc28   : > { %3190 = vmatprep.mubr.msk.bf16.mxu0 %vm378_vm0, %v2582_v4 }
 0xc29   : > { %v2569_v13 = vsel %vm677_vm3, %v2561_v38, %v3358_v45  ;;  %v2570_v55 = vsel %vm677_vm3, %v2562_v14, %v3359_v57 }
 0xc2a   : > { %v3362_v31 = vpop.permute.xlu1 %3361 }
 0xc2b   : > { %v3364_v26 = vunpack.i.h.bf16 %v3362_v31  ;;  %v3363_v51 = vunpack.i.l.bf16 %v3362_v31 }
 0xc2d   : > { %v2577_v59 = vsel %vm2573_vm4, %v2568_v53, %v3364_v26  ;;  %v2576_v63 = vsel %vm2573_vm4, %v2567_v24, %v3363_v51 }
 0xc2e   : > { %v2583_v8 = vpack.c.bf16 %v2577_v59, %v2576_v63  ;;  %v3367_v62 = vpop.permute.xlu1 %3366  ;;  %v3372_v58 = vpop.permute.xlu0 %3371 }
 0xc2f   : > { %v3374_v10 = vunpack.i.h.bf16 %v3372_v58  ;;  %v3373_v7 = vunpack.i.l.bf16 %v3372_v58  ;;  %v3369_v19 = vunpack.i.h.bf16 %v3367_v62  ;;  %v3368_v1 = vunpack.i.l.bf16 %v3367_v62 }
 0xc30   : > { %3191 = vmatmul.mubr.msk.bf16.vlgmr.msra.gmra.mrb[64].mxu0 %vm378_vm0, %v2583_v8 }
 0xc31   : > { %v2578_v47 = vsel %vm2573_vm4, %v2569_v13, %v3373_v7  ;;  %v2579_v21 = vsel %vm2573_vm4, %v2570_v55, %v3374_v10  ;;  %v2572_v32 = vsel %vm677_vm3, %v2564_v56, %v3369_v19  ;;  %v2571_v16 = vsel %vm677_vm3, %v2563_v54, %v3368_v1 }
 0xc32   : > { %v2584_v15 = vpack.c.bf16 %v2579_v21, %v2578_v47  ;;  %v3377_v22 = vpop.permute.xlu1 %3376 }
 0xc33   : > { %v3379_v29 = vunpack.i.h.bf16 %v3377_v22  ;;  %v3378_v40 = vunpack.i.l.bf16 %v3377_v22 }
 0xc34   : > { %3194 = vmatprep.mubr.msk.bf16.mxu0 %vm378_vm0, %v2584_v15 }
 0xc35   : > { %v2581_v17 = vsel %vm2573_vm4, %v2572_v32, %v3379_v29  ;;  %v2580_v18 = vsel %vm2573_vm4, %v2571_v16, %v3378_v40 }
 0xc36   : > { %v2585_v33 = vpack.c.bf16 %v2581_v17, %v2580_v18 }
 0xc38   : > { %3195 = vmatmul.mubr.msk.bf16.gmra.mrb[68].mxu0 %vm378_vm0, %v2585_v33 }
 0xd03   : > { %v3192_v35 = vpop.f32.mrb[64].mxu0 }
 0xd04   : > { %v2664_v5 = vadd.f32 %v3192_v35, %v2889_v9  ;;  %v2655_v25 = vpop.f32.mrb[65].mxu0 }
 0xd05   : > { %v2656_v27 = vadd.f32 %v2889_v9, %v2655_v25  ;;  %v3193_v28 = vpop.f32.mrb[66].mxu0 }
 0xd06   : > { %2688 = vst.msk [vmem:[%s339_s26 + $0x10] sm:$0xff] %vm378_vm0, %v2664_v5  ;;  %v2667_v30 = vadd.f32 %v3193_v28, %v2889_v9  ;;  %v2658_v36 = vpop.f32.mrb[67].mxu0 }
 0xd07   : > { %2686 = vst.msk [vmem:[%s339_s26] sm:$0xff] %vm378_vm0, %v2656_v27  ;;  %v2659_v37 = vadd.f32 %v2889_v9, %v2658_v36 }
 0xd08   : > { %2689 = vst.msk [vmem:[%s339_s26 + $0x18] sm:$0xff] %vm378_vm0, %v2667_v30 }
 0xd09   : > { %2687 = vst.msk [vmem:[%s339_s26 + $0x8] sm:$0xff] %vm378_vm0, %v2659_v37 }
 0xd0b   : > { %v3196_v44 = vpop.f32.mrb[68].mxu0 }
 0xd0c   : > { %v2680_v61 = vadd.f32 %v3196_v44, %v2889_v9  ;;  %v2671_v20 = vpop.f32.mrb[69].mxu0 }
 0xd0d   : > { %v2672_v23 = vadd.f32 %v2889_v9, %v2671_v20  ;;  %v3197_v46 = vpop.f32.mrb[70].mxu0 }
 0xd0e   : > { %2692 = vst.msk [vmem:[%s339_s26 + $0x30] sm:$0xff] %vm378_vm0, %v2680_v61  ;;  %v2683_v48 = vadd.f32 %v3197_v46, %v2889_v9  ;;  %v2674_v39 = vpop.f32.mrb[71].mxu0 }
 0xd0f   : > { %2690 = vst.msk [vmem:[%s339_s26 + $0x20] sm:$0xff] %vm378_vm0, %v2672_v23  ;;  %v2675_v41 = vadd.f32 %v2889_v9, %v2674_v39 }
 0xd10   : > { %2693 = vst.msk [vmem:[%s339_s26 + $0x38] sm:$0xff] %vm378_vm0, %v2683_v48 }
 0xd11   : > { %2691 = vst.msk [vmem:[%s339_s26 + $0x28] sm:$0xff] %vm378_vm0, %v2675_v41 }
 0xd12   : > { %3695 = shalt.err (!%p3692_p8)
}
 0xd13   : > { %s3696_s10 = scalar_lea.hbm %s4560_s13, 1024  ;;  %s3700_s26 = scalar_lea.hbm %s4616_s6, 2048 }
 0xd14   : > { %p3697_p6 = scmp.ne.s32.totalorder %s4560_s13, %s3696_s10  ;;  %p3701_p0 = scmp.lt.u32.totalorder %s4560_s13, %s4616_s6 }
 0xd15   : > { %p3702_p5 = scmp.lt.u32.totalorder %s3700_s26, %s3696_s10  ;;  %p3704_p7 = scmp.lt.u32.totalorder %s3696_s10, %s4560_s13 }
 0xd16   : > { %p3698_p10 = pnand %p3697_p6, %p4635_p4 }
 0xd17   : > { %p3703_p9 = por %p3702_p5, %p3701_p0 }
 0xd18   : > { %p3699_p11 = pneg %p3698_p10 }
 0xd19   : > { %p3705_p12 = por %p3704_p7, %p3703_p9 }
 0xd1b   : > { %p3706_p13 = pnand %p3705_p12, %p3699_p11 }
 0xd1d   : > { %3709 = shalt.err (!%p3706_p13)
}
 0xd1e   : > { %s3789_s11 = smov 128  }
 0xd1f   : > { %3224 = dma.vmem_to_hbm [thread:$0]  (%p4635_p4), %s4563_s14, 1024, %s4560_s13, %s2695_s27, %s3789_s11, %s3789_s11, %s3785_s12  }
 0xd20 PF: > { %s2724_s19 = sand.u32 1, %s3748_s21   ;;  %p4636_p1 = scmp.ne.s32.totalorder %s4626_s17, 0 }
 0xd21   : > { %p4637_p3 = scmp.ge.s32.totalorder %s3760_s24, 2  ;;  %s2725_s16 = scalar_lea.sflag [#allocation4], %s2724_s19 }
 0xd23   : > { %p3247_p2 = pnand %p4637_p3, %p4636_p1 }
 0xd25   : > { %3743 = dma.done.wait (!%p3247_p2), %s2725_s16, 1024  }
 0xd26   : > { %3745 = vsyncadd (!%p3247_p2), %s2725_s16, 4294966272  ;;  %p22_p8 = scmp.ge.s32.totalorder %s3987_s30, 4   ;;  %s4638_s21 = smov %s3752_s22 }
 0xd27   : > { %s4639_s22 = smov %s3756_s23  ;;  %s4640_s23 = smov %s3999_s7 }
 0xd28   : > { %s4641_s24 = smov %s3987_s30  ;;  %24 = sbr.rel (!%p22_p8) target bundleno = 8 (0x8), region = 112 }
 0xd2f   :  { %2730 = vsyncpa [#allocation3], 1 }
 0xd30   :  { %2732 = vsyncpa [#allocation3 + $0x1], 1 }
 0xd31   :  { %2733 = vsyncpa [#allocation6], 1 }
 0xd32   :  { %2734 = vsyncpa [#allocation9], 1 }
 0xd33   :  { %2735 = vsyncpa [#allocation12], 1 }
 0xd34   :  { %2736 = vsyncpa [#allocation4], 1 }
 0xd35   :  { %2738 = vsyncpa [#allocation4 + $0x1], 1 }

</bundles_post_ra>
